<compile_context>
chip_gen: v5e
topology: v5e:2x2
jax: 0.10.0
libtpu: 0.0.40
codegen_flags: <defaults>
</compile_context>

<pallas_src>
import functools

import jax
import jax.numpy as jnp
from jax import lax
from jax.experimental import pallas as pl
from jax.experimental.pallas import tpu as pltpu


def _round_up(x, m):
    return (x + m - 1) // m * m


# ----------------------------- Pallas kernel ------------------------------- #
def _maevq_kernel(patches_ref, w_enc_ref, b_enc_ref, cb_ref, cb2h_ref,
                  w_dec_ref, b_dec_ref, recon_ref, loss_ref,
                  *, keep_col, valid_col, k_chunk):
    f32 = jnp.float32
    bf16 = jnp.bfloat16

    pr = patches_ref[...]                                    # (tm, Cpp_pad) bf16
    tm = pr.shape[0]
    # side-channel lanes carry exact 0/1 flags (exact in bf16)
    keep = pr[:, keep_col:keep_col + 1].astype(f32)          # (tm, 1)
    valid = pr[:, valid_col:valid_col + 1].astype(f32)       # (tm, 1)

    # ---- patch embedding (== Conv2d(C_in, D, kernel=p, stride=p)); bf16 MXU, f32 acc
    x = jnp.dot(pr, w_enc_ref[...], preferred_element_type=f32) + b_enc_ref[...]
    xm = x * keep                                            # masked tokens -> 0
    xm_bf = xm.astype(bf16)

    # ---- VectorQuantizer: nearest codebook entry, chunked over K ----
    K_pad, D_pad = cb_ref.shape
    n_chunks = K_pad // k_chunk
    best = jnp.full((tm, 1), jnp.inf, f32)                   # running min score
    quant = jnp.zeros((tm, D_pad), f32)                      # selected codebook rows
    for c in range(n_chunks):                                # static unroll
        cb_c = cb_ref[c * k_chunk:(c + 1) * k_chunk, :]      # (kc, D_pad) bf16
        # argmin_k ||x||^2/2 + ||c_k||^2/2 - x.c_k ; per-row-constant ||x||^2 dropped,
        # positive 0.5 scaling preserves the argmin.
        cross = lax.dot_general(xm_bf, cb_c, (((1,), (1,)), ((), ())),
                                preferred_element_type=f32)  # (tm, kc) = xm @ cb_c.T
        score = cb2h_ref[:, c * k_chunk:(c + 1) * k_chunk] - cross
        min_c = jnp.min(score, axis=1, keepdims=True)        # (tm, 1)
        iota_k = lax.broadcasted_iota(jnp.int32, score.shape, 1)
        idx_c = jnp.min(jnp.where(score == min_c, iota_k, k_chunk),
                        axis=1, keepdims=True)               # first-index tie-break
        enc = (iota_k == idx_c).astype(bf16)                 # one-hot, bool->bf16
        q_c = jnp.dot(enc, cb_c, preferred_element_type=f32) # codebook row "gather"
        take = min_c < best                                  # earlier chunks win ties
        quant = jnp.where(take, q_c, quant)
        best = jnp.where(take, min_c, best)

    # per-tile partial sum of squared error; padded rows excluded via `valid`.
    # (1 + commitment_cost) / (M * D) scaling is applied in the wrapper.
    diff = (quant - xm) * valid
    loss_ref[...] = jnp.zeros(loss_ref.shape, f32) + jnp.sum(diff * diff)

    # straight-through forward value == quant ; ---- SimpleDecoder linear ----
    y = jnp.dot(quant.astype(bf16), w_dec_ref[...],
                preferred_element_type=f32) + b_dec_ref[...]  # (tm, Pout_pad)
    recon_ref[...] = y.astype(recon_ref.dtype)               # bf16 writeback


# --------------------------- sizing heuristics ------------------------------ #
def _vmem_limit_bytes():
    cap = 64 * 1024 * 1024
    try:
        cap = int(pltpu.get_tpu_info().vmem_capacity_bytes)
    except Exception:
        pass
    # generation-aware scoped limit: v5e/v6e (128 MiB) -> 96 MiB, v7x (64 MiB) -> 48 MiB
    return max(32 * 1024 * 1024, min(96 * 1024 * 1024, cap * 3 // 4))


def _choose_tm(M, per_row_bytes, tile_budget):
    candidates = [t for t in (2048, 1024, 512, 256, 128)
                  if t * per_row_bytes <= tile_budget] or [128]
    # largest fitting tile that still leaves enough grid steps for pipelining and
    # for v7x's two TensorCores; relax for small M, single tile for tiny M.
    for steps in (8, 4, 2):
        for t in candidates:
            if pl.cdiv(M, t) >= steps:
                return t
    return min(candidates[-1], _round_up(max(M, 8), 8))


# ------------------------------- wrapper ------------------------------------ #
def maevq_forward(x_nchw, params, mask_key, *, mask_ratio=0.4,
                  patch_size=4, commitment_cost=0.25):
    """Returns (recon [B, C_out, H_img, W_img], vq_loss scalar)."""
    f32 = jnp.float32
    bf16 = jnp.bfloat16

    B, C_in, Himg, Wimg = x_nchw.shape
    p = patch_size
    H, W = Himg // p, Wimg // p
    N = H * W
    M = B * N

    codebook = params["codebook"].astype(f32)                # (K, D)
    K, D = codebook.shape
    w_dec = params["w_dec"].astype(f32)                      # (D, Pout)
    Pout = w_dec.shape[1]
    C_out = Pout // (p * p)
    Cpp = C_in * p * p

    # ---- lane-dense padded sizes (last dims -> multiples of 128) ----
    Cpp_pad = _round_up(Cpp + 2, 128)     # +2 spare lanes: keep / valid side channel
    D_pad = _round_up(D, 128)
    Pout_pad = _round_up(Pout, 128)
    K_pad = _round_up(K, 128)
    k_chunk = K_pad if K_pad <= 1024 else 1024               # bound (tm, K) f32 live set
    K_pad = _round_up(K_pad, k_chunk)
    keep_col, valid_col = Cpp_pad - 1, Cpp_pad - 2

    # ---- VMEM-budget-aware M-tile choice ----
    vmem_limit = _vmem_limit_bytes()
    weight_bytes = (2 * (Cpp_pad * D_pad + K_pad * D_pad + D_pad * Pout_pad)
                    + 4 * (D_pad + K_pad + Pout_pad))
    per_row_bytes = (4 * Cpp_pad + 4 * Pout_pad      # double-buffered bf16 in/out tiles
                     + 10 * D_pad + 6 * Pout_pad     # x/xm/quant f32 + bf16 copies + y
                     + 14 * k_chunk)                 # cross/score/iota/one-hot per chunk
    tile_budget = max((vmem_limit - 2 * weight_bytes) // 2, 1 << 20)
    tm = _choose_tm(M, per_row_bytes, tile_budget)
    M_pad = _round_up(M, tm)
    grid_m = M_pad // tm

    # ---- unfold NCHW into bf16 patch rows (c, p1, p2), one write into padded buffer
    patches = (x_nchw.astype(bf16)
               .reshape(B, C_in, H, p, W, p)
               .transpose(0, 2, 4, 1, 3, 5)
               .reshape(M, Cpp))
    # mask = rand(B, N) < mask_ratio ; keep = 1 - mask  (RNG differs from torch)
    u = jax.random.uniform(mask_key, (B, N), dtype=f32)
    keep = (u >= mask_ratio).reshape(M).astype(bf16)
    patches_pad = jnp.zeros((M_pad, Cpp_pad), bf16)
    patches_pad = patches_pad.at[:M, :Cpp].set(patches)
    patches_pad = patches_pad.at[:M, valid_col].set(jnp.ones((M,), bf16))
    patches_pad = patches_pad.at[:M, keep_col].set(keep)

    # conv weight (D, C_in, p, p) -> (C_in*p*p, D), zero-padded (flag lanes hit 0 rows)
    w_enc = params["w_enc"].astype(f32).reshape(D, Cpp).T
    w_enc_pad = jnp.pad(w_enc, ((0, Cpp_pad - Cpp), (0, D_pad - D))).astype(bf16)
    b_enc_pad = jnp.pad(params["b_enc"].astype(f32).reshape(1, D),
                        ((0, 0), (0, D_pad - D)))

    cb_bf = jnp.pad(codebook, ((0, K_pad - K), (0, D_pad - D))).astype(bf16)
    # 0.5*||c_k||^2 from the same bf16-rounded codes used in the cross matmul; padded
    # fake codes get +1e30 so they can never win the argmin.
    cb2_half = 0.5 * jnp.sum(cb_bf.astype(f32) ** 2, axis=1).reshape(1, K_pad)
    cb2_half = cb2_half + jnp.where(jnp.arange(K_pad) >= K, 1e30, 0.0).reshape(1, K_pad)

    w_dec_pad = jnp.pad(w_dec, ((0, D_pad - D), (0, Pout_pad - Pout))).astype(bf16)
    b_dec_pad = jnp.pad(params["b_dec"].astype(f32).reshape(1, Pout),
                        ((0, 0), (0, Pout_pad - Pout)))

    kernel = functools.partial(_maevq_kernel, keep_col=keep_col,
                               valid_col=valid_col, k_chunk=k_chunk)

    def _run(weight_mode):
        def wspec(shape):
            if weight_mode is None:
                return pl.BlockSpec(shape, lambda i: (0, 0))
            return pl.BlockSpec(shape, lambda i: (0, 0), pipeline_mode=weight_mode)
        return pl.pallas_call(
            kernel,
            out_shape=(jax.ShapeDtypeStruct((M_pad, Pout_pad), bf16),
                       jax.ShapeDtypeStruct((grid_m, 8, 128), f32)),
            grid=(grid_m,),
            in_specs=[
                pl.BlockSpec((tm, Cpp_pad), lambda i: (i, 0)),   # patches (tiled over M)
                wspec((Cpp_pad, D_pad)),                         # w_enc
                wspec((1, D_pad)),                               # b_enc
                wspec((K_pad, D_pad)),                           # codebook
                wspec((1, K_pad)),                               # 0.5*||codebook||^2
                wspec((D_pad, Pout_pad)),                        # w_dec
                wspec((1, Pout_pad)),                            # b_dec
            ],
            out_specs=(
                pl.BlockSpec((tm, Pout_pad), lambda i: (i, 0)),  # recon (tiled, bf16)
                pl.BlockSpec((1, 8, 128), lambda i: (i, 0, 0)),  # per-tile loss partials
            ),
            compiler_params=pltpu.CompilerParams(
                dimension_semantics=("parallel",),               # tiles are independent
                vmem_limit_bytes=int(vmem_limit)),
        )(patches_pad, w_enc_pad, b_enc_pad, cb_bf, cb2_half, w_dec_pad, b_dec_pad)

    try:
        # grid-invariant weights: single-buffered so they are not duplicated in VMEM
        recon_pad, loss_parts = _run(pl.Buffered(1))
    except Exception:
        recon_pad, loss_parts = _run(None)   # fall back to default double-buffering

    # q_latent_loss + commitment_cost * e_latent_loss (both equal MSE numerically)
    vq_loss = (1.0 + commitment_cost) * jnp.sum(loss_parts[:, 0, 0]) / jnp.float32(M * D)

    # rearrange 'b (h w) (p1 p2 c) -> b c (h p1) (w p2)' (bf16 read, f32 at the end)
    recon = (recon_pad[:M, :Pout]
             .reshape(B, H, W, p, p, C_out)
             .transpose(0, 5, 1, 3, 2, 4)
             .reshape(B, C_out, H * p, W * p)
             .astype(f32))
    return recon, vq_loss


# --------------------------- parameter init --------------------------------- #
def init_params(key, *, embed_dim, num_codes, c_in, c_out, patch_size):
    p = patch_size
    k_enc, k_cb, k_dec = jax.random.split(key, 3)
    return {
        # conv patch-embed weight / bias (PyTorch Conv2d layout: (D, C_in, p, p))
        "w_enc": 0.02 * jax.random.normal(k_enc, (embed_dim, c_in, p, p), jnp.float32),
        "b_enc": jnp.zeros((embed_dim,), jnp.float32),
        # VQ codebook: uniform(-1/K, 1/K) as in the PyTorch __init__
        "codebook": jax.random.uniform(k_cb, (num_codes, embed_dim), jnp.float32,
                                       minval=-1.0 / num_codes, maxval=1.0 / num_codes),
        # decoder Linear(embed_dim -> p*p*c_out), stored as (in, out)
        "w_dec": 0.02 * jax.random.normal(k_dec, (embed_dim, p * p * c_out), jnp.float32),
        "b_dec": jnp.zeros((p * p * c_out,), jnp.float32),
    }


if __name__ == "__main__":
    # Small, self-consistent shapes (scaled-down ViT patch embed):
    #   images 8x3x32x32, patch=4  ->  H=W=8, N=64 tokens, M=512 rows
    #   embed_dim=128, codebook entries=256, decoder out_channels=3
    #   -> tm=128, grid=(4,): exercises the tiled / pipelined path.
    B, C_IN, IMG, PATCH = 8, 3, 32, 4
    EMBED_DIM, NUM_CODES, C_OUT = 128, 256, 3

    root = jax.random.PRNGKey(0)
    k_params, k_x, k_mask = jax.random.split(root, 3)

    params = init_params(k_params, embed_dim=EMBED_DIM, num_codes=NUM_CODES,
                         c_in=C_IN, c_out=C_OUT, patch_size=PATCH)
    x = jax.random.normal(k_x, (B, C_IN, IMG, IMG), jnp.float32)

    recon, vq_loss = maevq_forward(x, params, k_mask, mask_ratio=0.4,
                                   patch_size=PATCH, commitment_cost=0.25)
    jax.block_until_ready((recon, vq_loss))

    assert recon.shape == (B, C_OUT, IMG, IMG), recon.shape
    assert vq_loss.shape == (), vq_loss.shape
    assert bool(jnp.isfinite(vq_loss)), vq_loss
    print("KERNEL_OK")
</pallas_src>

<mosaic_0001>
module attributes {stable_mosaic.version = 11 : i64} {
  func.func @_maevq_kernel(%arg0: i32, %arg1: memref<128x128xbf16, #tpu.memory_space<vmem>>, %arg2: memref<128x128xbf16, #tpu.memory_space<vmem>>, %arg3: memref<1x128xf32, #tpu.memory_space<vmem>>, %arg4: memref<256x128xbf16, #tpu.memory_space<vmem>>, %arg5: memref<1x256xf32, #tpu.memory_space<vmem>>, %arg6: memref<128x128xbf16, #tpu.memory_space<vmem>>, %arg7: memref<1x128xf32, #tpu.memory_space<vmem>>, %arg8: memref<128x128xbf16, #tpu.memory_space<vmem>>, %arg9: memref<1x8x128xf32, #tpu.memory_space<vmem>>) attributes {dimension_semantics = [#tpu.dimension_semantics<parallel>], iteration_bounds = array<i64: 4>, scalar_prefetch = 0 : i64, scratch_operands = 0 : i64, tpu.core_type = #tpu.core_type<tc>, window_params = [{transform_indices = @transform_0, window_bounds = array<i64: 128, 128>}, {pipeline_mode = #tpu.pipeline_mode<synchronous>, transform_indices = @transform_1, window_bounds = array<i64: 128, 128>}, {pipeline_mode = #tpu.pipeline_mode<synchronous>, transform_indices = @transform_2, window_bounds = array<i64: 1, 128>}, {pipeline_mode = #tpu.pipeline_mode<synchronous>, transform_indices = @transform_3, window_bounds = array<i64: 256, 128>}, {pipeline_mode = #tpu.pipeline_mode<synchronous>, transform_indices = @transform_4, window_bounds = array<i64: 1, 256>}, {pipeline_mode = #tpu.pipeline_mode<synchronous>, transform_indices = @transform_5, window_bounds = array<i64: 128, 128>}, {pipeline_mode = #tpu.pipeline_mode<synchronous>, transform_indices = @transform_6, window_bounds = array<i64: 1, 128>}, {transform_indices = @transform_7, window_bounds = array<i64: 128, 128>}, {transform_indices = @transform_8, window_bounds = array<i64: 1, 8, 128>}]} {
    %c0 = arith.constant 0 : index
    %c0_0 = arith.constant 0 : index
    %0 = vector.load %arg1[%c0, %c0_0] : memref<128x128xbf16, #tpu.memory_space<vmem>>, vector<128x128xbf16>
    %1 = vector.extract_strided_slice %0 {offsets = [0, 127], sizes = [128, 1], strides = [1, 1]} : vector<128x128xbf16> to vector<128x1xbf16>
    %2 = arith.extf %1 : vector<128x1xbf16> to vector<128x1xf32>
    %3 = vector.extract_strided_slice %0 {offsets = [0, 126], sizes = [128, 1], strides = [1, 1]} : vector<128x128xbf16> to vector<128x1xbf16>
    %4 = arith.extf %3 : vector<128x1xbf16> to vector<128x1xf32>
    %c0_1 = arith.constant 0 : index
    %c0_2 = arith.constant 0 : index
    %5 = vector.load %arg2[%c0_1, %c0_2] : memref<128x128xbf16, #tpu.memory_space<vmem>>, vector<128x128xbf16>
    %cst = arith.constant dense<0.000000e+00> : vector<128x128xf32>
    %6 = tpu.matmul %0, %5, %cst {dimension_numbers = #tpu.dot_dimension_numbers<[1], [0], [0], [1], [0, 0, 1, 1], [], []>} : vector<128x128xbf16>, vector<128x128xbf16>, vector<128x128xf32> -> vector<128x128xf32>
    %c0_3 = arith.constant 0 : index
    %c0_4 = arith.constant 0 : index
    %7 = vector.load %arg3[%c0_3, %c0_4] : memref<1x128xf32, #tpu.memory_space<vmem>>, vector<1x128xf32>
    %8 = vector.broadcast %7 : vector<1x128xf32> to vector<128x128xf32>
    %9 = arith.addf %6, %8 : vector<128x128xf32>
    %10 = vector.broadcast %2 : vector<128x1xf32> to vector<128x128xf32>
    %11 = arith.mulf %9, %10 : vector<128x128xf32>
    %12 = arith.truncf %11 : vector<128x128xf32> to vector<128x128xbf16>
    %cst_5 = arith.constant 0x7F800000 : f32
    %13 = vector.broadcast %cst_5 : f32 to vector<128x1xf32>
    %cst_6 = arith.constant 0.000000e+00 : f32
    %14 = vector.broadcast %cst_6 : f32 to vector<128x128xf32>
    %c0_7 = arith.constant 0 : index
    %c0_8 = arith.constant 0 : index
    %15 = vector.load %arg4[%c0_7, %c0_8] : memref<256x128xbf16, #tpu.memory_space<vmem>>, vector<256x128xbf16>
    %cst_9 = arith.constant dense<0.000000e+00> : vector<128x256xf32>
    %16 = tpu.matmul %12, %15, %cst_9 {dimension_numbers = #tpu.dot_dimension_numbers<[1], [1], [0], [0], [0, 0, 1, 0], [], []>} : vector<128x128xbf16>, vector<256x128xbf16>, vector<128x256xf32> -> vector<128x256xf32>
    %c0_10 = arith.constant 0 : index
    %c0_11 = arith.constant 0 : index
    %17 = vector.load %arg5[%c0_10, %c0_11] : memref<1x256xf32, #tpu.memory_space<vmem>>, vector<1x256xf32>
    %18 = vector.broadcast %17 : vector<1x256xf32> to vector<128x256xf32>
    %19 = arith.subf %18, %16 : vector<128x256xf32>
    %cst_12 = arith.constant dense<0x7F800000> : vector<128xf32>
    %20 = vector.multi_reduction <minimumf>, %19, %cst_12 [1] : vector<128x256xf32> to vector<128xf32>
    %21 = vector.shape_cast %20 : vector<128xf32> to vector<128x1xf32>
    %22 = tpu.iota {dimensions = array<i32: 1>} : vector<128x256xi32>
    %23 = vector.broadcast %21 : vector<128x1xf32> to vector<128x256xf32>
    %24 = arith.cmpf oeq, %19, %23 : vector<128x256xf32>
    %c256_i32 = arith.constant 256 : i32
    %25 = vector.broadcast %c256_i32 : i32 to vector<128x256xi32>
    %26 = arith.select %24, %22, %25 : vector<128x256xi1>, vector<128x256xi32>
    %cst_13 = arith.constant dense<2147483647> : vector<128xi32>
    %27 = vector.multi_reduction <minsi>, %26, %cst_13 [1] : vector<128x256xi32> to vector<128xi32>
    %28 = vector.shape_cast %27 : vector<128xi32> to vector<128x1xi32>
    %29 = vector.broadcast %28 : vector<128x1xi32> to vector<128x256xi32>
    %30 = arith.cmpi eq, %22, %29 : vector<128x256xi32>
    %31 = arith.extui %30 : vector<128x256xi1> to vector<128x256xi32>
    %32 = arith.sitofp %31 : vector<128x256xi32> to vector<128x256xf32>
    %33 = arith.truncf %32 : vector<128x256xf32> to vector<128x256xbf16>
    %cst_14 = arith.constant dense<0.000000e+00> : vector<128x128xf32>
    %34 = tpu.matmul %33, %15, %cst_14 {dimension_numbers = #tpu.dot_dimension_numbers<[1], [0], [0], [1], [0, 0, 1, 1], [], []>} : vector<128x256xbf16>, vector<256x128xbf16>, vector<128x128xf32> -> vector<128x128xf32>
    %35 = arith.cmpf olt, %21, %13 : vector<128x1xf32>
    %36 = vector.shape_cast %35 : vector<128x1xi1> to vector<128x1xi1>
    %37 = vector.broadcast %36 : vector<128x1xi1> to vector<128x128xi1>
    %38 = arith.select %37, %34, %14 : vector<128x128xi1>, vector<128x128xf32>
    %39 = arith.subf %38, %11 : vector<128x128xf32>
    %40 = vector.broadcast %4 : vector<128x1xf32> to vector<128x128xf32>
    %41 = arith.mulf %39, %40 : vector<128x128xf32>
    %cst_15 = arith.constant 0.000000e+00 : f32
    %42 = vector.broadcast %cst_15 : f32 to vector<1x8x128xf32>
    %43 = arith.mulf %41, %41 : vector<128x128xf32>
    %44 = vector.shape_cast %43 : vector<128x128xf32> to vector<1x128x128xf32>
    %cst_16 = arith.constant dense<0.000000e+00> : vector<1xf32>
    %45 = vector.multi_reduction <add>, %44, %cst_16 [1, 2] : vector<1x128x128xf32> to vector<1xf32>
    %46 = vector.shape_cast %45 : vector<1xf32> to vector<1x1x1xf32>
    %47 = vector.extract %46[0, 0, 0] : f32 from vector<1x1x1xf32>
    %48 = vector.broadcast %47 : f32 to vector<1x8x128xf32>
    %49 = arith.addf %42, %48 : vector<1x8x128xf32>
    %c0_17 = arith.constant 0 : index
    %c0_18 = arith.constant 0 : index
    %c0_19 = arith.constant 0 : index
    %50 = vector.load %arg9[%c0_17, %c0_18, %c0_19] : memref<1x8x128xf32, #tpu.memory_space<vmem>>, vector<1x8x128xf32>
    tpu.vector_store %arg9[%c0_17, %c0_18, %c0_19], %49 {strides = array<i32>} : memref<1x8x128xf32, #tpu.memory_space<vmem>>, vector<1x8x128xf32>,
    %51 = arith.truncf %38 : vector<128x128xf32> to vector<128x128xbf16>
    %c0_20 = arith.constant 0 : index
    %c0_21 = arith.constant 0 : index
    %52 = vector.load %arg6[%c0_20, %c0_21] : memref<128x128xbf16, #tpu.memory_space<vmem>>, vector<128x128xbf16>
    %cst_22 = arith.constant dense<0.000000e+00> : vector<128x128xf32>
    %53 = tpu.matmul %51, %52, %cst_22 {dimension_numbers = #tpu.dot_dimension_numbers<[1], [0], [0], [1], [0, 0, 1, 1], [], []>} : vector<128x128xbf16>, vector<128x128xbf16>, vector<128x128xf32> -> vector<128x128xf32>
    %c0_23 = arith.constant 0 : index
    %c0_24 = arith.constant 0 : index
    %54 = vector.load %arg7[%c0_23, %c0_24] : memref<1x128xf32, #tpu.memory_space<vmem>>, vector<1x128xf32>
    %55 = vector.broadcast %54 : vector<1x128xf32> to vector<128x128xf32>
    %56 = arith.addf %53, %55 : vector<128x128xf32>
    %57 = arith.truncf %56 : vector<128x128xf32> to vector<128x128xbf16>
    %c0_25 = arith.constant 0 : index
    %c0_26 = arith.constant 0 : index
    %58 = vector.load %arg8[%c0_25, %c0_26] : memref<128x128xbf16, #tpu.memory_space<vmem>>, vector<128x128xbf16>
    tpu.vector_store %arg8[%c0_25, %c0_26], %57 {strides = array<i32>} : memref<128x128xbf16, #tpu.memory_space<vmem>>, vector<128x128xbf16>,
    return
  }
  func.func @transform_0(%arg0: i32) -> (i32, i32) {
    %c0_i32 = arith.constant 0 : i32
    %c0_i32_0 = arith.constant 0 : i32
    return %arg0, %c0_i32 : i32, i32
  }
  func.func @transform_1(%arg0: i32) -> (i32, i32) {
    %c0_i32 = arith.constant 0 : i32
    %c0_i32_0 = arith.constant 0 : i32
    %c0_i32_1 = arith.constant 0 : i32
    return %c0_i32, %c0_i32_0 : i32, i32
  }
  func.func @transform_2(%arg0: i32) -> (i32, i32) {
    %c0_i32 = arith.constant 0 : i32
    %c0_i32_0 = arith.constant 0 : i32
    %c0_i32_1 = arith.constant 0 : i32
    return %c0_i32, %c0_i32_0 : i32, i32
  }
  func.func @transform_3(%arg0: i32) -> (i32, i32) {
    %c0_i32 = arith.constant 0 : i32
    %c0_i32_0 = arith.constant 0 : i32
    %c0_i32_1 = arith.constant 0 : i32
    return %c0_i32, %c0_i32_0 : i32, i32
  }
  func.func @transform_4(%arg0: i32) -> (i32, i32) {
    %c0_i32 = arith.constant 0 : i32
    %c0_i32_0 = arith.constant 0 : i32
    %c0_i32_1 = arith.constant 0 : i32
    return %c0_i32, %c0_i32_0 : i32, i32
  }
  func.func @transform_5(%arg0: i32) -> (i32, i32) {
    %c0_i32 = arith.constant 0 : i32
    %c0_i32_0 = arith.constant 0 : i32
    %c0_i32_1 = arith.constant 0 : i32
    return %c0_i32, %c0_i32_0 : i32, i32
  }
  func.func @transform_6(%arg0: i32) -> (i32, i32) {
    %c0_i32 = arith.constant 0 : i32
    %c0_i32_0 = arith.constant 0 : i32
    %c0_i32_1 = arith.constant 0 : i32
    return %c0_i32, %c0_i32_0 : i32, i32
  }
  func.func @transform_7(%arg0: i32) -> (i32, i32) {
    %c0_i32 = arith.constant 0 : i32
    %c0_i32_0 = arith.constant 0 : i32
    return %arg0, %c0_i32 : i32, i32
  }
  func.func @transform_8(%arg0: i32) -> (i32, i32, i32) {
    %c0_i32 = arith.constant 0 : i32
    %c0_i32_0 = arith.constant 0 : i32
    %c0_i32_1 = arith.constant 0 : i32
    return %arg0, %c0_i32, %c0_i32_0 : i32, i32, i32
  }
}

module attributes {stable_mosaic.version = 11 : i64} {
  func.func @_maevq_kernel(%arg0: i32, %arg1: memref<128x128xbf16, #tpu.memory_space<vmem>>, %arg2: memref<128x128xbf16, #tpu.memory_space<vmem>>, %arg3: memref<1x128xf32, #tpu.memory_space<vmem>>, %arg4: memref<256x128xbf16, #tpu.memory_space<vmem>>, %arg5: memref<1x256xf32, #tpu.memory_space<vmem>>, %arg6: memref<128x128xbf16, #tpu.memory_space<vmem>>, %arg7: memref<1x128xf32, #tpu.memory_space<vmem>>, %arg8: memref<128x128xbf16, #tpu.memory_space<vmem>>, %arg9: memref<1x8x128xf32, #tpu.memory_space<vmem>>) attributes {dimension_semantics = [#tpu.dimension_semantics<parallel>], iteration_bounds = array<i64: 4>, scalar_prefetch = 0 : i64, scratch_operands = 0 : i64, tpu.core_type = #tpu.core_type<tc>, window_params = [{transform_indices = @transform_0, window_bounds = array<i64: 128, 128>}, {pipeline_mode = #tpu.pipeline_mode<synchronous>, transform_indices = @transform_1, window_bounds = array<i64: 128, 128>}, {pipeline_mode = #tpu.pipeline_mode<synchronous>, transform_indices = @transform_2, window_bounds = array<i64: 1, 128>}, {pipeline_mode = #tpu.pipeline_mode<synchronous>, transform_indices = @transform_3, window_bounds = array<i64: 256, 128>}, {pipeline_mode = #tpu.pipeline_mode<synchronous>, transform_indices = @transform_4, window_bounds = array<i64: 1, 256>}, {pipeline_mode = #tpu.pipeline_mode<synchronous>, transform_indices = @transform_5, window_bounds = array<i64: 128, 128>}, {pipeline_mode = #tpu.pipeline_mode<synchronous>, transform_indices = @transform_6, window_bounds = array<i64: 1, 128>}, {transform_indices = @transform_7, window_bounds = array<i64: 128, 128>}, {transform_indices = @transform_8, window_bounds = array<i64: 1, 8, 128>}]} {
    %c0 = arith.constant 0 : index
    %c0_0 = arith.constant 0 : index
    %0 = vector.load %arg1[%c0, %c0_0] : memref<128x128xbf16, #tpu.memory_space<vmem>>, vector<128x128xbf16>
    %1 = vector.extract_strided_slice %0 {offsets = [0, 127], sizes = [128, 1], strides = [1, 1]} : vector<128x128xbf16> to vector<128x1xbf16>
    %2 = arith.extf %1 : vector<128x1xbf16> to vector<128x1xf32>
    %3 = vector.extract_strided_slice %0 {offsets = [0, 126], sizes = [128, 1], strides = [1, 1]} : vector<128x128xbf16> to vector<128x1xbf16>
    %4 = arith.extf %3 : vector<128x1xbf16> to vector<128x1xf32>
    %c0_1 = arith.constant 0 : index
    %c0_2 = arith.constant 0 : index
    %5 = vector.load %arg2[%c0_1, %c0_2] : memref<128x128xbf16, #tpu.memory_space<vmem>>, vector<128x128xbf16>
    %cst = arith.constant dense<0.000000e+00> : vector<128x128xf32>
    %6 = tpu.matmul %0, %5, %cst {dimension_numbers = #tpu.dot_dimension_numbers<[1], [0], [0], [1], [0, 0, 1, 1], [], []>} : vector<128x128xbf16>, vector<128x128xbf16>, vector<128x128xf32> -> vector<128x128xf32>
    %c0_3 = arith.constant 0 : index
    %c0_4 = arith.constant 0 : index
    %7 = vector.load %arg3[%c0_3, %c0_4] : memref<1x128xf32, #tpu.memory_space<vmem>>, vector<1x128xf32>
    %8 = vector.broadcast %7 : vector<1x128xf32> to vector<128x128xf32>
    %9 = arith.addf %6, %8 : vector<128x128xf32>
    %10 = vector.broadcast %2 : vector<128x1xf32> to vector<128x128xf32>
    %11 = arith.mulf %9, %10 : vector<128x128xf32>
    %12 = arith.truncf %11 : vector<128x128xf32> to vector<128x128xbf16>
    %cst_5 = arith.constant 0x7F800000 : f32
    %13 = vector.broadcast %cst_5 : f32 to vector<128x1xf32>
    %cst_6 = arith.constant 0.000000e+00 : f32
    %14 = vector.broadcast %cst_6 : f32 to vector<128x128xf32>
    %c0_7 = arith.constant 0 : index
    %c0_8 = arith.constant 0 : index
    %15 = vector.load %arg4[%c0_7, %c0_8] : memref<256x128xbf16, #tpu.memory_space<vmem>>, vector<256x128xbf16>
    %cst_9 = arith.constant dense<0.000000e+00> : vector<128x256xf32>
    %16 = tpu.matmul %12, %15, %cst_9 {dimension_numbers = #tpu.dot_dimension_numbers<[1], [1], [0], [0], [0, 0, 1, 0], [], []>} : vector<128x128xbf16>, vector<256x128xbf16>, vector<128x256xf32> -> vector<128x256xf32>
    %c0_10 = arith.constant 0 : index
    %c0_11 = arith.constant 0 : index
    %17 = vector.load %arg5[%c0_10, %c0_11] : memref<1x256xf32, #tpu.memory_space<vmem>>, vector<1x256xf32>
    %18 = vector.broadcast %17 : vector<1x256xf32> to vector<128x256xf32>
    %19 = arith.subf %18, %16 : vector<128x256xf32>
    %cst_12 = arith.constant dense<0x7F800000> : vector<128xf32>
    %20 = vector.multi_reduction <minimumf>, %19, %cst_12 [1] : vector<128x256xf32> to vector<128xf32>
    %21 = vector.shape_cast %20 : vector<128xf32> to vector<128x1xf32>
    %22 = tpu.iota {dimensions = array<i32: 1>} : vector<128x256xi32>
    %23 = vector.broadcast %21 : vector<128x1xf32> to vector<128x256xf32>
    %24 = arith.cmpf oeq, %19, %23 : vector<128x256xf32>
    %c256_i32 = arith.constant 256 : i32
    %25 = vector.broadcast %c256_i32 : i32 to vector<128x256xi32>
    %26 = arith.select %24, %22, %25 : vector<128x256xi1>, vector<128x256xi32>
    %cst_13 = arith.constant dense<2147483647> : vector<128xi32>
    %27 = vector.multi_reduction <minsi>, %26, %cst_13 [1] : vector<128x256xi32> to vector<128xi32>
    %28 = vector.shape_cast %27 : vector<128xi32> to vector<128x1xi32>
    %29 = vector.broadcast %28 : vector<128x1xi32> to vector<128x256xi32>
    %30 = arith.cmpi eq, %22, %29 : vector<128x256xi32>
    %31 = arith.extui %30 : vector<128x256xi1> to vector<128x256xi32>
    %32 = arith.sitofp %31 : vector<128x256xi32> to vector<128x256xf32>
    %33 = arith.truncf %32 : vector<128x256xf32> to vector<128x256xbf16>
    %cst_14 = arith.constant dense<0.000000e+00> : vector<128x128xf32>
    %34 = tpu.matmul %33, %15, %cst_14 {dimension_numbers = #tpu.dot_dimension_numbers<[1], [0], [0], [1], [0, 0, 1, 1], [], []>} : vector<128x256xbf16>, vector<256x128xbf16>, vector<128x128xf32> -> vector<128x128xf32>
    %35 = arith.cmpf olt, %21, %13 : vector<128x1xf32>
    %36 = vector.shape_cast %35 : vector<128x1xi1> to vector<128x1xi1>
    %37 = vector.broadcast %36 : vector<128x1xi1> to vector<128x128xi1>
    %38 = arith.select %37, %34, %14 : vector<128x128xi1>, vector<128x128xf32>
    %39 = arith.subf %38, %11 : vector<128x128xf32>
    %40 = vector.broadcast %4 : vector<128x1xf32> to vector<128x128xf32>
    %41 = arith.mulf %39, %40 : vector<128x128xf32>
    %cst_15 = arith.constant 0.000000e+00 : f32
    %42 = vector.broadcast %cst_15 : f32 to vector<1x8x128xf32>
    %43 = arith.mulf %41, %41 : vector<128x128xf32>
    %44 = vector.shape_cast %43 : vector<128x128xf32> to vector<1x128x128xf32>
    %cst_16 = arith.constant dense<0.000000e+00> : vector<1xf32>
    %45 = vector.multi_reduction <add>, %44, %cst_16 [1, 2] : vector<1x128x128xf32> to vector<1xf32>
    %46 = vector.shape_cast %45 : vector<1xf32> to vector<1x1x1xf32>
    %47 = vector.extract %46[0, 0, 0] : f32 from vector<1x1x1xf32>
    %48 = vector.broadcast %47 : f32 to vector<1x8x128xf32>
    %49 = arith.addf %42, %48 : vector<1x8x128xf32>
    %c0_17 = arith.constant 0 : index
    %c0_18 = arith.constant 0 : index
    %c0_19 = arith.constant 0 : index
    %50 = vector.load %arg9[%c0_17, %c0_18, %c0_19] : memref<1x8x128xf32, #tpu.memory_space<vmem>>, vector<1x8x128xf32>
    tpu.vector_store %arg9[%c0_17, %c0_18, %c0_19], %49 {strides = array<i32>} : memref<1x8x128xf32, #tpu.memory_space<vmem>>, vector<1x8x128xf32>,
    %51 = arith.truncf %38 : vector<128x128xf32> to vector<128x128xbf16>
    %c0_20 = arith.constant 0 : index
    %c0_21 = arith.constant 0 : index
    %52 = vector.load %arg6[%c0_20, %c0_21] : memref<128x128xbf16, #tpu.memory_space<vmem>>, vector<128x128xbf16>
    %cst_22 = arith.constant dense<0.000000e+00> : vector<128x128xf32>
    %53 = tpu.matmul %51, %52, %cst_22 {dimension_numbers = #tpu.dot_dimension_numbers<[1], [0], [0], [1], [0, 0, 1, 1], [], []>} : vector<128x128xbf16>, vector<128x128xbf16>, vector<128x128xf32> -> vector<128x128xf32>
    %c0_23 = arith.constant 0 : index
    %c0_24 = arith.constant 0 : index
    %54 = vector.load %arg7[%c0_23, %c0_24] : memref<1x128xf32, #tpu.memory_space<vmem>>, vector<1x128xf32>
    %55 = vector.broadcast %54 : vector<1x128xf32> to vector<128x128xf32>
    %56 = arith.addf %53, %55 : vector<128x128xf32>
    %57 = arith.truncf %56 : vector<128x128xf32> to vector<128x128xbf16>
    %c0_25 = arith.constant 0 : index
    %c0_26 = arith.constant 0 : index
    %58 = vector.load %arg8[%c0_25, %c0_26] : memref<128x128xbf16, #tpu.memory_space<vmem>>, vector<128x128xbf16>
    tpu.vector_store %arg8[%c0_25, %c0_26], %57 {strides = array<i32>} : memref<128x128xbf16, #tpu.memory_space<vmem>>, vector<128x128xbf16>,
    return
  }
  func.func @transform_0(%arg0: i32) -> (i32, i32) {
    %c0_i32 = arith.constant 0 : i32
    %c0_i32_0 = arith.constant 0 : i32
    return %arg0, %c0_i32 : i32, i32
  }
  func.func @transform_1(%arg0: i32) -> (i32, i32) {
    %c0_i32 = arith.constant 0 : i32
    %c0_i32_0 = arith.constant 0 : i32
    %c0_i32_1 = arith.constant 0 : i32
    return %c0_i32, %c0_i32_0 : i32, i32
  }
  func.func @transform_2(%arg0: i32) -> (i32, i32) {
    %c0_i32 = arith.constant 0 : i32
    %c0_i32_0 = arith.constant 0 : i32
    %c0_i32_1 = arith.constant 0 : i32
    return %c0_i32, %c0_i32_0 : i32, i32
  }
  func.func @transform_3(%arg0: i32) -> (i32, i32) {
    %c0_i32 = arith.constant 0 : i32
    %c0_i32_0 = arith.constant 0 : i32
    %c0_i32_1 = arith.constant 0 : i32
    return %c0_i32, %c0_i32_0 : i32, i32
  }
  func.func @transform_4(%arg0: i32) -> (i32, i32) {
    %c0_i32 = arith.constant 0 : i32
    %c0_i32_0 = arith.constant 0 : i32
    %c0_i32_1 = arith.constant 0 : i32
    return %c0_i32, %c0_i32_0 : i32, i32
  }
  func.func @transform_5(%arg0: i32) -> (i32, i32) {
    %c0_i32 = arith.constant 0 : i32
    %c0_i32_0 = arith.constant 0 : i32
    %c0_i32_1 = arith.constant 0 : i32
    return %c0_i32, %c0_i32_0 : i32, i32
  }
  func.func @transform_6(%arg0: i32) -> (i32, i32) {
    %c0_i32 = arith.constant 0 : i32
    %c0_i32_0 = arith.constant 0 : i32
    %c0_i32_1 = arith.constant 0 : i32
    return %c0_i32, %c0_i32_0 : i32, i32
  }
  func.func @transform_7(%arg0: i32) -> (i32, i32) {
    %c0_i32 = arith.constant 0 : i32
    %c0_i32_0 = arith.constant 0 : i32
    return %arg0, %c0_i32 : i32, i32
  }
  func.func @transform_8(%arg0: i32) -> (i32, i32, i32) {
    %c0_i32 = arith.constant 0 : i32
    %c0_i32_0 = arith.constant 0 : i32
    %c0_i32_1 = arith.constant 0 : i32
    return %arg0, %c0_i32, %c0_i32_0 : i32, i32, i32
  }
}

</mosaic_0001>

<bundles_post_ra>
// kernel: tpu_custom_call.1
= control target key start
LH: loop header
LB: loop body
LE: loop exit
PB: predicated region body
PF: predicated region fallthrough
CT: control target
= control target key end

     0   :  { %s3889_s0 = inlined_call_operand.hbm [shape: bf16[512,128], index: 0, kind: input, shape index: {}]   ;;  %s3890_s1 = inlined_call_operand.hbm [shape: bf16[128,128], index: 1, kind: input, shape index: {}]   ;;  %s3891_s2 = inlined_call_operand.vmem [shape: f32[1,128], index: 2, kind: input, shape index: {}]   ;;  %s3892_s3 = inlined_call_operand.hbm [shape: bf16[256,128], index: 3, kind: input, shape index: {}]   ;;  %s3893_s4 = inlined_call_operand.vmem [shape: f32[1,256], index: 4, kind: input, shape index: {}]   ;;  %s3894_s5 = inlined_call_operand.hbm [shape: bf16[128,128], index: 5, kind: input, shape index: {}]   ;;  %s3895_s6 = inlined_call_operand.vmem [shape: f32[1,128], index: 6, kind: input, shape index: {}]   ;;  %s3896_s7 = inlined_call_operand.hbm [shape: bf16[512,128], index: 7, kind: output, shape index: {0}]   ;;  %s3897_s8 = inlined_call_operand.hbm [shape: f32[4,8,128], index: 8, kind: output, shape index: {1}]  }
   0x1   :  { %3916 = sst [smem:[#allocation32_spill]] %s3889_s0 }
   0x2   :  { %3917 = sst [smem:[#allocation33_spill]] %s3890_s1 }
   0x3   :  { %3918 = sst [smem:[#allocation34_spill]] %s3891_s2 }
   0x4   :  { %3919 = sst [smem:[#allocation35_spill]] %s3892_s3 }
   0x5   :  { %3920 = sst [smem:[#allocation36_spill]] %s3893_s4 }
   0x6   :  { %14 = vsyncpa [#allocation3], 0 }
   0x7   :  { %16 = vsyncpa [#allocation3 + $0x1], 0 }
   0x8   :  { %17 = vsyncpa [#allocation6], 0 }
   0x9   :  { %18 = vsyncpa [#allocation9], 0 }
   0xa   :  { %19 = vsyncpa [#allocation4], 0 }
   0xb   :  { %21 = vsyncpa [#allocation4 + $0x1], 0 }
   0xc   :  { %22 = vsyncpa [#allocation12], 0 }
   0xd   :  { %24 = vsyncpa [#allocation12 + $0x1], 0  ;;  %s2903_s27 = smov 0   ;;  %s2905_s28 = smov 0  }
   0xe   :  { %s2907_s29 = smov 0   ;;  %s2909_s30 = smov 0  }
   0xf LB: > { %s2924_s9 = sadd.s32 4294967295, %s2846_s30   ;;  %s2065_s10 = sadd.s32 4294967294, %s2846_s30   ;;  %s2846_s30 = sphi %s2909_s30, %s3967_s30   ;;  %s2842_s29 = sphi %s2907_s29, %s3966_s29   ;;  %s2838_s28 = sphi %s2905_s28, %s3965_s28   ;;  %s2834_s27 = sphi %s2903_s27, %s3964_s27  }
  0x10   : > { %p50_p0 = scmp.ne.s32.totalorder %s2838_s28, %s2834_s27  ;;  %p51_p1 = scmp.eq.s32.totalorder %s2924_s9, 0 }
  0x11   : > { %p200_p2 = scmp.eq.s32.totalorder %s2924_s9, 3  ;;  %p206_p3 = scmp.eq.s32.totalorder %s2065_s10, 3 }
  0x12   : > { %p2933_p4 = por %p51_p1, %p50_p0  ;;  %p2066_p5 = scmp.ge.s32.totalorder %s2846_s30, 1 }
  0x13   : > { %p2938_p6 = por %p206_p3, %p50_p0  ;;  %p239_p7 = scmp.lt.s32.totalorder %s2846_s30, 5 }
  0x14   : > { %s3923_s1 = sld [smem:[#allocation33_spill]]  ;;  %s2848_s17 = smov [#allocation5]  }
  0x15   : > { %p2946_p8 = pnand %p2066_p5, %p239_p7  ;;  %s252_s18 = sshll.u32 %s2848_s17, 4  ;;  %s253_s18 = int_to_ptr.vmem [resolvable:$true] %s252_s18 }
  0x16   : > { %s3926_s3 = sld [smem:[#allocation35_spill]]  ;;  %s3898_s23 = smov 64  }
  0x17   : > { %p2461_p9 = pneg %p2946_p8  ;;  %s3899_s24 = smov 4  }
  0x18   : > { %s2851_s25 = smov [#allocation7]   ;;  %s284_s14 = sshll.u32 %s3894_s5, 4  ;;  %s285_s14 = int_to_ptr.hbm [resolvable:$true] %s284_s14 }
  0x19   : > { %p2954_p10 = pnand %p2461_p9, %p51_p1  ;;  %s269_s26 = sshll.u32 %s2851_s25, 4  ;;  %s270_s26 = int_to_ptr.vmem [resolvable:$true] %s269_s26 }
  0x1a   : > { %s250_s15 = sshll.u32 %s3923_s1, 4  ;;  %s37_s21 = sadd.s32 1, %s2842_s29  ;;  %s251_s15 = int_to_ptr.hbm [resolvable:$true] %s250_s15 }
  0x1b   : > { %2464 = dma.hbm_to_vmem [thread:$0]  (!%p2954_p10), %s251_s15, 1024, %s253_s18, [#allocation6], %s3898_s23, %s3898_s23, %s3899_s24  }
  0x1c   : > { %s267_s22 = sshll.u32 %s3926_s3, 4  ;;  %s2852_s15 = smov [#allocation8]   ;;  %s268_s22 = int_to_ptr.hbm [resolvable:$true] %s267_s22 }
  0x1d   : > { %2467 = dma.hbm_to_vmem [thread:$0]  (!%p2954_p10), %s268_s22, 2048, %s270_s26, [#allocation6], %s3898_s23, %s3898_s23, %s3899_s24  }
  0x1e   : > { %s286_s17 = sshll.u32 %s2852_s15, 4  ;;  %s2975_s18 = sadd.s32 1, %s2846_s30   ;;  %s287_s17 = int_to_ptr.vmem [resolvable:$true] %s286_s17 }
  0x1f   : > { %2470 = dma.hbm_to_vmem [thread:$0]  (!%p2954_p10), %s285_s14, 1024, %s287_s17, [#allocation9], %s3898_s23, %s3898_s23, %s3899_s24  }
  0x20   : > { %s34_s20 = ssub.s32 %s2846_s30, %s2975_s18  ;;  %p44_p12 = scmp.ne.s32.totalorder %s2842_s29, %s2838_s28 }
  0x21   : > { %p35_p11 = scmp.eq.s32.totalorder %s34_s20, 0  ;;  %p45_p13 = scmp.eq.s32.totalorder %s2846_s30, 0 }
  0x22   : > { %p2993_p0 = por %p200_p2, %p44_p12  ;;  %p2485_p3 = scmp.lt.s32.totalorder %s2846_s30, 4 }
  0x23   : > { %s2989_s25 = scalar_select %p35_p11, %s2842_s29, %s37_s21  }
  0x24   : > { %s303_s26 = sand.u32 1, %s2842_s29   ;;  %s2336_s19 = sshll.u32 %s2846_s30, 6 }
  0x25   : > { %p46_p5 = por %p45_p13, %p44_p12  ;;  %s2071_s10 = sshll.u32 %s303_s26, 6 }
  0x26   : > { %s3928_s0 = sld [smem:[#allocation32_spill]]  ;;  %s307_s20 = scalar_lea.vmem [#allocation2], %s2071_s10 }
  0x27   : > { %s315_s23 = sshll.u32 %s307_s20, 4  ;;  %p3003_p7 = pnand %p2485_p3, %p46_p5  ;;  %s316_s23 = int_to_ptr.vmem [resolvable:$true] %s315_s23 }
  0x28   : > { %s304_s24 = scalar_lea.sflag [#allocation3], %s303_s26 }
  0x29   : > { %p2714_p9 = pneg %p3003_p7 }
  0x2c   : > { %s312_s14 = scalar_lea.hbm %s3928_s0, %s2336_s19  ;;  %s2717_s10 = scalar_lea.hbm %s3928_s0, 256 }
  0x2d   : > { %s313_s17 = sshll.u32 %s312_s14, 4  ;;  %s314_s17 = int_to_ptr.hbm [resolvable:$true] %s313_s17 }
  0x2e   : > { %s2710_s1 = sshra.s32 %s314_s17, 4  ;;  %s2711_s1 = int_to_ptr.hbm [resolvable:$true] %s2710_s1 }
  0x2f   : > { %s2712_s3 = scalar_lea.hbm %s2711_s1, 64  ;;  %p2718_p12 = scmp.lt.s32.totalorder %s2711_s1, %s3928_s0 }
  0x30   : > { %p2713_p2 = scmp.ne.s32.totalorder %s2711_s1, %s2712_s3  ;;  %p2719_p13 = scmp.lt.s32.totalorder %s2717_s10, %s2712_s3 }
  0x32   : > { %p2715_p10 = pnand %p2714_p9, %p2713_p2  ;;  %p2720_p3 = por %p2719_p13, %p2718_p12 }
  0x34   : > { %p2716_p11 = pneg %p2715_p10 }
  0x36   : > { %p2721_p5 = pnand %p2720_p3, %p2716_p11 }
  0x38   : > { %2724 = shalt.err (!%p2721_p5)
}
  0x39   : > { %s3930_s26 = smov 4   ;;  %s3931_s20 = smov 64  }
  0x3a   : > { %2474 = dma.hbm_to_vmem [thread:$0]  (!%p3003_p7), %s314_s17, 1024, %s316_s23, %s304_s24, %s3931_s20, %s3931_s20, %s3930_s26  }
  0x3b   : > { %327 = sbr.rel (%p2946_p8) target bundleno = 1353 (0x549), region = 48 }
  0x40   : > { %s3023_s19 = sand.u32 1, %s2838_s28  }
  0x41   : > { %s2075_s1 = sshll.u32 %s3023_s19, 6  ;;  %s330_s3 = scalar_lea.sflag [#allocation3], %s3023_s19 }
  0x42   : > { %s3029_s13 = scalar_lea.vmem [#allocation2], %s2075_s1 }
  0x43   : > { %2813 = dma.done.wait (%p2933_p4), %s330_s3, 1024  }
  0x44   : > { %2815 = vsyncadd (%p2933_p4), %s330_s3, 4294966272 }
  0x45   : > { %2817 = dma.done.wait (%p51_p1), [#allocation6], 3072  }
  0x46   : > { %2819 = vsyncadd (%p51_p1), [#allocation6], 4294964224 }
  0x47   : > { %2821 = dma.done.wait (%p51_p1), [#allocation9], 1024  }
  0x48   : > { %2823 = vsyncadd (%p51_p1), [#allocation9], 4294966272  ;;  %v2352_v0 = vld [vmem:[#allocation5 + $0x38] sm:$0xff]  ;;  %v2351_v1 = vld [vmem:[#allocation5 + $0x30] sm:$0xff]  ;;  %v2853_v2 = vmov 127   ;;  %s3932_s2 = sld [smem:[#allocation34_spill]] }
  0x49   : > { %537 = vmatpush.bf16.msra.mxu0 %v2352_v0  ;;  %2532 = vset.pattern.permute.xlu0 %v2853_v2  ;;  %v389_v3 = vld [vmem:[%s3029_s13] sm:$0xff]   ;;  %v391_v6 = vld [vmem:[%s3029_s13 + $0x8] sm:$0xff]   ;;  %v2348_v13 = vld [vmem:[#allocation5 + $0x18] sm:$0xff]  ;;  %s3944_s4 = sld [smem:[#allocation36_spill]]  ;;  %s3830_s10 = scalar_lea.vmem [#allocation10], %s2075_s1 }
  0x4a   : > { %2543 = vset.pattern.permute.xlu1 %v2853_v2  ;;  %2554 = vset.pattern.permute.xlu2 %v2853_v2  ;;  %v405_v4 = vunpack.c.l.bf16 %v389_v3  ;;  %v406_v5 = vunpack.c.h.bf16 %v389_v3  ;;  %v2350_v7 = vld [vmem:[#allocation5 + $0x28] sm:$0xff]  ;;  %v407_v9 = vunpack.c.l.bf16 %v391_v6  ;;  %v408_v10 = vunpack.c.h.bf16 %v391_v6  ;;  %v2349_v11 = vld [vmem:[#allocation5 + $0x20] sm:$0xff]  ;;  %v401_v14 = vld [vmem:[%s3029_s13 + $0x30] sm:$0xff]   ;;  %s2377_s15 = sshll.u32 %s2924_s9, 6  ;;  %s1913_s1 = sshll.u32 %s3830_s10, 4  ;;  %s1914_s1 = int_to_ptr.vmem [resolvable:$true] %s1913_s1 }
  0x4b   : > { %v417_v15 = vunpack.c.l.bf16 %v401_v14  ;;  %v418_v16 = vunpack.c.h.bf16 %v401_v14  ;;  %v2347_v17 = vld [vmem:[#allocation5 + $0x10] sm:$0xff]  ;;  %v2346_v19 = vld [vmem:[#allocation5 + $0x8] sm:$0xff]  ;;  %v2345_v20 = vld [vmem:[#allocation5] sm:$0xff]  ;;  %s1912_s20 = scalar_lea.hbm %s3896_s7, %s2377_s15  ;;  %s2760_s17 = scalar_lea.hbm %s3896_s7, 256 }
  0x4c   : > { %v3045_v8 = vpack.i.bf16 %v406_v5, %v405_v4  ;;  %v3048_v12 = vpack.i.bf16 %v408_v10, %v407_v9  ;;  %v2337_v21 = vld [vmem:[%s3029_s13] sm:$0xff]  ;;  %v2338_v22 = vld [vmem:[%s3029_s13 + $0x8] sm:$0xff]  ;;  %v393_v23 = vld [vmem:[%s3029_s13 + $0x10] sm:$0xff]   ;;  %s1915_s3 = sshll.u32 %s1912_s20, 4  ;;  %s1916_s3 = int_to_ptr.hbm [resolvable:$true] %s1915_s3 }
  0x4d   : > { %538 = vmatpush.bf16.msra.mxu0 %v2351_v1  ;;  %v3052_v18 = vpack.i.bf16 %v418_v16, %v417_v15  ;;  %v409_v24 = vunpack.c.l.bf16 %v393_v23  ;;  %v410_v25 = vunpack.c.h.bf16 %v393_v23  ;;  %v2339_v27 = vld [vmem:[%s3029_s13 + $0x10] sm:$0xff]  ;;  %v395_v28 = vld [vmem:[%s3029_s13 + $0x18] sm:$0xff]   ;;  %v2358_v37 = vld [vmem:[#allocation7 + $0x28] sm:$0xff]  ;;  %s2754_s11 = sshra.s32 %s1916_s3, 4  ;;  %s2755_s11 = int_to_ptr.hbm [resolvable:$true] %s2754_s11 }
  0x4e   : > { %2534 = vperm.xlu0 %2532, %v3045_v8   ;;  %v411_v29 = vunpack.c.l.bf16 %v395_v28  ;;  %v412_v30 = vunpack.c.h.bf16 %v395_v28  ;;  %v3063_v31 = vld [vmem:[#allocation7 + $0x38] sm:$0xff]  ;;  %v3075_v35 = vld [vmem:[#allocation7 + $0x30] sm:$0xff]  ;;  %v2366_v38 = vld [vmem:[#allocation7 + $0x68] sm:$0xff]  ;;  %s2756_s16 = scalar_lea.hbm %s2755_s11, 64  ;;  %p2761_p7 = scmp.lt.s32.totalorder %s2755_s11, %s3896_s7 }
  0x4f   : > { %v3058_v26 = vpack.i.bf16 %v410_v25, %v409_v24  ;;  %v3065_v32 = vld [vmem:[#allocation7 + $0x78] sm:$0xff]  ;;  %818 = vmatpush.bf16.xpose.msra.mxu1 %v3063_v31  ;;  %2425 = vmatpush.bf16.msra.mxu3 %v3063_v31  ;;  %v3077_v36 = vld [vmem:[#allocation7 + $0x70] sm:$0xff]  ;;  %v2341_v39 = vld [vmem:[%s3029_s13 + $0x20] sm:$0xff]  ;;  %p2757_p1 = scmp.ne.s32.totalorder %s2755_s11, %s2756_s16  ;;  %p2762_p2 = scmp.lt.s32.totalorder %s2760_s17, %s2756_s16 }
  0x50   : > { %v3067_v33 = vpack.i.bf16 %v412_v30, %v411_v29  ;;  %867 = vmatpush.bf16.xpose.msra.mxu2 %v3065_v32  ;;  %v2340_v34 = vld [vmem:[%s3029_s13 + $0x18] sm:$0xff]  ;;  %v2357_v40 = vld [vmem:[#allocation7 + $0x20] sm:$0xff]  ;;  %v2342_v48 = vld [vmem:[%s3029_s13 + $0x28] sm:$0xff] }
  0x51   : > { %539 = vmatpush.bf16.msra.mxu0 %v2350_v7  ;;  %2545 = vperm.xlu1 %2543, %v3058_v26   ;;  %v2365_v41 = vld [vmem:[#allocation7 + $0x60] sm:$0xff]  ;;  %v2356_v46 = vld [vmem:[#allocation7 + $0x18] sm:$0xff]  ;;  %v2355_v49 = vld [vmem:[#allocation7 + $0x10] sm:$0xff]  ;;  %p2758_p4 = pnand %p2757_p1, %p2993_p0  ;;  %p2763_p9 = por %p2762_p2, %p2761_p7 }
  0x52   : > { %v397_v42 = vld [vmem:[%s3029_s13 + $0x20] sm:$0xff]   ;;  %v2364_v47 = vld [vmem:[#allocation7 + $0x58] sm:$0xff]  ;;  %v2363_v50 = vld [vmem:[#allocation7 + $0x50] sm:$0xff] }
  0x53   : > { %2426 = vmatpush.bf16.msra.mxu3 %v3075_v35  ;;  %v413_v43 = vunpack.c.l.bf16 %v397_v42  ;;  %v414_v44 = vunpack.c.h.bf16 %v397_v42  ;;  %v399_v51 = vld [vmem:[%s3029_s13 + $0x28] sm:$0xff]   ;;  %v403_v55 = vld [vmem:[%s3029_s13 + $0x38] sm:$0xff]   ;;  %v2343_v60 = vld [vmem:[%s3029_s13 + $0x30] sm:$0xff]  ;;  %p2759_p8 = pneg %p2758_p4 }
  0x54   : > { %v415_v52 = vunpack.c.l.bf16 %v399_v51  ;;  %v416_v53 = vunpack.c.h.bf16 %v399_v51  ;;  %v2354_v56 = vld [vmem:[#allocation7 + $0x8] sm:$0xff]  ;;  %v419_v58 = vunpack.c.l.bf16 %v403_v55  ;;  %v420_v59 = vunpack.c.h.bf16 %v403_v55  ;;  %v2353_v62 = vld [vmem:[#allocation7] sm:$0xff]  ;;  %v2344_v0 = vld [vmem:[%s3029_s13 + $0x38] sm:$0xff]  ;;  %s1896_s13 = scalar_lea.sflag [#allocation4], %s3023_s19 }
  0x55   : > { %540 = vmatpush.bf16.msra.mxu0 %v2349_v11  ;;  %v3085_v45 = vpack.i.bf16 %v414_v44, %v413_v43  ;;  %v2362_v57 = vld [vmem:[#allocation7 + $0x48] sm:$0xff]  ;;  %v2361_v63 = vld [vmem:[#allocation7 + $0x40] sm:$0xff]  ;;  %p2764_p10 = pnand %p2763_p9, %p2759_p8 }
  0x56   : > { %2539 = vperm.xlu0 %2532, %v3048_v12   ;;  %v3090_v54 = vpack.i.bf16 %v416_v53, %v415_v52  ;;  %v3095_v61 = vpack.i.bf16 %v420_v59, %v419_v58  ;;  %v3106_v2 = vld [vmem:[%s3932_s2] ss:$0 sm:$0xff] }
  0x57   : > { %819 = vmatpush.bf16.xpose.msra.mxu1 %v3075_v35  ;;  %2427 = vmatpush.bf16.msra.mxu3 %v2358_v37 }
  0x58   : > { %868 = vmatpush.bf16.xpose.msra.mxu2 %v3077_v36  ;;  %2556 = vperm.xlu2 %2554, %v3085_v45  }
  0x59   : > { %541 = vmatpush.bf16.msra.mxu0 %v2348_v13  ;;  %2550 = vperm.xlu1 %2543, %v3067_v33  }
  0x5b   : > { %2428 = vmatpush.bf16.msra.mxu3 %v2357_v40 }
  0x5d   : > { %542 = vmatpush.bf16.msra.mxu0 %v2347_v17 }
  0x5e   : > { %2566 = vperm.xlu0 %2532, %v3052_v18  }
  0x5f   : > { %820 = vmatpush.bf16.xpose.msra.mxu1 %v2358_v37  ;;  %2429 = vmatpush.bf16.msra.mxu3 %v2356_v46 }
  0x60   : > { %869 = vmatpush.bf16.xpose.msra.mxu2 %v2366_v38  ;;  %2561 = vperm.xlu2 %2554, %v3090_v54  }
  0x61   : > { %543 = vmatpush.bf16.msra.mxu0 %v2346_v19  ;;  %2571 = vperm.xlu1 %2543, %v3095_v61  }
  0x63   : > { %2430 = vmatpush.bf16.msra.mxu3 %v2355_v49 }
  0x65   : > { %544 = vmatpush.bf16.msra.mxu0 %v2345_v20 }
  0x67   : > { %821 = vmatpush.bf16.xpose.msra.mxu1 %v2357_v40  ;;  %2431 = vmatpush.bf16.msra.mxu3 %v2354_v56 }
  0x68   : > { %545 = vmatmul.bf16.vlgmr.msra.gmra.mxu0 %v2337_v21  ;;  %870 = vmatpush.bf16.xpose.msra.mxu2 %v2365_v41 }
  0x69   : > { %1486 = vmatpush.bf16.msrb.mxu0 %v3065_v32 }
  0x6b   : > { %2432 = vmatpush.bf16.msra.mxu3 %v2353_v62 }
  0x6d   : > { %1487 = vmatpush.bf16.msrb.mxu0 %v3077_v36 }
  0x6f   : > { %822 = vmatpush.bf16.xpose.msra.mxu1 %v2356_v46 }
  0x70   : > { %871 = vmatpush.bf16.xpose.msra.mxu2 %v2364_v47 }
  0x71   : > { %1488 = vmatpush.bf16.msrb.mxu0 %v2366_v38 }
  0x75   : > { %1489 = vmatpush.bf16.msrb.mxu0 %v2365_v41 }
  0x77   : > { %823 = vmatpush.bf16.xpose.msra.mxu1 %v2355_v49 }
  0x78   : > { %550 = vmatmul.bf16.gmra.mxu0 %v2338_v22  ;;  %872 = vmatpush.bf16.xpose.msra.mxu2 %v2363_v50 }
  0x79   : > { %1490 = vmatpush.bf16.msrb.mxu0 %v2364_v47 }
  0x7d   : > { %1491 = vmatpush.bf16.msrb.mxu0 %v2363_v50 }
  0x7f   : > { %824 = vmatpush.bf16.xpose.msra.mxu1 %v2354_v56 }
  0x80   : > { %873 = vmatpush.bf16.xpose.msra.mxu2 %v2362_v57 }
  0x81   : > { %1492 = vmatpush.bf16.msrb.mxu0 %v2362_v57 }
  0x85   : > { %1493 = vmatpush.bf16.msrb.mxu0 %v2361_v63 }
  0x87   : > { %825 = vmatpush.bf16.xpose.msra.mxu1 %v2353_v62 }
  0x88   : > { %555 = vmatmul.bf16.gmra.mxu0 %v2339_v27  ;;  %874 = vmatpush.bf16.xpose.msra.mxu2 %v2361_v63 }
  0x8f   : > { %2433 = vmatpush.bf16.msrb.mxu1 %v3065_v32 }
  0x90   : > { %1437 = vmatpush.bf16.msrb.mxu2 %v3063_v31 }
  0x93   : > { %2434 = vmatpush.bf16.msrb.mxu1 %v3077_v36 }
  0x94   : > { %1438 = vmatpush.bf16.msrb.mxu2 %v3075_v35 }
  0x97   : > { %2435 = vmatpush.bf16.msrb.mxu1 %v2366_v38 }
  0x98   : > { %560 = vmatmul.bf16.gmra.mxu0 %v2340_v34  ;;  %1439 = vmatpush.bf16.msrb.mxu2 %v2358_v37 }
  0x9b   : > { %2436 = vmatpush.bf16.msrb.mxu1 %v2365_v41 }
  0x9c   : > { %1440 = vmatpush.bf16.msrb.mxu2 %v2357_v40 }
  0x9f   : > { %2437 = vmatpush.bf16.msrb.mxu1 %v2364_v47 }
  0xa0   : > { %1441 = vmatpush.bf16.msrb.mxu2 %v2356_v46 }
  0xa3   : > { %2438 = vmatpush.bf16.msrb.mxu1 %v2363_v50 }
  0xa4   : > { %1442 = vmatpush.bf16.msrb.mxu2 %v2355_v49 }
  0xa7   : > { %2439 = vmatpush.bf16.msrb.mxu1 %v2362_v57 }
  0xa8   : > { %565 = vmatmul.bf16.gmra.mxu0 %v2341_v39  ;;  %1443 = vmatpush.bf16.msrb.mxu2 %v2354_v56 }
  0xab   : > { %2440 = vmatpush.bf16.msrb.mxu1 %v2361_v63 }
  0xac   : > { %1444 = vmatpush.bf16.msrb.mxu2 %v2353_v62 }
  0xb2   : > { %v2557_v49 = vpop.permute.xlu2 %2556 }
  0xb3   : > { %v2558_v51 = vunpack.i.l.bf16 %v2557_v49  ;;  %v2559_v52 = vunpack.i.h.bf16 %v2557_v49 }
  0xb8   : > { %570 = vmatmul.bf16.gmra.mxu0 %v2342_v48 }
  0xc0   : > { %v2535_v3 = vpop.permute.xlu0 %2534 }
  0xc1   : > { %v2537_v4 = vunpack.i.h.bf16 %v2535_v3  ;;  %v2536_v5 = vunpack.i.l.bf16 %v2535_v3 }
  0xc3   : > { %v2546_v27 = vpop.permute.xlu1 %2545 }
  0xc4   : > { %v2547_v29 = vunpack.i.l.bf16 %v2546_v27  ;;  %v2548_v30 = vunpack.i.h.bf16 %v2546_v27 }
  0xc8   : > { %575 = vmatmul.bf16.gmra.mxu0 %v2343_v60  ;;  %v2540_v16 = vpop.permute.xlu0 %2539  ;;  %v2562_v60 = vpop.permute.xlu2 %2561 }
  0xc9   : > { %v2542_v19 = vunpack.i.h.bf16 %v2540_v16  ;;  %v2541_v20 = vunpack.i.l.bf16 %v2540_v16  ;;  %v2563_v63 = vunpack.i.l.bf16 %v2562_v60 }
  0xcb   : > { %v2551_v38 = vpop.permute.xlu1 %2550 }
  0xcc   : > { %v2552_v40 = vunpack.i.l.bf16 %v2551_v38  ;;  %v2553_v41 = vunpack.i.h.bf16 %v2551_v38 }
  0xd8   : > { %580 = vmatmul.bf16.gmra.mxu0 %v2344_v0  ;;  %v2564_v0 = vunpack.i.h.bf16 %v2562_v60 }
  0xe5   : > { %v546_v1 = vpop.f32.mrf.mxu0 }
  0xe6   : > { %v547_v6 = vadd.f32 %v3106_v2, %v546_v1 }
  0xe8   : > { %v3110_v10 = vmul.f32 %v2536_v5, %v547_v6 }
  0xed   : > { %v548_v7 = vpop.f32.mrf.mxu0 }
  0xee   : > { %v549_v9 = vadd.f32 %v3106_v2, %v548_v7 }
  0xf0   : > { %v3112_v11 = vmul.f32 %v2537_v4, %v549_v9  ;;  %v2567_v9 = vpop.permute.xlu0 %2566 }
  0xf1   : > { %v2568_v16 = vunpack.i.l.bf16 %v2567_v9 }
  0xf2   : > { %v682_v13 = vpack.c.bf16 %v3112_v11, %v3110_v10 }
  0xf4   : > { %826 = vmatmul.bf16.vlgmr.msra.gmra.mxu1 %v682_v13  ;;  %875 = vmatmul.bf16.vlgmr.msra.gmra.mxu2 %v682_v13 }
  0xf5   : > { %v551_v14 = vpop.f32.mrf.mxu0 }
  0xf6   : > { %v552_v15 = vadd.f32 %v3106_v2, %v551_v14 }
  0xf8   : > { %v3118_v22 = vmul.f32 %v2541_v20, %v552_v15  ;;  %v2569_v15 = vunpack.i.h.bf16 %v2567_v9 }
  0xfd   : > { %v553_v17 = vpop.f32.mrf.mxu0 }
  0xfe   : > { %v554_v21 = vadd.f32 %v3106_v2, %v553_v17 }
 0x100   : > { %v3120_v23 = vmul.f32 %v2542_v19, %v554_v21 }
 0x102   : > { %v683_v24 = vpack.c.bf16 %v3120_v23, %v3118_v22 }
 0x104   : > { %831 = vmatmul.bf16.gmra.mxu1 %v683_v24  ;;  %880 = vmatmul.bf16.gmra.mxu2 %v683_v24 }
 0x105   : > { %v556_v25 = vpop.f32.mrf.mxu0 }
 0x106   : > { %v557_v28 = vadd.f32 %v3106_v2, %v556_v25  ;;  %v2572_v25 = vpop.permute.xlu1 %2571 }
 0x108   : > { %v3126_v34 = vmul.f32 %v2547_v29, %v557_v28  ;;  %v2573_v28 = vunpack.i.l.bf16 %v2572_v25 }
 0x10d   : > { %v558_v31 = vpop.f32.mrf.mxu0 }
 0x10e   : > { %v559_v32 = vadd.f32 %v3106_v2, %v558_v31 }
 0x110   : > { %v3128_v35 = vmul.f32 %v2548_v30, %v559_v32  ;;  %v2574_v30 = vunpack.i.h.bf16 %v2572_v25 }
 0x112   : > { %3933 = vst [vmem:[#allocation18_spill] sm:$0xff] %v3128_v35  ;;  %v684_v36 = vpack.c.bf16 %v3128_v35, %v3126_v34 }
 0x114   : > { %836 = vmatmul.bf16.gmra.mxu1 %v684_v36  ;;  %885 = vmatmul.bf16.gmra.mxu2 %v684_v36 }
 0x115   : > { %v561_v37 = vpop.f32.mrf.mxu0 }
 0x116   : > { %v562_v39 = vadd.f32 %v3106_v2, %v561_v37 }
 0x118   : > { %v3134_v44 = vmul.f32 %v2552_v40, %v562_v39  ;;  %v916_v39 = vld [vmem:[%s3944_s4] sm:$0x3] }
 0x119   : > { %v3175_v40 = vperm.slane %v916_v39, 0 }
 0x11a   : > { %3934 = vst [vmem:[#allocation19_spill] sm:$0xff] %v3134_v44 }
 0x11d   : > { %v563_v42 = vpop.f32.mrf.mxu0 }
 0x11e   : > { %v564_v43 = vadd.f32 %v3106_v2, %v563_v42 }
 0x120   : > { %v3136_v46 = vmul.f32 %v2553_v41, %v564_v43  ;;  %v3177_v41 = vperm.slane %v916_v39, 1 }
 0x122   : > { %3935 = vst [vmem:[#allocation20_spill] sm:$0xff] %v3136_v46  ;;  %v685_v47 = vpack.c.bf16 %v3136_v46, %v3134_v44 }
 0x124   : > { %841 = vmatmul.bf16.gmra.mxu1 %v685_v47  ;;  %890 = vmatmul.bf16.gmra.mxu2 %v685_v47 }
 0x125   : > { %v566_v48 = vpop.f32.mrf.mxu0 }
 0x126   : > { %v567_v50 = vadd.f32 %v3106_v2, %v566_v48 }
 0x128   : > { %v3142_v56 = vmul.f32 %v2558_v51, %v567_v50 }
 0x12a   : > { %3936 = vst [vmem:[#allocation21_spill] sm:$0xff] %v3142_v56 }
 0x12d   : > { %v568_v53 = vpop.f32.mrf.mxu0 }
 0x12e   : > { %v569_v55 = vadd.f32 %v3106_v2, %v568_v53 }
 0x130   : > { %v3144_v57 = vmul.f32 %v2559_v52, %v569_v55 }
 0x132   : > { %3937 = vst [vmem:[#allocation22_spill] sm:$0xff] %v3144_v57  ;;  %v686_v58 = vpack.c.bf16 %v3144_v57, %v3142_v56 }
 0x134   : > { %846 = vmatmul.bf16.gmra.mxu1 %v686_v58  ;;  %895 = vmatmul.bf16.gmra.mxu2 %v686_v58 }
 0x135   : > { %v571_v59 = vpop.f32.mrf.mxu0 }
 0x136   : > { %v572_v62 = vadd.f32 %v3106_v2, %v571_v59 }
 0x138   : > { %v3150_v4 = vmul.f32 %v2563_v63, %v572_v62 }
 0x13a   : > { %3938 = vst [vmem:[#allocation23_spill] sm:$0xff] %v3150_v4 }
 0x13d   : > { %v573_v1 = vpop.f32.mrf.mxu0 }
 0x13e   : > { %v574_v3 = vadd.f32 %v3106_v2, %v573_v1 }
 0x140   : > { %v3152_v5 = vmul.f32 %v2564_v0, %v574_v3 }
 0x142   : > { %3939 = vst [vmem:[#allocation24_spill] sm:$0xff] %v3152_v5  ;;  %v687_v6 = vpack.c.bf16 %v3152_v5, %v3150_v4 }
 0x144   : > { %851 = vmatmul.bf16.gmra.mxu1 %v687_v6  ;;  %900 = vmatmul.bf16.gmra.mxu2 %v687_v6 }
 0x145   : > { %v576_v7 = vpop.f32.mrf.mxu0 }
 0x146   : > { %v577_v13 = vadd.f32 %v3106_v2, %v576_v7 }
 0x148   : > { %v3158_v19 = vmul.f32 %v2568_v16, %v577_v13 }
 0x14a   : > { %3940 = vst [vmem:[#allocation25_spill] sm:$0xff] %v3158_v19 }
 0x14d   : > { %v578_v14 = vpop.f32.mrf.mxu0 }
 0x14e   : > { %v579_v17 = vadd.f32 %v3106_v2, %v578_v14 }
 0x150   : > { %v3160_v20 = vmul.f32 %v2569_v15, %v579_v17 }
 0x152   : > { %3941 = vst [vmem:[#allocation26_spill] sm:$0xff] %v3160_v20  ;;  %v688_v21 = vpack.c.bf16 %v3160_v20, %v3158_v19 }
 0x154   : > { %856 = vmatmul.bf16.gmra.mxu1 %v688_v21  ;;  %905 = vmatmul.bf16.gmra.mxu2 %v688_v21 }
 0x155   : > { %v581_v24 = vpop.f32.mrf.mxu0 }
 0x156   : > { %v582_v27 = vadd.f32 %v3106_v2, %v581_v24 }
 0x158   : > { %v3168_v36 = vmul.f32 %v2573_v28, %v582_v27 }
 0x15a   : > { %3943 = vst [vmem:[#allocation28_spill] sm:$0xff] %v3168_v36 }
 0x15d   : > { %v583_v29 = vpop.f32.mrf.mxu0 }
 0x15e   : > { %v584_v31 = vadd.f32 %v3106_v2, %v583_v29 }
 0x160   : > { %v3166_v32 = vmul.f32 %v2574_v30, %v584_v31 }
 0x162   : > { %3942 = vst [vmem:[#allocation27_spill] sm:$0xff] %v3166_v32  ;;  %v689_v37 = vpack.c.bf16 %v3166_v32, %v3168_v36 }
 0x164   : > { %861 = vmatmul.bf16.gmra.mxu1 %v689_v37  ;;  %910 = vmatmul.bf16.gmra.mxu2 %v689_v37 }
 0x171   : > { %v827_v38 = vpop.f32.mrf.mxu1 }
 0x172   : > { %v922_v2 = vsub.f32 %v3175_v40, %v827_v38 }
 0x177   : > { %v876_v42 = vpop.f32.mrf.mxu2 }
 0x178   : > { %v923_v43 = vsub.f32 %v3177_v41, %v876_v42 }
 0x179   : > { %v829_v47 = vpop.f32.mrf.mxu1 }
 0x17a   : > { %v954_v48 = vmin.f32 %v922_v2, %v923_v43  ;;  %v3182_v50 = vsub.f32 %v3175_v40, %v829_v47 }
 0x17c   : > { %955 = vmin.xlane.f32.xlu2 %v954_v48 }
 0x17f   : > { %v878_v49 = vpop.f32.mrf.mxu2 }
 0x180   : > { %v3185_v51 = vsub.f32 %v3177_v41, %v878_v49 }
 0x181   : > { %v832_v52 = vpop.f32.mrf.mxu1 }
 0x182   : > { %v957_v53 = vmin.f32 %v3182_v50, %v3185_v51  ;;  %v3190_v58 = vsub.f32 %v3175_v40, %v832_v52 }
 0x184   : > { %958 = vmin.xlane.f32.xlu0 %v957_v53 }
 0x187   : > { %v881_v55 = vpop.f32.mrf.mxu2 }
 0x188   : > { %v3193_v59 = vsub.f32 %v3177_v41, %v881_v55  ;;  %v1002_v55 = vlaneseq }
 0x189   : > { %v834_v60 = vpop.f32.mrf.mxu1 }
 0x18a   : > { %v960_v62 = vmin.f32 %v3190_v58, %v3193_v59  ;;  %v3198_v0 = vsub.f32 %v3175_v40, %v834_v60  ;;  %v3245_v60 = vand.u32 127, %v1002_v55 }
 0x18c   : > { %961 = vmin.xlane.f32.xlu1 %v960_v62  ;;  %v3248_v62 = vadd.s32 128, %v3245_v60 }
 0x18f   : > { %v883_v63 = vpop.f32.mrf.mxu2 }
 0x190   : > { %v3201_v1 = vsub.f32 %v3177_v41, %v883_v63 }
 0x191   : > { %v837_v3 = vpop.f32.mrf.mxu1 }
 0x192   : > { %v963_v6 = vmin.f32 %v3198_v0, %v3201_v1  ;;  %v3206_v7 = vsub.f32 %v3175_v40, %v837_v3 }
 0x194   : > { %964 = vmin.xlane.f32.xlu2 %v963_v6 }
 0x197   : > { %v886_v9 = vpop.f32.mrf.mxu2 }
 0x198   : > { %v3209_v13 = vsub.f32 %v3177_v41, %v886_v9 }
 0x199   : > { %v839_v14 = vpop.f32.mrf.mxu1 }
 0x19a   : > { %v966_v15 = vmin.f32 %v3206_v7, %v3209_v13  ;;  %v3214_v16 = vsub.f32 %v3175_v40, %v839_v14 }
 0x19c   : > { %967 = vmin.xlane.f32.xlu2 %v966_v15 }
 0x19f   : > { %v888_v17 = vpop.f32.mrf.mxu2 }
 0x1a0   : > { %v3217_v21 = vsub.f32 %v3177_v41, %v888_v17 }
 0x1a1   : > { %v842_v24 = vpop.f32.mrf.mxu1 }
 0x1a2   : > { %v969_v25 = vmin.f32 %v3214_v16, %v3217_v21  ;;  %v3222_v27 = vsub.f32 %v3175_v40, %v842_v24 }
 0x1a4   : > { %970 = vmin.xlane.f32.xlu0 %v969_v25 }
 0x1a7   : > { %v891_v28 = vpop.f32.mrf.mxu2 }
 0x1a8   : > { %v3225_v29 = vsub.f32 %v3177_v41, %v891_v28 }
 0x1a9   : > { %v844_v31 = vpop.f32.mrf.mxu1 }
 0x1aa   : > { %v972_v30 = vmin.f32 %v3222_v27, %v3225_v29  ;;  %v3230_v37 = vsub.f32 %v3175_v40, %v844_v31 }
 0x1ac   : > { %973 = vmin.xlane.f32.xlu1 %v972_v30 }
 0x1af   : > { %v893_v38 = vpop.f32.mrf.mxu2 }
 0x1b0   : > { %v3233_v39 = vsub.f32 %v3177_v41, %v893_v38 }
 0x1b1   : > { %v847_v47 = vpop.f32.mrf.mxu1 }
 0x1b2   : > { %v975_v42 = vmin.f32 %v3230_v37, %v3233_v39  ;;  %v3238_v48 = vsub.f32 %v3175_v40, %v847_v47 }
 0x1b4   : > { %976 = vmin.xlane.f32.xlu2 %v975_v42 }
 0x1b7   : > { %v896_v49 = vpop.f32.mrf.mxu2 }
 0x1b8   : > { %v3241_v52 = vsub.f32 %v3177_v41, %v896_v49 }
 0x1b9   : > { %v849_v14 = vpop.f32.mrf.mxu1 }
 0x1ba   : > { %v978_v53 = vmin.f32 %v3238_v48, %v3241_v52  ;;  %v3271_v28 = vsub.f32 %v3175_v40, %v849_v14 }
 0x1bc   : > { %979 = vmin.xlane.f32.xlu2 %v978_v53 }
 0x1bf   : > { %v898_v17 = vpop.f32.mrf.mxu2 }
 0x1c0   : > { %v3274_v30 = vsub.f32 %v3177_v41, %v898_v17 }
 0x1c1   : > { %v852_v38 = vpop.f32.mrf.mxu1 }
 0x1c7   : > { %v901_v47 = vpop.f32.mrf.mxu2 }
 0x1ef   : > { %v3250_v63 = vpop.xlane.xlu2 %955 }
 0x1f0   : > { %vm1005_vm0 = vcmp.eq.f32.partialorder %v922_v2, %v3250_v63  ;;  %vm1006_vm1 = vcmp.eq.f32.partialorder %v923_v43, %v3250_v63 }
 0x1f1   : > { %v1037_v3 = vsel %vm1005_vm0, %v3245_v60, 256  ;;  %v1038_v6 = vsel %vm1006_vm1, %v3248_v62, 256 }
 0x1f2   : > { %vm1069_vm2 = vcmp.lt.s32.totalorder %v1037_v3, %v1038_v6 }
 0x1f3   : > { %v3256_v9 = vsel %vm1069_vm2, %v1037_v3, %v1038_v6  ;;  %v3293_v3 = vsub.f32 %v3175_v40, %v852_v38  ;;  %v3296_v6 = vsub.f32 %v3177_v41, %v901_v47 }
 0x1f4   : > { %v1072_v15 = vshra.s32 %v3256_v9, 16 }
 0x1f6   : > { %v3259_v24 = vcvt.s32.f32 %v1072_v15 }
 0x1f7   : > { %v3261_v25 = vpop.xlane.xlu0 %958 }
 0x1f8   : > { %vm1007_vm3 = vcmp.eq.f32.partialorder %v3182_v50, %v3261_v25  ;;  %vm1008_vm4 = vcmp.eq.f32.partialorder %v3185_v51, %v3261_v25  ;;  %1075 = vmin.xlane.f32.xlu0 %v3259_v24  ;;  %v981_v51 = vmin.f32 %v3271_v28, %v3274_v30 }
 0x1f9   : > { %v1039_v2 = vsel %vm1007_vm3, %v3245_v60, 256  ;;  %v1040_v43 = vsel %vm1008_vm4, %v3248_v62, 256 }
 0x1fa   : > { %vm1085_vm5 = vcmp.lt.s32.totalorder %v1039_v2, %v1040_v43 }
 0x1fb   : > { %v3276_v31 = vsel %vm1085_vm5, %v1039_v2, %v1040_v43  ;;  %v854_v2 = vpop.f32.mrf.mxu1  ;;  %v903_v43 = vpop.f32.mrf.mxu2 }
 0x1fc   : > { %v1088_v50 = vshra.s32 %v3276_v31, 16  ;;  %v3318_v47 = vsub.f32 %v3177_v41, %v903_v43 }
 0x1fe   : > { %v3279_v42 = vcvt.s32.f32 %v1088_v50 }
 0x1ff   : > { %v3283_v49 = vpop.xlane.xlu1 %961 }
 0x200   : > { %vm1009_vm6 = vcmp.eq.f32.partialorder %v3190_v58, %v3283_v49  ;;  %vm1010_vm7 = vcmp.eq.f32.partialorder %v3193_v59, %v3283_v49  ;;  %1091 = vmin.xlane.f32.xlu1 %v3279_v42  ;;  %982 = vmin.xlane.f32.xlu0 %v981_v51  ;;  %v984_v59 = vmin.f32 %v3293_v3, %v3296_v6 }
 0x201   : > { %v1041_v53 = vsel %vm1009_vm6, %v3245_v60, 256  ;;  %v1042_v55 = vsel %vm1010_vm7, %v3248_v62, 256  ;;  %v3315_v51 = vsub.f32 %v3175_v40, %v854_v2 }
 0x202   : > { %vm1101_vm8 = vcmp.lt.s32.totalorder %v1041_v53, %v1042_v55 }
 0x203   : > { %v3298_v14 = vsel %vm1101_vm8, %v1041_v53, %v1042_v55  ;;  %v987_v55 = vmin.f32 %v3315_v51, %v3318_v47 }
 0x204   : > { %v1104_v58 = vshra.s32 %v3298_v14, 16  ;;  %v1103_v44 = vand.u32 65535, %v3298_v14 }
 0x206   : > { %v3301_v15 = vcvt.s32.f32 %v1104_v58 }
 0x207   : > { %v3305_v17 = vpop.xlane.xlu2 %964 }
 0x208   : > { %vm1011_vm9 = vcmp.eq.f32.partialorder %v3198_v0, %v3305_v17  ;;  %vm1012_vm10 = vcmp.eq.f32.partialorder %v3201_v1, %v3305_v17  ;;  %1107 = vmin.xlane.f32.xlu1 %v3301_v15  ;;  %985 = vmin.xlane.f32.xlu0 %v984_v59 }
 0x209   : > { %v1043_v50 = vsel %vm1011_vm9, %v3245_v60, 256  ;;  %v1044_v38 = vsel %vm1012_vm10, %v3248_v62, 256 }
 0x20a   : > { %vm1117_vm11 = vcmp.lt.s32.totalorder %v1043_v50, %v1044_v38 }
 0x20b   : > { %v3320_v0 = vsel %vm1117_vm11, %v1043_v50, %v1044_v38 }
 0x20c   : > { %v1120_v1 = vshra.s32 %v3320_v0, 16 }
 0x20e   : > { %v3323_v53 = vcvt.s32.f32 %v1120_v1 }
 0x20f   : > { %v3327_v58 = vpop.xlane.xlu2 %967 }
 0x210   : > { %vm1013_vm12 = vcmp.eq.f32.partialorder %v3206_v7, %v3327_v58  ;;  %vm1014_vm13 = vcmp.eq.f32.partialorder %v3209_v13, %v3327_v58  ;;  %1123 = vmin.xlane.f32.xlu2 %v3323_v53  ;;  %988 = vmin.xlane.f32.xlu1 %v987_v55  ;;  %v906_v55 = vpop.f32.mrf.mxu2 }
 0x211   : > { %v1045_v59 = vsel %vm1013_vm12, %v3245_v60, 256  ;;  %v1046_v2 = vsel %vm1014_vm13, %v3248_v62, 256 }
 0x212   : > { %vm1133_vm14 = vcmp.lt.s32.totalorder %v1045_v59, %v1046_v2 }
 0x213   : > { %v3336_v43 = vsel %vm1133_vm14, %v1045_v59, %v1046_v2 }
 0x214   : > { %v1136_v50 = vshra.s32 %v3336_v43, 16 }
 0x216   : > { %v3339_v38 = vcvt.s32.f32 %v1136_v50  ;;  %v857_v50 = vpop.f32.mrf.mxu1 }
 0x217   : > { %v3341_v1 = vpop.xlane.xlu0 %970 }
 0x218   : > { %vm1015_vm15 = vcmp.eq.f32.partialorder %v3214_v16, %v3341_v1  ;;  %vm1016_vm0 = vcmp.eq.f32.partialorder %v3217_v21, %v3341_v1  ;;  %1139 = vmin.xlane.f32.xlu2 %v3339_v38  ;;  %v3357_v16 = vsub.f32 %v3177_v41, %v906_v55  ;;  %v3360_v21 = vsub.f32 %v3175_v40, %v857_v50  ;;  %v908_v36 = vpop.f32.mrf.mxu2 }
 0x219   : > { %v1047_v7 = vsel %vm1015_vm15, %v3245_v60, 256  ;;  %v1048_v13 = vsel %vm1016_vm0, %v3248_v62, 256 }
 0x21a   : > { %vm1149_vm1 = vcmp.lt.s32.totalorder %v1047_v7, %v1048_v13  ;;  %v990_v20 = vmin.f32 %v3360_v21, %v3357_v16 }
 0x21b   : > { %v3350_v59 = vsel %vm1149_vm1, %v1047_v7, %v1048_v13 }
 0x21c   : > { %v1152_v2 = vshra.s32 %v3350_v59, 16 }
 0x21e   : > { %v3353_v32 = vcvt.s32.f32 %v1152_v2  ;;  %v859_v19 = vpop.f32.mrf.mxu1 }
 0x21f   : > { %v3404_v46 = vsub.f32 %v3175_v40, %v859_v19 }
 0x220   : > { %1155 = vmin.xlane.f32.xlu0 %v3353_v32  ;;  %v911_v4 = vpop.f32.mrf.mxu2 }
 0x226   : > { %v862_v57 = vpop.f32.mrf.mxu1 }
 0x227   : > { %v3364_v7 = vpop.xlane.xlu2 %976 }
 0x228   : > { %vm1019_vm2 = vcmp.eq.f32.partialorder %v3230_v37, %v3364_v7  ;;  %vm1020_vm3 = vcmp.eq.f32.partialorder %v3233_v39, %v3364_v7  ;;  %991 = vmin.xlane.f32.xlu0 %v990_v20  ;;  %v3379_v37 = vsub.f32 %v3177_v41, %v911_v4  ;;  %v3382_v20 = vsub.f32 %v3175_v40, %v862_v57  ;;  %v913_v14 = vpop.f32.mrf.mxu2 }
 0x229   : > { %v1051_v13 = vsel %vm1019_vm2, %v3245_v60, 256  ;;  %v1052_v55 = vsel %vm1020_vm3, %v3248_v62, 256 }
 0x22a   : > { %vm1181_vm4 = vcmp.lt.s32.totalorder %v1051_v13, %v1052_v55  ;;  %v996_v39 = vmin.f32 %v3382_v20, %v3379_v37 }
 0x22b   : > { %v3372_v2 = vsel %vm1181_vm4, %v1051_v13, %v1052_v55  ;;  %v1071_v13 = vand.u32 65535, %v3256_v9  ;;  %v3387_v55 = vpop.xlane.xlu1 %973  ;;  %v3400_v9 = vsub.f32 %v3177_v41, %v908_v36 }
 0x22c   : > { %v1184_v50 = vshra.s32 %v3372_v2, 16  ;;  %vm1017_vm5 = vcmp.eq.f32.partialorder %v3222_v27, %v3387_v55  ;;  %vm1018_vm6 = vcmp.eq.f32.partialorder %v3225_v29, %v3387_v55  ;;  %v1087_v27 = vand.u32 65535, %v3276_v31 }
 0x22d   : > { %v1073_v4 = vcvt.s32.f32 %v1071_v13  ;;  %v1049_v56 = vsel %vm1017_vm5, %v3245_v60, 256 }
 0x22e   : > { %v3375_v5 = vcvt.s32.f32 %v1184_v50 }
 0x230   : > { %1187 = vmin.xlane.f32.xlu0 %v3375_v5 }
 0x238   : > { %997 = vmin.xlane.f32.xlu0 %v996_v39  ;;  %v1050_v39 = vsel %vm1018_vm6, %v3248_v62, 256 }
 0x239   : > { %vm1165_vm8 = vcmp.lt.s32.totalorder %v1049_v56, %v1050_v39 }
 0x23a   : > { %v3418_v19 = vsel %vm1165_vm8, %v1049_v56, %v1050_v39 }
 0x26b   : > { %v3393_v50 = vpop.xlane.xlu0 %1075 }
 0x26c   : > { %vm1077_vm7 = vcmp.eq.f32.partialorder %v3259_v24, %v3393_v50  ;;  %v1089_v24 = vcvt.s32.f32 %v1087_v27 }
 0x26d   : > { %v1078_v57 = vsel %vm1077_vm7, %v1073_v4, inf  ;;  %v993_v4 = vmin.f32 %v3404_v46, %v3400_v9 }
 0x26e   : > { %1079 = vmin.xlane.f32.xlu1 %v1078_v57 }
 0x273   : > { %v3406_v29 = vpop.xlane.xlu1 %1091  ;;  %v3408_v13 = vpop.xlane.xlu0 %982 }
 0x274   : > { %3945 = vst [vmem:[#allocation29_spill] sm:$0xff] %v3408_v13  ;;  %vm1023_vm9 = vcmp.eq.f32.partialorder %v3271_v28, %v3408_v13  ;;  %vm1024_vm10 = vcmp.eq.f32.partialorder %v3274_v30, %v3408_v13  ;;  %vm1093_vm11 = vcmp.eq.f32.partialorder %v3279_v42, %v3406_v29  ;;  %v1168_v28 = vshra.s32 %v3418_v19, 16  ;;  %v3426_v30 = vpop.xlane.xlu2 %979 }
 0x275   : > { %v1055_v36 = vsel %vm1023_vm9, %v3245_v60, 256  ;;  %v1056_v31 = vsel %vm1024_vm10, %v3248_v62, 256  ;;  %v1094_v57 = vsel %vm1093_vm11, %v1089_v24, inf  ;;  %vm1021_vm13 = vcmp.eq.f32.partialorder %v3238_v48, %v3426_v30 }
 0x276   : > { %1095 = vmin.xlane.f32.xlu2 %v1094_v57  ;;  %994 = vmin.xlane.f32.xlu1 %v993_v4  ;;  %vm1213_vm12 = vcmp.lt.s32.totalorder %v1055_v36, %v1056_v31  ;;  %v3437_v4 = vcvt.s32.f32 %v1168_v28  ;;  %vm1022_vm14 = vcmp.eq.f32.partialorder %v3241_v52, %v3426_v30  ;;  %v864_v52 = vpop.f32.mrf.mxu1 }
 0x277   : > { %v3422_v27 = vsel %vm1213_vm12, %v1055_v36, %v1056_v31  ;;  %v1105_v36 = vcvt.s32.f32 %v1103_v44 }
 0x278   : > { %v1216_v42 = vshra.s32 %v3422_v27, 16 }
 0x27a   : > { %v3429_v56 = vcvt.s32.f32 %v1216_v42  ;;  %v3460_v42 = vsub.f32 %v3177_v41, %v913_v14 }
 0x27b   : > { %v3433_v39 = vpop.xlane.xlu1 %1107  ;;  %v3435_v24 = vpop.xlane.xlu0 %985 }
 0x27c   : > { %3946 = vst [vmem:[#allocation30_spill] sm:$0xff] %v3435_v24  ;;  %vm1025_vm15 = vcmp.eq.f32.partialorder %v3293_v3, %v3435_v24  ;;  %vm1026_vm0 = vcmp.eq.f32.partialorder %v3296_v6, %v3435_v24  ;;  %1219 = vmin.xlane.f32.xlu0 %v3429_v56  ;;  %vm1109_vm1 = vcmp.eq.f32.partialorder %v3301_v15, %v3433_v39  ;;  %v1053_v3 = vsel %vm1021_vm13, %v3245_v60, 256 }
 0x27d   : > { %v1057_v31 = vsel %vm1025_vm15, %v3245_v60, 256  ;;  %v1058_v57 = vsel %vm1026_vm0, %v3248_v62, 256  ;;  %v1110_v44 = vsel %vm1109_vm1, %v1105_v36, inf  ;;  %v1054_v6 = vsel %vm1022_vm14, %v3248_v62, 256 }
 0x27e   : > { %1171 = vmin.xlane.f32.xlu2 %v3437_v4  ;;  %1111 = vmin.xlane.f32.xlu1 %v1110_v44  ;;  %vm1229_vm2 = vcmp.lt.s32.totalorder %v1057_v31, %v1058_v57  ;;  %v1119_v15 = vand.u32 65535, %v3320_v0  ;;  %v3464_v44 = vsub.f32 %v3175_v40, %v864_v52  ;;  %vm1197_vm3 = vcmp.lt.s32.totalorder %v1053_v3, %v1054_v6 }
 0x27f   : > { %v3456_v28 = vsel %vm1229_vm2, %v1057_v31, %v1058_v57  ;;  %v3481_v0 = vsel %vm1197_vm3, %v1053_v3, %v1054_v6  ;;  %v1135_v31 = vand.u32 65535, %v3336_v43  ;;  %v1151_v6 = vand.u32 65535, %v3350_v59 }
 0x280   : > { %v1232_v36 = vshra.s32 %v3456_v28, 16  ;;  %v1121_v35 = vcvt.s32.f32 %v1119_v15  ;;  %v999_v40 = vmin.f32 %v3464_v44, %v3460_v42 }
 0x282   : > { %v3466_v24 = vcvt.s32.f32 %v1232_v36  ;;  %v1153_v36 = vcvt.s32.f32 %v1151_v6  ;;  %v1082_v6 = vcvt.f32.s32 %v3393_v50 }
 0x283   : > { %v3468_v13 = vpop.xlane.xlu2 %1123  ;;  %v3470_v48 = vpop.xlane.xlu1 %988 }
 0x284   : > { %3947 = vst [vmem:[#allocation31_spill] sm:$0xff] %v3470_v48  ;;  %vm1027_vm4 = vcmp.eq.f32.partialorder %v3315_v51, %v3470_v48  ;;  %vm1028_vm5 = vcmp.eq.f32.partialorder %v3318_v47, %v3470_v48  ;;  %1235 = vmin.xlane.f32.xlu0 %v3466_v24  ;;  %vm1125_vm6 = vcmp.eq.f32.partialorder %v3323_v53, %v3468_v13  ;;  %v1200_v47 = vshra.s32 %v3481_v0, 16 }
 0x285   : > { %v1126_v41 = vsel %vm1125_vm6, %v1121_v35, inf  ;;  %v1059_v14 = vsel %vm1027_vm4, %v3245_v60, 256  ;;  %v1060_v51 = vsel %vm1028_vm5, %v3248_v62, 256  ;;  %v1137_v53 = vcvt.s32.f32 %v1135_v31 }
 0x286   : > { %1127 = vmin.xlane.f32.xlu2 %v1126_v41  ;;  %1000 = vmin.xlane.f32.xlu1 %v999_v40  ;;  %vm1245_vm7 = vcmp.lt.s32.totalorder %v1059_v14, %v1060_v51  ;;  %v3489_v52 = vcvt.s32.f32 %v1200_v47 }
 0x287   : > { %v3493_v3 = vsel %vm1245_vm7, %v1059_v14, %v1060_v51  ;;  %v1183_v51 = vand.u32 65535, %v3372_v2 }
 0x288   : > { %v1248_v43 = vshra.s32 %v3493_v3, 16 }
 0x28a   : > { %v3502_v40 = vcvt.s32.f32 %v1248_v43  ;;  %v1098_v43 = vcvt.f32.s32 %v3406_v29 }
 0x28b   : > { %v3487_v57 = vpop.xlane.xlu2 %1139 }
 0x28c   : > { %vm1141_vm8 = vcmp.eq.f32.partialorder %v3339_v38, %v3487_v57 }
 0x28d   : > { %v1142_v35 = vsel %vm1141_vm8, %v1137_v53, inf }
 0x28e   : > { %1203 = vmin.xlane.f32.xlu2 %v3489_v52  ;;  %1143 = vmin.xlane.f32.xlu1 %v1142_v35  ;;  %v1185_v35 = vcvt.s32.f32 %v1183_v51 }
 0x293   : > { %v3498_v15 = vpop.xlane.xlu0 %1155 }
 0x294   : > { %vm1157_vm9 = vcmp.eq.f32.partialorder %v3353_v32, %v3498_v15 }
 0x295   : > { %v1158_v41 = vsel %vm1157_vm9, %v1153_v36, inf  ;;  %v1083_v36 = vshll.u32 %v1082_v6, 16 }
 0x296   : > { %1159 = vmin.xlane.f32.xlu2 %v1158_v41  ;;  %1251 = vmin.xlane.f32.xlu1 %v3502_v40 }
 0x29b   : > { %v3505_v38 = vpop.xlane.xlu0 %991 }
 0x29c   : > { %vm1029_vm10 = vcmp.eq.f32.partialorder %v3360_v21, %v3505_v38  ;;  %vm1030_vm11 = vcmp.eq.f32.partialorder %v3357_v16, %v3505_v38  ;;  %vm1547_vm14 = vcmp.lt.f32.partialorder %v3505_v38, inf }
 0x29d   : > { %v1061_v59 = vsel %vm1029_vm10, %v3245_v60, 256  ;;  %v1062_v14 = vsel %vm1030_vm11, %v3248_v62, 256 }
 0x29e   : > { %vm1261_vm12 = vcmp.lt.s32.totalorder %v1061_v59, %v1062_v14 }
 0x29f   : > { %v3513_v32 = vsel %vm1261_vm12, %v1061_v59, %v1062_v14  ;;  %v1099_v59 = vshll.u32 %v1098_v43, 16 }
 0x2a0   : > { %v1264_v31 = vshra.s32 %v3513_v32, 16 }
 0x2a2   : > { %v3517_v47 = vcvt.s32.f32 %v1264_v31 }
 0x2a3   : > { %v3519_v53 = vpop.xlane.xlu0 %1187 }
 0x2a4   : > { %1267 = vmin.xlane.f32.xlu1 %v3517_v47  ;;  %vm1189_vm13 = vcmp.eq.f32.partialorder %v3375_v5, %v3519_v53  ;;  %v1215_v5 = vand.u32 65535, %v3422_v27 }
 0x2a5   : > { %v1190_v16 = vsel %vm1189_vm13, %v1185_v35, inf }
 0x2a6   : > { %1191 = vmin.xlane.f32.xlu0 %v1190_v16  ;;  %v1167_v16 = vand.u32 65535, %v3418_v19  ;;  %v1217_v27 = vcvt.s32.f32 %v1215_v5 }
 0x2a8   : > { %v1169_v43 = vcvt.s32.f32 %v1167_v16 }
 0x2ab   : > { %v3526_v41 = vpop.xlane.xlu0 %997 }
 0x2ac   : > { %vm1033_vm11 = vcmp.eq.f32.partialorder %v3382_v20, %v3526_v41  ;;  %vm1034_vm12 = vcmp.eq.f32.partialorder %v3379_v37, %v3526_v41 }
 0x2ad   : > { %v1066_v20 = vsel %vm1034_vm12, %v3248_v62, 256 }
 0x2e1   : > { %v1080_v21 = vpop.xlane.xlu1 %1079 }
 0x2e2   : > { %v1081_v2 = vcvt.f32.s32 %v1080_v21 }
 0x2e4   : > { %v1084_v14 = vadd.s32 %v1083_v36, %v1081_v2  ;;  %v1231_v36 = vand.u32 65535, %v3456_v28 }
 0x2e6   : > { %vm1325_vm3 = vcmp.eq.s32.totalorder %v3245_v60, %v1084_v14  ;;  %vm1326_vm7 = vcmp.eq.s32.totalorder %v3248_v62, %v1084_v14  ;;  %v1130_v14 = vcvt.f32.s32 %v3468_v13 }
 0x2e8   : > { %v1131_v28 = vshll.u32 %v1130_v14, 16 }
 0x2e9   : > { %v1096_v31 = vpop.xlane.xlu2 %1095  ;;  %v3528_v51 = vpop.xlane.xlu1 %994 }
 0x2ea   : > { %v1097_v48 = vcvt.f32.s32 %v1096_v31  ;;  %vm1031_vm15 = vcmp.eq.f32.partialorder %v3404_v46, %v3528_v51  ;;  %vm1032_vm0 = vcmp.eq.f32.partialorder %v3400_v9, %v3528_v51  ;;  %vm1548_vm1 = vcmp.lt.f32.partialorder %v3528_v51, inf }
 0x2eb   : > { %vm3541_vm2 = vmpackc.low %vm1548_vm1, %vm1547_vm14  ;;  %v1063_v35 = vsel %vm1031_vm15, %v3245_v60, 256  ;;  %v1064_v46 = vsel %vm1032_vm0, %v3248_v62, 256  ;;  %v1065_v31 = vsel %vm1033_vm11, %v3245_v60, 256 }
 0x2ec   : > { %v1100_v29 = vadd.s32 %v1099_v59, %v1097_v48  ;;  %vm1277_vm8 = vcmp.lt.s32.totalorder %v1063_v35, %v1064_v46  ;;  %v2854_v48 = vmov 1.0|1.0   ;;  %v1114_v59 = vcvt.f32.s32 %v3433_v39 }
 0x2ed   : > { %v3566_v2 = vsel %vm1277_vm8, %v1063_v35, %v1064_v46  ;;  %vm1293_vm0 = vcmp.lt.s32.totalorder %v1065_v31, %v1066_v20 }
 0x2ee   : > { %vm1327_vm4 = vcmp.eq.s32.totalorder %v3245_v60, %v1100_v29  ;;  %vm1328_vm5 = vcmp.eq.s32.totalorder %v3248_v62, %v1100_v29  ;;  %v1280_v37 = vshra.s32 %v3566_v2, 16  ;;  %v1115_v35 = vshll.u32 %v1114_v59, 16 }
 0x2ef   : > { %v3551_v9 = vpop.xlane.xlu0 %1219  ;;  %vm2241_vm6 = vmpackc.low %vm1327_vm4, %vm1325_vm3 }
 0x2f0   : > { %2242 = vmatmul.msk.bf16.vlgmr.msrb.gmra.mxu2 %vm2241_vm6, %v2854_v48  ;;  %vm2257_vm9 = vmpackc.low %vm1328_vm5, %vm1326_vm7  ;;  %vm1221_vm10 = vcmp.eq.f32.partialorder %v3429_v56, %v3551_v9  ;;  %v3580_v16 = vcvt.s32.f32 %v1280_v37  ;;  %v1146_v37 = vcvt.f32.s32 %v3487_v57 }
 0x2f1   : > { %2258 = vmatmul.msk.bf16.vlgmr.msrb.gmra.mxu0 %vm2257_vm9, %v2854_v48  ;;  %v3558_v19 = vpop.xlane.xlu2 %1171  ;;  %v1112_v21 = vpop.xlane.xlu1 %1111  ;;  %v1222_v6 = vsel %vm1221_vm10, %v1217_v27, inf }
 0x2f2   : > { %1223 = vmin.xlane.f32.xlu1 %v1222_v6  ;;  %vm1173_vm13 = vcmp.eq.f32.partialorder %v3437_v4, %v3558_v19  ;;  %v1113_v5 = vcvt.f32.s32 %v1112_v21  ;;  %v1233_v4 = vcvt.s32.f32 %v1231_v36  ;;  %v3586_v21 = vsel %vm1293_vm0, %v1065_v31, %v1066_v20 }
 0x2f3   : > { %v1174_v56 = vsel %vm1173_vm13, %v1169_v43, inf  ;;  %v1199_v36 = vand.u32 65535, %v3481_v0 }
 0x2f4   : > { %1175 = vmin.xlane.f32.xlu2 %v1174_v56  ;;  %v1116_v27 = vadd.s32 %v1115_v35, %v1113_v5  ;;  %v1162_v5 = vcvt.f32.s32 %v3498_v15 }
 0x2f5   : > { %v1201_v59 = vcvt.s32.f32 %v1199_v36 }
 0x2f6   : > { %vm1329_vm5 = vcmp.eq.s32.totalorder %v3245_v60, %v1116_v27  ;;  %vm1330_vm9 = vcmp.eq.s32.totalorder %v3248_v62, %v1116_v27 }
 0x2f7   : > { %v3574_v29 = vpop.xlane.xlu0 %1235 }
 0x2f8   : > { %vm1237_vm15 = vcmp.eq.f32.partialorder %v3466_v24, %v3574_v29 }
 0x2f9   : > { %v1128_v39 = vpop.xlane.xlu2 %1127  ;;  %v3578_v46 = vpop.xlane.xlu1 %1000  ;;  %v1238_v13 = vsel %vm1237_vm15, %v1233_v4, inf  ;;  %v1247_v4 = vand.u32 65535, %v3493_v3  ;;  %v1263_v3 = vand.u32 65535, %v3513_v32  ;;  %v2855_v32 = vmov 126  }
 0x2fa   : > { %v1129_v6 = vcvt.f32.s32 %v1128_v39  ;;  %vm1035_vm3 = vcmp.eq.f32.partialorder %v3464_v44, %v3578_v46  ;;  %vm1036_vm4 = vcmp.eq.f32.partialorder %v3460_v42, %v3578_v46  ;;  %1239 = vmin.xlane.f32.xlu1 %v1238_v13  ;;  %v1296_v42 = vshra.s32 %v3586_v21, 16  ;;  %2587 = vset.pattern.permute.xlu0 %v2855_v32 }
 0x2fb   : > { %v1067_v43 = vsel %vm1035_vm3, %v3245_v60, 256  ;;  %v1068_v56 = vsel %vm1036_vm4, %v3248_v62, 256  ;;  %v1147_v39 = vshll.u32 %v1146_v37, 16  ;;  %v1163_v13 = vshll.u32 %v1162_v5, 16  ;;  %2575 = vset.pattern.permute.xlu1 %v2855_v32  ;;  %2581 = vset.pattern.permute.xlu2 %v2855_v32 }
 0x2fc   : > { %v1132_v24 = vadd.s32 %v1131_v28, %v1129_v6  ;;  %1283 = vmin.xlane.f32.xlu2 %v3580_v16  ;;  %vm1309_vm11 = vcmp.lt.s32.totalorder %v1067_v43, %v1068_v56  ;;  %v3603_v14 = vcvt.s32.f32 %v1296_v42  ;;  %v1249_v6 = vcvt.s32.f32 %v1247_v4 }
 0x2fd   : > { %v3605_v20 = vsel %vm1309_vm11, %v1067_v43, %v1068_v56  ;;  %v1265_v36 = vcvt.s32.f32 %v1263_v3 }
 0x2fe   : > { %vm1331_vm6 = vcmp.eq.s32.totalorder %v3245_v60, %v1132_v24  ;;  %vm1332_vm7 = vcmp.eq.s32.totalorder %v3248_v62, %v1132_v24  ;;  %v1312_v28 = vshra.s32 %v3605_v20, 16 }
 0x2ff   : > { %vm2243_vm8 = vmpackc.low %vm1331_vm6, %vm1329_vm5 }
 0x300   : > { %2244 = vmatmul.msk.bf16.gmra.mxu2 %vm2243_vm8, %v2854_v48  ;;  %vm2259_vm10 = vmpackc.low %vm1332_vm7, %vm1330_vm9  ;;  %v3614_v56 = vcvt.s32.f32 %v1312_v28 }
 0x301   : > { %2260 = vmatmul.msk.bf16.gmra.mxu0 %vm2259_vm10, %v2854_v48  ;;  %v3599_v44 = vpop.xlane.xlu2 %1203  ;;  %v1144_v0 = vpop.xlane.xlu1 %1143 }
 0x302   : > { %vm1205_vm12 = vcmp.eq.f32.partialorder %v3489_v52, %v3599_v44  ;;  %v1145_v35 = vcvt.f32.s32 %v1144_v0 }
 0x303   : > { %v1206_v31 = vsel %vm1205_vm12, %v1201_v59, inf  ;;  %v1194_v59 = vcvt.f32.s32 %v3519_v53 }
 0x304   : > { %1207 = vmin.xlane.f32.xlu0 %v1206_v31  ;;  %1299 = vmin.xlane.f32.xlu2 %v3603_v14  ;;  %v1148_v24 = vadd.s32 %v1147_v39, %v1145_v35  ;;  %v1178_v31 = vcvt.f32.s32 %v3558_v19 }
 0x305   : > { %v1195_v5 = vshll.u32 %v1194_v59, 16 }
 0x306   : > { %vm1333_vm15 = vcmp.eq.s32.totalorder %v3245_v60, %v1148_v24  ;;  %vm1334_vm5 = vcmp.eq.s32.totalorder %v3248_v62, %v1148_v24  ;;  %v1179_v35 = vshll.u32 %v1178_v31, 16  ;;  %v1295_v24 = vand.u32 65535, %v3586_v21 }
 0x309   : > { %v1160_v52 = vpop.xlane.xlu2 %1159  ;;  %v3612_v27 = vpop.xlane.xlu1 %1251 }
 0x30a   : > { %v1161_v43 = vcvt.f32.s32 %v1160_v52  ;;  %vm1253_vm13 = vcmp.eq.f32.partialorder %v3502_v40, %v3612_v27  ;;  %v1258_v21 = vcvt.f32.s32 %v3612_v27 }
 0x30b   : > { %v1254_v57 = vsel %vm1253_vm13, %v1249_v6, inf  ;;  %v1226_v6 = vcvt.f32.s32 %v3551_v9  ;;  %v1242_v9 = vcvt.f32.s32 %v3574_v29 }
 0x30c   : > { %v1164_v15 = vadd.s32 %v1163_v13, %v1161_v43  ;;  %1315 = vmin.xlane.f32.xlu0 %v3614_v56  ;;  %1255 = vmin.xlane.f32.xlu2 %v1254_v57  ;;  %v1210_v43 = vcvt.f32.s32 %v3599_v44  ;;  %v1311_v44 = vand.u32 65535, %v3605_v20 }
 0x30e   : > { %vm1335_vm0 = vcmp.eq.s32.totalorder %v3245_v60, %v1164_v15  ;;  %vm1336_vm3 = vcmp.eq.s32.totalorder %v3248_v62, %v1164_v15  ;;  %v1227_v15 = vshll.u32 %v1226_v6, 16  ;;  %v1313_v20 = vcvt.s32.f32 %v1311_v44 }
 0x30f   : > { %vm2245_vm4 = vmpackc.low %vm1335_vm0, %vm1333_vm15 }
 0x310   : > { %2246 = vmatmul.msk.bf16.gmra.mxu2 %vm2245_vm4, %v2854_v48  ;;  %vm2261_vm6 = vmpackc.low %vm1336_vm3, %vm1334_vm5 }
 0x311   : > { %2262 = vmatmul.msk.bf16.gmra.mxu0 %vm2261_vm6, %v2854_v48 }
 0x317   : > { %v3626_v40 = vpop.xlane.xlu1 %1267 }
 0x318   : > { %vm1269_vm7 = vcmp.eq.f32.partialorder %v3517_v47, %v3626_v40  ;;  %v1279_v47 = vand.u32 65535, %v3566_v2 }
 0x319   : > { %v1270_v42 = vsel %vm1269_vm7, %v1265_v36, inf  ;;  %v1192_v0 = vpop.xlane.xlu0 %1191 }
 0x31a   : > { %1271 = vmin.xlane.f32.xlu0 %v1270_v42  ;;  %v1193_v37 = vcvt.f32.s32 %v1192_v0  ;;  %v1281_v52 = vcvt.s32.f32 %v1279_v47  ;;  %v1297_v42 = vcvt.s32.f32 %v1295_v24  ;;  %v1211_v0 = vshll.u32 %v1210_v43, 16  ;;  %v2374_v24 = vld [vmem:[#allocation8 + $0x28] sm:$0xff] }
 0x31c   : > { %v1196_v28 = vadd.s32 %v1195_v5, %v1193_v37 }
 0x31e   : > { %vm1339_vm9 = vcmp.eq.s32.totalorder %v3245_v60, %v1196_v28  ;;  %vm1340_vm12 = vcmp.eq.s32.totalorder %v3248_v62, %v1196_v28 }
 0x365   : > { %v1224_v53 = vpop.xlane.xlu1 %1223 }
 0x366   : > { %v1225_v57 = vcvt.f32.s32 %v1224_v53 }
 0x367   : > { %v1176_v4 = vpop.xlane.xlu2 %1175 }
 0x368   : > { %v1177_v39 = vcvt.f32.s32 %v1176_v4  ;;  %v1228_v59 = vadd.s32 %v1227_v15, %v1225_v57  ;;  %v2371_v15 = vld [vmem:[#allocation8 + $0x10] sm:$0xff] }
 0x36a   : > { %v1180_v13 = vadd.s32 %v1179_v35, %v1177_v39  ;;  %vm1343_vm4 = vcmp.eq.s32.totalorder %v3245_v60, %v1228_v59  ;;  %vm1344_vm7 = vcmp.eq.s32.totalorder %v3248_v62, %v1228_v59  ;;  %v1259_v35 = vshll.u32 %v1258_v21, 16  ;;  %v2369_v21 = vld [vmem:[#allocation8] sm:$0xff] }
 0x36c   : > { %vm1337_vm8 = vcmp.eq.s32.totalorder %v3245_v60, %v1180_v13  ;;  %vm1338_vm10 = vcmp.eq.s32.totalorder %v3248_v62, %v1180_v13 }
 0x36d   : > { %vm2247_vm11 = vmpackc.low %vm1339_vm9, %vm1337_vm8 }
 0x36e   : > { %2248 = vmatmul.msk.bf16.vlgmr.msra.gmra.mxu3 %vm2247_vm11, %v2854_v48  ;;  %vm2263_vm13 = vmpackc.low %vm1340_vm12, %vm1338_vm10 }
 0x36f   : > { %2264 = vmatmul.msk.bf16.gmra.mxu0 %vm2263_vm13, %v2854_v48  ;;  %v3639_v19 = vpop.xlane.xlu2 %1283 }
 0x370   : > { %vm1285_vm15 = vcmp.eq.f32.partialorder %v3580_v16, %v3639_v19  ;;  %v1240_v16 = vpop.xlane.xlu1 %1239 }
 0x371   : > { %v1286_v2 = vsel %vm1285_vm15, %v1281_v52, inf  ;;  %v1241_v4 = vcvt.f32.s32 %v1240_v16 }
 0x372   : > { %1287 = vmin.xlane.f32.xlu1 %v1286_v2  ;;  %v2376_v2 = vld [vmem:[#allocation8 + $0x38] sm:$0xff] }
 0x373   : > { %v1446_v52 = vpop.f32.mrf.mxu2  ;;  %1814 = vmatpush.bf16.msrb.mxu3 %v2376_v2 }
 0x377   : > { %v3646_v3 = vpop.xlane.xlu2 %1299  ;;  %v1208_v36 = vpop.xlane.xlu0 %1207 }
 0x378   : > { %v1209_v31 = vcvt.f32.s32 %v1208_v36  ;;  %vm1301_vm0 = vcmp.eq.f32.partialorder %v3603_v14, %v3646_v3  ;;  %v1243_v14 = vshll.u32 %v1242_v9, 16  ;;  %v1290_v36 = vcvt.f32.s32 %v3639_v19 }
 0x379   : > { %v1302_v37 = vsel %vm1301_vm0, %v1297_v42, inf }
 0x37a   : > { %v1212_v5 = vadd.s32 %v1211_v0, %v1209_v31  ;;  %1303 = vmin.xlane.f32.xlu2 %v1302_v37  ;;  %v1244_v28 = vadd.s32 %v1243_v14, %v1241_v4  ;;  %v2370_v31 = vld [vmem:[#allocation8 + $0x8] sm:$0xff]  ;;  %v1291_v37 = vshll.u32 %v1290_v36, 16  ;;  %v1306_v4 = vcvt.f32.s32 %v3646_v3 }
 0x37b   : > { %v1448_v43 = vpop.f32.mrf.mxu2 }
 0x37c   : > { %vm1341_vm3 = vcmp.eq.s32.totalorder %v3245_v60, %v1212_v5  ;;  %vm1342_vm5 = vcmp.eq.s32.totalorder %v3248_v62, %v1212_v5  ;;  %vm1346_vm10 = vcmp.eq.s32.totalorder %v3248_v62, %v1244_v28  ;;  %vm1345_vm15 = vcmp.eq.s32.totalorder %v3245_v60, %v1244_v28 }
 0x37d   : > { %vm2249_vm6 = vmpackc.low %vm1343_vm4, %vm1341_vm3 }
 0x37e   : > { %2250 = vmatmul.msk.bf16.gmra.mxu3 %vm2249_vm6, %v2854_v48  ;;  %vm2265_vm8 = vmpackc.low %vm1344_vm7, %vm1342_vm5 }
 0x37f   : > { %2266 = vmatmul.msk.bf16.gmra.mxu0 %vm2265_vm8, %v2854_v48  ;;  %v3659_v29 = vpop.xlane.xlu0 %1315  ;;  %v1256_v27 = vpop.xlane.xlu2 %1255 }
 0x380   : > { %v1257_v39 = vcvt.f32.s32 %v1256_v27  ;;  %vm1317_vm9 = vcmp.eq.f32.partialorder %v3614_v56, %v3659_v29  ;;  %v1495_v56 = vpop.f32.mrf.mxu0  ;;  %v1322_v27 = vcvt.f32.s32 %v3659_v29 }
 0x381   : > { %v1318_v32 = vsel %vm1317_vm9, %v1313_v20, inf  ;;  %vm1535_vm9 = vcmp.lt.f32.partialorder %v3250_v63, inf }
 0x382   : > { %v1260_v13 = vadd.s32 %v1259_v35, %v1257_v39  ;;  %1319 = vmin.xlane.f32.xlu0 %v1318_v32  ;;  %v1307_v35 = vshll.u32 %v1306_v4, 16  ;;  %v3692_v39 = vadd.f32 %v1495_v56, %v1446_v52 }
 0x383   : > { %v1451_v57 = vpop.f32.mrf.mxu2 }
 0x384   : > { %vm1348_vm11 = vcmp.eq.s32.totalorder %v3248_v62, %v1260_v13  ;;  %vm1347_vm12 = vcmp.eq.s32.totalorder %v3245_v60, %v1260_v13  ;;  %v1583_v29 = vsel %vm1535_vm9, %v3692_v39, 0.0 }
 0x385   : > { %vm2267_vm13 = vmpackc.low %vm1348_vm11, %vm1346_vm10  ;;  %vm1536_vm10 = vcmp.lt.f32.partialorder %v3261_v25, inf  ;;  %vm1537_vm11 = vcmp.lt.f32.partialorder %v3283_v49, inf }
 0x386   : > { %2268 = vmatmul.msk.bf16.vlgmr.msrb.gmra.mxu1 %vm2267_vm13, %v2854_v48  ;;  %vm2251_vm0 = vmpackc.low %vm1347_vm12, %vm1345_vm15 }
 0x388   : > { %v1497_v47 = vpop.f32.mrf.mxu0 }
 0x389   : > { %v3694_v2 = vadd.f32 %v1497_v47, %v1448_v43 }
 0x38b   : > { %2577 = vperm.xlu1 %2575, %v3045_v8   ;;  %v2375_v8 = vld [vmem:[#allocation8 + $0x30] sm:$0xff]  ;;  %v1453_v44 = vpop.f32.mrf.mxu2 }
 0x38c   : > { %1815 = vmatpush.bf16.msrb.mxu3 %v2375_v8  ;;  %v1323_v8 = vshll.u32 %v1322_v27, 16 }
 0x38e   : > { %2252 = vmatmul.msk.bf16.gmra.mxu3 %vm2251_vm0, %v2854_v48 }
 0x390   : > { %v1500_v53 = vpop.f32.mrf.mxu0  ;;  %1816 = vmatpush.bf16.msrb.mxu3 %v2374_v24 }
 0x392   : > { %2583 = vperm.xlu2 %2581, %v3048_v12   ;;  %v2373_v12 = vld [vmem:[#allocation8 + $0x20] sm:$0xff] }
 0x393   : > { %2594 = vperm.xlu1 %2575, %v3067_v33   ;;  %v1456_v28 = vpop.f32.mrf.mxu2 }
 0x394   : > { %1817 = vmatpush.bf16.msrb.mxu3 %v2373_v12 }
 0x396   : > { %2589 = vperm.xlu0 %2587, %v3058_v26   ;;  %v2372_v26 = vld [vmem:[#allocation8 + $0x18] sm:$0xff] }
 0x398   : > { %v1502_v6 = vpop.f32.mrf.mxu0  ;;  %1818 = vmatpush.bf16.msrb.mxu3 %v2372_v26  ;;  %v3696_v26 = vadd.f32 %v1500_v53, %v1451_v57  ;;  %v1584_v53 = vsel %vm1536_vm10, %v3694_v2, 0.0 }
 0x399   : > { %v3705_v56 = vadd.f32 %v1502_v6, %v1453_v44 }
 0x39a   : > { %2599 = vperm.xlu2 %2581, %v3085_v45   ;;  %v1272_v45 = vpop.xlane.xlu0 %1271  ;;  %v1585_v43 = vsel %vm1537_vm11, %v3696_v26, 0.0 }
 0x39b   : > { %2604 = vperm.xlu1 %2575, %v3090_v54   ;;  %v1274_v54 = vcvt.f32.s32 %v3626_v40  ;;  %v1273_v42 = vcvt.f32.s32 %v1272_v45  ;;  %v1599_v45 = vsub.f32 %v1583_v29, %v3110_v10 }
 0x39c   : > { %1819 = vmatpush.bf16.msrb.mxu3 %v2371_v15  ;;  %v1601_v15 = vsub.f32 %v1585_v43, %v3118_v22 }
 0x39d   : > { %v1275_v0 = vshll.u32 %v1274_v54, 16  ;;  %v1600_v54 = vsub.f32 %v1584_v53, %v3112_v11  ;;  %v2306_v53 = vpack.c.bf16 %v3694_v2, %v3692_v39  ;;  %v3953_v2 = vld [vmem:[#allocation20_spill] sm:$0xff] }
 0x39f   : > { %v1276_v9 = vadd.s32 %v1275_v0, %v1273_v42 }
 0x3a0   : > { %v3675_v33 = vpop.f32.mrf.mxu0  ;;  %1820 = vmatpush.bf16.msrb.mxu3 %v2370_v31  ;;  %v1458_v31 = vpop.f32.mrf.mxu2 }
 0x3a1   : > { %vm1349_vm3 = vcmp.eq.s32.totalorder %v3245_v60, %v1276_v9  ;;  %vm1350_vm7 = vcmp.eq.s32.totalorder %v3248_v62, %v1276_v9  ;;  %v3736_v11 = vadd.f32 %v3675_v33, %v1456_v28 }
 0x3a2   : > { %2609 = vperm.xlu2 %2581, %v3052_v18  }
 0x3a3   : > { %2614 = vperm.xlu1 %2575, %v3095_v61  }
 0x3a4   : > { %1821 = vmatpush.bf16.msrb.mxu3 %v2369_v21 }
 0x3a8   : > { %v3680_v59 = vpop.f32.mrf.mxu0 }
 0x3a9   : > { %v3739_v21 = vadd.f32 %v3680_v59, %v1458_v31 }
 0x3e5   : > { %v1288_v16 = vpop.xlane.xlu1 %1287 }
 0x3e6   : > { %v1289_v5 = vcvt.f32.s32 %v1288_v16 }
 0x3e8   : > { %v1292_v61 = vadd.s32 %v1291_v37, %v1289_v5 }
 0x3ea   : > { %vm1351_vm4 = vcmp.eq.s32.totalorder %v3245_v60, %v1292_v61  ;;  %vm1352_vm5 = vcmp.eq.s32.totalorder %v3248_v62, %v1292_v61 }
 0x3eb   : > { %vm2253_vm6 = vmpackc.low %vm1351_vm4, %vm1349_vm3  ;;  %vm1542_vm4 = vcmp.lt.f32.partialorder %v3364_v7, inf }
 0x3ec   : > { %v3686_v40 = vpop.f32.mrf.mxu0  ;;  %2254 = vmatmul.msk.bf16.gmra.mxu3 %vm2253_vm6, %v2854_v48  ;;  %vm2269_vm8 = vmpackc.low %vm1352_vm5, %vm1350_vm7  ;;  %vm1538_vm5 = vcmp.lt.f32.partialorder %v3305_v17, inf  ;;  %vm1539_vm7 = vcmp.lt.f32.partialorder %v3327_v58, inf }
 0x3ed   : > { %2270 = vmatmul.msk.bf16.gmra.mxu1 %vm2269_vm8, %v2854_v48  ;;  %v1304_v19 = vpop.xlane.xlu2 %1303  ;;  %v1587_v27 = vsel %vm1539_vm7, %v3736_v11, 0.0  ;;  %vm1540_vm8 = vcmp.lt.f32.partialorder %v3341_v1, inf }
 0x3ee   : > { %v1305_v20 = vcvt.f32.s32 %v1304_v19  ;;  %v1588_v33 = vsel %vm1540_vm8, %v3739_v21, 0.0 }
 0x3f0   : > { %v1308_v24 = vadd.s32 %v1307_v35, %v1305_v20 }
 0x3f1   : > { %v1461_v14 = vpop.f32.mrf.mxu3 }
 0x3f2   : > { %vm1353_vm12 = vcmp.eq.s32.totalorder %v3245_v60, %v1308_v24  ;;  %vm1354_vm0 = vcmp.eq.s32.totalorder %v3248_v62, %v1308_v24  ;;  %v3743_v19 = vadd.f32 %v3686_v40, %v1461_v14  ;;  %v1603_v40 = vsub.f32 %v1587_v27, %v3126_v34 }
 0x3f4   : > { %v1512_v32 = vpop.f32.mrf.mxu0 }
 0x3f5   : > { %v1320_v13 = vpop.xlane.xlu0 %1319  ;;  %v2584_v47 = vpop.permute.xlu2 %2583 }
 0x3f6   : > { %v1321_v12 = vcvt.f32.s32 %v1320_v13  ;;  %v2585_v6 = vunpack.i.l.bf16 %v2584_v47  ;;  %v2586_v36 = vunpack.i.h.bf16 %v2584_v47 }
 0x3f8   : > { %v1324_v3 = vadd.s32 %v1323_v8, %v1321_v12  ;;  %v1681_v9 = vmul.f32 %v2585_v6, %v1601_v15  ;;  %v3950_v8 = vld [vmem:[#allocation18_spill] sm:$0xff] }
 0x3f9   : > { %v1463_v52 = vpop.f32.mrf.mxu3  ;;  %v1604_v24 = vsub.f32 %v1588_v33, %v3950_v8  ;;  %v3957_v8 = vld [vmem:[#allocation23_spill] sm:$0xff] }
 0x3fa   : > { %v3710_v18 = vadd.f32 %v1512_v32, %v1463_v52  ;;  %vm1355_vm13 = vcmp.eq.s32.totalorder %v3245_v60, %v1324_v3  ;;  %vm1356_vm3 = vcmp.eq.s32.totalorder %v3248_v62, %v1324_v3  ;;  %v1586_v62 = vsel %vm1538_vm5, %v3705_v56, 0.0 }
 0x3fb   : > { %vm2255_vm15 = vmpackc.low %vm1355_vm13, %vm1353_vm12  ;;  %v1602_v37 = vsub.f32 %v1586_v62, %v3120_v23  ;;  %v1697_v4 = vmul.f32 %v1681_v9, %v1681_v9  ;;  %vm1541_vm12 = vcmp.lt.f32.partialorder %v3387_v55, inf  ;;  %vm1543_vm13 = vcmp.lt.f32.partialorder %v3426_v30, inf }
 0x3fc   : > { %2256 = vmatmul.msk.bf16.gmra.mxu3 %vm2255_vm15, %v2854_v48  ;;  %vm2271_vm6 = vmpackc.low %vm1356_vm3, %vm1354_vm0  ;;  %v3725_v60 = vsel %vm1542_vm4, %v3710_v18, 0.0  ;;  %v1515_v16 = vpop.f32.mrf.mxu0  ;;  %v1589_v14 = vsel %vm1541_vm12, %v3743_v19, 0.0 }
 0x3fd   : > { %2272 = vmatmul.msk.bf16.gmra.mxu1 %vm2271_vm6, %v2854_v48  ;;  %v2578_v57 = vpop.permute.xlu1 %2577  ;;  %v1682_v48 = vmul.f32 %v2586_v36, %v1602_v37  ;;  %v2600_v43 = vpop.permute.xlu2 %2599  ;;  %vm2305_vm0 = vmpackc.low %vm1536_vm10, %vm1535_vm9 }
 0x3fe   : > { %v2580_v42 = vunpack.i.h.bf16 %v2578_v57  ;;  %v2579_v0 = vunpack.i.l.bf16 %v2578_v57  ;;  %vm2308_vm10 = vmpackc.low %vm1538_vm5, %vm1537_vm11 }
 0x3ff   : > { %v1698_v59 = vmul.f32 %v1682_v48, %v1682_v48  ;;  %v3955_v48 = vld [vmem:[#allocation22_spill] sm:$0xff]  ;;  %vm2311_vm3 = vmpackc.low %vm1540_vm8, %vm1539_vm7 }
 0x400   : > { %v1680_v10 = vmul.f32 %v2580_v42, %v1600_v54  ;;  %v1679_v5 = vmul.f32 %v2579_v0, %v1599_v45  ;;  %v3951_v45 = vld [vmem:[#allocation29_spill] sm:$0xff]  ;;  %v3952_v54 = vld [vmem:[#allocation19_spill] sm:$0xff]  ;;  %v1606_v42 = vsub.f32 %v3725_v60, %v3953_v2  ;;  %vm2314_vm6 = vmpackc.low %vm1542_vm4, %vm1541_vm12 }
 0x401   : > { %v1466_v61 = vpop.f32.mrf.mxu3  ;;  %vm1544_vm15 = vcmp.lt.f32.partialorder %v3951_v45, inf  ;;  %v1605_v62 = vsub.f32 %v1589_v14, %v3952_v54  ;;  %v3954_v0 = vld [vmem:[#allocation21_spill] sm:$0xff]  ;;  %v2312_v54 = vpack.c.bf16 %v3739_v21, %v3736_v11  ;;  %v3959_v11 = vld [vmem:[#allocation24_spill] sm:$0xff] }
 0x402   : > { %v1696_v44 = vmul.f32 %v1680_v10, %v1680_v10  ;;  %v1695_v22 = vmul.f32 %v1679_v5, %v1679_v5  ;;  %v3752_v35 = vadd.f32 %v1515_v16, %v1466_v61  ;;  %v2601_v16 = vunpack.i.l.bf16 %v2600_v43  ;;  %vm2317_vm11 = vmpackc.low %vm1544_vm15, %vm1543_vm13 }
 0x403   : > { %v2602_v10 = vunpack.i.h.bf16 %v2600_v43 }
 0x404   : > { %v1711_v23 = vadd.f32 %v1696_v44, %v1695_v22  ;;  %v1517_v12 = vpop.f32.mrf.mxu0  ;;  %v1591_v34 = vsel %vm1543_vm13, %v3752_v35, 0.0  ;;  %v1520_v22 = vpop.f32.mrf.mxu1 }
 0x405   : > { %v2595_v28 = vpop.permute.xlu1 %2594  ;;  %v1607_v31 = vsub.f32 %v1591_v34, %v3954_v0  ;;  %v2309_v34 = vpack.c.bf16 %v3705_v56, %v3696_v26  ;;  %v3958_v26 = vld [vmem:[#allocation31_spill] sm:$0xff] }
 0x406   : > { %v1712_v20 = vadd.f32 %v1711_v23, %v1697_v4  ;;  %v2596_v3 = vunpack.i.l.bf16 %v2595_v28  ;;  %v2597_v57 = vunpack.i.h.bf16 %v2595_v28  ;;  %vm1546_vm5 = vcmp.lt.f32.partialorder %v3958_v26, inf }
 0x407   : > { %v1687_v4 = vmul.f32 %v2601_v16, %v1607_v31 }
 0x408   : > { %v2590_v32 = vpop.permute.xlu0 %2589  ;;  %v1713_v13 = vadd.f32 %v1712_v20, %v1698_v59  ;;  %v1685_v37 = vmul.f32 %v2596_v3, %v1605_v62  ;;  %v1686_v44 = vmul.f32 %v2597_v57, %v1606_v42  ;;  %v3956_v20 = vld [vmem:[#allocation30_spill] sm:$0xff]  ;;  %v2315_v62 = vpack.c.bf16 %v3710_v18, %v3743_v19 }
 0x409   : > { %v2592_v29 = vunpack.i.h.bf16 %v2590_v32  ;;  %v2591_v47 = vunpack.i.l.bf16 %v2590_v32  ;;  %v1468_v52 = vpop.f32.mrf.mxu3  ;;  %vm1545_vm9 = vcmp.lt.f32.partialorder %v3956_v20, inf }
 0x40a   : > { %v1518_v6 = vadd.f32 %v1517_v12, %v1468_v52  ;;  %v1701_v23 = vmul.f32 %v1685_v37, %v1685_v37  ;;  %v1702_v14 = vmul.f32 %v1686_v44, %v1686_v44  ;;  %vm2320_vm7 = vmpackc.low %vm1546_vm5, %vm1545_vm9 }
 0x40b   : > { %v1684_v15 = vmul.f32 %v2592_v29, %v1604_v24  ;;  %v1683_v36 = vmul.f32 %v2591_v47, %v1603_v40 }
 0x40c   : > { %v1592_v39 = vsel %vm1544_vm15, %v1518_v6, 0.0  ;;  %2307 = vmatmul.msk.bf16.vlgmr.msrb.gmra.mxu3 %vm2305_vm0, %v2306_v53  ;;  %v2318_v49 = vpack.c.bf16 %v1518_v6, %v3752_v35  ;;  %v1522_v58 = vpop.f32.mrf.mxu1  ;;  %v2610_v6 = vpop.permute.xlu2 %2609 }
 0x40d   : > { %v1699_v9 = vmul.f32 %v1683_v36, %v1683_v36  ;;  %v1700_v5 = vmul.f32 %v1684_v15, %v1684_v15  ;;  %v1608_v63 = vsub.f32 %v1592_v39, %v3955_v48  ;;  %v2605_v25 = vpop.permute.xlu1 %2604  ;;  %v3960_v15 = vld [vmem:[#allocation25_spill] sm:$0xff]  ;;  %v2611_v39 = vunpack.i.l.bf16 %v2610_v6  ;;  %v3961_v48 = vld [vmem:[#allocation26_spill] sm:$0xff] }
 0x40e   : > { %v2606_v40 = vunpack.i.l.bf16 %v2605_v25  ;;  %v2607_v18 = vunpack.i.h.bf16 %v2605_v25 }
 0x40f   : > { %v1714_v61 = vadd.f32 %v1713_v13, %v1699_v9  ;;  %v1688_v28 = vmul.f32 %v2602_v10, %v1608_v63  ;;  %v1703_v13 = vmul.f32 %v1687_v4, %v1687_v4 }
 0x411   : > { %v1715_v27 = vadd.f32 %v1714_v61, %v1700_v5  ;;  %v1471_v33 = vpop.f32.mrf.mxu3  ;;  %v1704_v3 = vmul.f32 %v1688_v28, %v1688_v28  ;;  %v2612_v61 = vunpack.i.h.bf16 %v2610_v6 }
 0x412   : > { %v1521_v59 = vadd.f32 %v1520_v22, %v1471_v33  ;;  %v3962_v33 = vld [vmem:[#allocation28_spill] sm:$0xff] }
 0x413   : > { %v1716_v60 = vadd.f32 %v1715_v27, %v1701_v23 }
 0x414   : > { %v1593_v32 = vsel %vm1545_vm9, %v1521_v59, 0.0 }
 0x415   : > { %v1609_v24 = vsub.f32 %v1593_v32, %v3957_v8  ;;  %v1717_v12 = vadd.f32 %v1716_v60, %v1702_v14  ;;  %v2615_v27 = vpop.permute.xlu1 %2614  ;;  %v3963_v8 = vld [vmem:[#allocation27_spill] sm:$0xff] }
 0x416   : > { %v2616_v20 = vunpack.i.l.bf16 %v2615_v27 }
 0x417   : > { %v1689_v29 = vmul.f32 %v2606_v40, %v1609_v24  ;;  %v1718_v47 = vadd.f32 %v1717_v12, %v1703_v13  ;;  %v2617_v13 = vunpack.i.h.bf16 %v2615_v27 }
 0x419   : > { %v1705_v52 = vmul.f32 %v1689_v29, %v1689_v29  ;;  %v1719_v53 = vadd.f32 %v1718_v47, %v1704_v3  ;;  %v1473_v17 = vpop.f32.mrf.mxu3 }
 0x41a   : > { %v1523_v1 = vadd.f32 %v1522_v58, %v1473_v17 }
 0x41b   : > { %v1720_v43 = vadd.f32 %v1719_v53, %v1705_v52 }
 0x41c   : > { %2310 = vmatmul.msk.bf16.gmra.mxu3 %vm2308_vm10, %v2309_v34  ;;  %v2321_v56 = vpack.c.bf16 %v1523_v1, %v1521_v59  ;;  %v1594_v7 = vsel %vm1546_vm5, %v1523_v1, 0.0 }
 0x41d   : > { %v1610_v21 = vsub.f32 %v1594_v7, %v3959_v11 }
 0x41f   : > { %v1690_v30 = vmul.f32 %v2607_v18, %v1610_v21 }
 0x421   : > { %v1706_v57 = vmul.f32 %v1690_v30, %v1690_v30 }
 0x423   : > { %v1721_v31 = vadd.f32 %v1720_v43, %v1706_v57 }
 0x42c   : > { %2313 = vmatmul.msk.bf16.gmra.mxu3 %vm2311_vm3, %v2312_v54 }
 0x43c   : > { %2316 = vmatmul.msk.bf16.gmra.mxu3 %vm2314_vm6, %v2315_v62 }
 0x44c   : > { %2319 = vmatmul.msk.bf16.gmra.mxu3 %vm2317_vm11, %v2318_v49 }
 0x45c   : > { %2322 = vmatmul.msk.bf16.gmra.mxu3 %vm2320_vm7, %v2321_v56 }
 0x46a   : > { %v1525_v55 = vpop.f32.mrf.mxu1 }
 0x46f   : > { %v1476_v19 = vpop.f32.mrf.mxu3 }
 0x470   : > { %v1526_v35 = vadd.f32 %v1525_v55, %v1476_v19 }
 0x472   : > { %v1595_v45 = vsel %vm1547_vm14, %v1526_v35, 0.0  ;;  %v1527_v2 = vpop.f32.mrf.mxu1  ;;  %vm1549_vm14 = vcmp.lt.f32.partialorder %v3526_v41, inf }
 0x473   : > { %v1611_v36 = vsub.f32 %v1595_v45, %v3960_v15 }
 0x475   : > { %v1691_v42 = vmul.f32 %v2611_v39, %v1611_v36 }
 0x477   : > { %v1707_v0 = vmul.f32 %v1691_v42, %v1691_v42  ;;  %v1478_v16 = vpop.f32.mrf.mxu3 }
 0x478   : > { %v1528_v37 = vadd.f32 %v1527_v2, %v1478_v16 }
 0x479   : > { %v1722_v9 = vadd.f32 %v1721_v31, %v1707_v0 }
 0x47a   : > { %v1596_v10 = vsel %vm1548_vm1, %v1528_v37, 0.0  ;;  %v2324_v5 = vpack.c.bf16 %v1528_v37, %v1526_v35  ;;  %v1530_v44 = vpop.f32.mrf.mxu1  ;;  %vm1550_vm1 = vcmp.lt.f32.partialorder %v3578_v46, inf  ;;  %v2619_v46 = vld [vmem:[%s3895_s6] ss:$0 sm:$0xff] }
 0x47b   : > { %v1612_v63 = vsub.f32 %v1596_v10, %v3961_v48 }
 0x47c   : > { %2325 = vmatmul.msk.bf16.gmra.mxu3 %vm3541_vm2, %v2324_v5  ;;  %vm2326_vm2 = vmpackc.low %vm1550_vm1, %vm1549_vm14 }
 0x47d   : > { %v1692_v38 = vmul.f32 %v2612_v61, %v1612_v63 }
 0x47f   : > { %v1708_v25 = vmul.f32 %v1692_v38, %v1692_v38  ;;  %v1481_v22 = vpop.f32.mrf.mxu3 }
 0x480   : > { %v1531_v4 = vadd.f32 %v1530_v44, %v1481_v22 }
 0x481   : > { %v1723_v23 = vadd.f32 %v1722_v9, %v1708_v25 }
 0x482   : > { %v1597_v51 = vsel %vm1549_vm14, %v1531_v4, 0.0  ;;  %v1532_v28 = vpop.f32.mrf.mxu1 }
 0x483   : > { %v1613_v59 = vsub.f32 %v1597_v51, %v3962_v33 }
 0x485   : > { %v1693_v60 = vmul.f32 %v2616_v20, %v1613_v59 }
 0x487   : > { %v1483_v40 = vpop.f32.mrf.mxu3  ;;  %v1709_v12 = vmul.f32 %v1693_v60, %v1693_v60 }
 0x488   : > { %v1533_v50 = vadd.f32 %v1532_v28, %v1483_v40 }
 0x489   : > { %v1724_v52 = vadd.f32 %v1723_v23, %v1709_v12 }
 0x48a   : > { %v1598_v14 = vsel %vm1550_vm1, %v1533_v50, 0.0  ;;  %v2327_v32 = vpack.c.bf16 %v1533_v50, %v1531_v4 }
 0x48b   : > { %v1614_v24 = vsub.f32 %v1598_v14, %v3963_v8 }
 0x48c   : > { %2328 = vmatmul.msk.bf16.gmra.mxu3 %vm2326_vm2, %v2327_v32 }
 0x48d   : > { %v1694_v3 = vmul.f32 %v2617_v13, %v1614_v24 }
 0x48f   : > { %v1823_v29 = vpop.f32.mrf.mxu3  ;;  %v1710_v47 = vmul.f32 %v1694_v3, %v1694_v3 }
 0x490   : > { %v1824_v43 = vadd.f32 %v2619_v46, %v1823_v29 }
 0x491   : > { %v1725_v53 = vadd.f32 %v1724_v52, %v1710_v47 }
 0x493   : > { %1726 = vadd.xlane.f32.xlu2 %v1725_v53 }
 0x497   : > { %v1825_v34 = vpop.f32.mrf.mxu3 }
 0x498   : > { %v1826_v54 = vadd.f32 %v2619_v46, %v1825_v34 }
 0x49a   : > { %v2381_v62 = vpack.c.bf16 %v1826_v54, %v1824_v43 }
 0x49c   : > { %2382 = vst [vmem:[%s3830_s10] sm:$0xff] %v2381_v62  }
 0x49f   : > { %v1828_v41 = vpop.f32.mrf.mxu3 }
 0x4a0   : > { %v1829_v17 = vadd.f32 %v2619_v46, %v1828_v41 }
 0x4a7   : > { %v1830_v49 = vpop.f32.mrf.mxu3 }
 0x4a8   : > { %v1831_v58 = vadd.f32 %v2619_v46, %v1830_v49 }
 0x4aa   : > { %v2386_v1 = vpack.c.bf16 %v1831_v58, %v1829_v17 }
 0x4ac   : > { %2418 = vst [vmem:[%s3830_s10 + $0x8] sm:$0xff] %v2386_v1  }
 0x4af   : > { %v1833_v26 = vpop.f32.mrf.mxu3 }
 0x4b0   : > { %v1834_v7 = vadd.f32 %v2619_v46, %v1833_v26 }
 0x4b7   : > { %v1835_v56 = vpop.f32.mrf.mxu3 }
 0x4b8   : > { %v1836_v55 = vadd.f32 %v2619_v46, %v1835_v56 }
 0x4ba   : > { %v2391_v18 = vpack.c.bf16 %v1836_v55, %v1834_v7 }
 0x4bc   : > { %2419 = vst [vmem:[%s3830_s10 + $0x10] sm:$0xff] %v2391_v18  }
 0x4bf   : > { %v1838_v11 = vpop.f32.mrf.mxu3 }
 0x4c0   : > { %v1839_v30 = vadd.f32 %v2619_v46, %v1838_v11 }
 0x4c7   : > { %v1840_v21 = vpop.f32.mrf.mxu3 }
 0x4c8   : > { %v1841_v19 = vadd.f32 %v2619_v46, %v1840_v21 }
 0x4ca   : > { %v2396_v35 = vpack.c.bf16 %v1841_v19, %v1839_v30 }
 0x4cc   : > { %2420 = vst [vmem:[%s3830_s10 + $0x18] sm:$0xff] %v2396_v35  }
 0x4cf   : > { %v1843_v6 = vpop.f32.mrf.mxu3 }
 0x4d0   : > { %v1844_v57 = vadd.f32 %v2619_v46, %v1843_v6 }
 0x4d7   : > { %v1845_v45 = vpop.f32.mrf.mxu3 }
 0x4d8   : > { %v1846_v15 = vadd.f32 %v2619_v46, %v1845_v45 }
 0x4da   : > { %v2401_v36 = vpack.c.bf16 %v1846_v15, %v1844_v57 }
 0x4dc   : > { %2421 = vst [vmem:[%s3830_s10 + $0x20] sm:$0xff] %v2401_v36  }
 0x4df   : > { %v1848_v39 = vpop.f32.mrf.mxu3 }
 0x4e0   : > { %v1849_v42 = vadd.f32 %v2619_v46, %v1848_v39 }
 0x4e7   : > { %v1850_v2 = vpop.f32.mrf.mxu3 }
 0x4e8   : > { %v1851_v0 = vadd.f32 %v2619_v46, %v1850_v2 }
 0x4ea   : > { %v2406_v31 = vpack.c.bf16 %v1851_v0, %v1849_v42 }
 0x4ec   : > { %2422 = vst [vmem:[%s3830_s10 + $0x28] sm:$0xff] %v2406_v31  }
 0x4ff   : > { %v1853_v16 = vpop.f32.mrf.mxu3 }
 0x500   : > { %v1854_v5 = vadd.f32 %v2619_v46, %v1853_v16 }
 0x506   : > { %v1727_v37 = vpop.xlane.xlu2 %1726 }
 0x507   : > { %v1728_v9 = vrot.slane %v1727_v37, 4  ;;  %v1855_v10 = vpop.f32.mrf.mxu3 }
 0x508   : > { %v1856_v61 = vadd.f32 %v2619_v46, %v1855_v10 }
 0x509   : > { %v1729_v48 = vadd.f32 %v1728_v9, %v1727_v37 }
 0x50a   : > { %v2411_v63 = vpack.c.bf16 %v1856_v61, %v1854_v5 }
 0x50b   : > { %v1730_v38 = vrot.slane %v1729_v48, 2 }
 0x50c   : > { %2423 = vst [vmem:[%s3830_s10 + $0x30] sm:$0xff] %v2411_v63  }
 0x50d   : > { %v1731_v44 = vadd.f32 %v1730_v38, %v1729_v48 }
 0x50f   : > { %v1858_v25 = vpop.f32.mrf.mxu3  ;;  %v1732_v22 = vrot.slane %v1731_v44, 1 }
 0x510   : > { %v1859_v27 = vadd.f32 %v2619_v46, %v1858_v25 }
 0x511   : > { %v1733_v4 = vadd.f32 %v1732_v22, %v1731_v44 }
 0x513   : > { %2441 = vpush %v1733_v4 }
 0x517   : > { %v1860_v23 = vpop.f32.mrf.mxu3 }
 0x518   : > { %v1861_v51 = vadd.f32 %v2619_v46, %v1860_v23 }
 0x51a   : > { %v2416_v33 = vpack.c.bf16 %v1861_v51, %v1859_v27 }
 0x51c   : > { %2424 = vst [vmem:[%s3830_s10 + $0x38] sm:$0xff] %v2416_v33  }
 0x51d   : > { %2767 = shalt.err (!%p2764_p10)
}
 0x51e   : > { %s2856_s10 = smov 64   ;;  %s2857_s14 = smov 4  }
 0x51f   : > { %2457 = dma.vmem_to_hbm [thread:$0]  (%p2993_p0), %s1914_s1, 1024, %s1916_s3, %s1896_s13, %s2856_s10, %s2856_s10, %s2857_s14  }
 0x520   : > { %s2080_s26 = sshll.u32 %s3023_s19, 3  ;;  %s2333_s20 = sshll.u32 %s2924_s9, 3 }
 0x521   : > { %s1928_s21 = scalar_lea.hbm %s3897_s8, %s2333_s20  ;;  %s386_s11 = scalar_lea.vmem [#allocation11], %s2080_s26 }
 0x522   : > { %s1930_s16 = sshll.u32 %s386_s11, 4  ;;  %s1932_s17 = sshll.u32 %s1928_s21, 4  ;;  %s1931_s16 = int_to_ptr.vmem [resolvable:$true] %s1930_s16  ;;  %s1933_s17 = int_to_ptr.hbm [resolvable:$true] %s1932_s17 }
 0x523   : > { %s1901_s0 = scalar_lea.sflag [#allocation12], %s3023_s19  ;;  %s2782_s2 = sshra.s32 %s1933_s17, 4  ;;  %s2783_s2 = int_to_ptr.hbm [resolvable:$true] %s2782_s2 }
 0x524   : > { %s2784_s4 = scalar_lea.hbm %s2783_s2, 8  ;;  %s2788_s3 = scalar_lea.hbm %s3897_s8, 32 }
 0x525   : > { %p2785_p11 = scmp.ne.s32.totalorder %s2783_s2, %s2784_s4  ;;  %p2789_p3 = scmp.lt.s32.totalorder %s2783_s2, %s3897_s8 }
 0x526   : > { %p2790_p5 = scmp.lt.s32.totalorder %s2788_s3, %s2784_s4 }
 0x527   : > { %p2786_p12 = pnand %p2785_p11, %p2993_p0 }
 0x528   : > { %p2791_p1 = por %p2790_p5, %p2789_p3 }
 0x529   : > { %p2787_p13 = pneg %p2786_p12 }
 0x52b   : > { %p2792_p4 = pnand %p2791_p1, %p2787_p13 }
 0x544   : > { %s2442_s15 = spop %2441 }
 0x545   : > { %v1735_v59 = vstv %s2442_s15 }
 0x546   : > { %1737 = vst [vmem:[%s386_s11] sm:$0xff] %v1735_v59 }
 0x547   : > { %2795 = shalt.err (!%p2792_p4)
}
 0x548   : > { %2458 = dma.vmem_to_hbm [thread:$0]  (%p2993_p0), %s1931_s16, 128, %s1933_s17, %s1901_s0  }
 0x549 PF: > { %p2489_p8 = scmp.ge.s32.totalorder %s2846_s30, 2  ;;  %s1944_s19 = sand.u32 1, %s2834_s27  }
 0x54a   : > { %s1945_s14 = scalar_lea.sflag [#allocation4], %s1944_s19 }
 0x54b   : > { %p2476_p7 = pnand %p2489_p8, %p2938_p6 }
 0x54d   : > { %p2477_p2 = pneg %p2476_p7 }
 0x54f   : > { %2825 = dma.done.wait (%p2477_p2), %s1945_s14, 1024  }
 0x550   : > { %2827 = vsyncadd (%p2477_p2), %s1945_s14, 4294966272  ;;  %s1955_s2 = scalar_lea.sflag [#allocation12], %s1944_s19 }
 0x551   : > { %2829 = dma.done.wait (%p2477_p2), %s1955_s2, 128  }
 0x552   : > { %2831 = vsyncadd (%p2477_p2), %s1955_s2, 4294967168  ;;  %p27_p0 = scmp.ge.s32.totalorder %s2975_s18, 6   ;;  %s3964_s27 = smov %s2838_s28 }
 0x553   : > { %s3965_s28 = smov %s2842_s29  ;;  %s3966_s29 = smov %s2989_s25 }
 0x554   : > { %s3967_s30 = smov %s2975_s18  ;;  %29 = sbr.rel (!%p27_p0) target bundleno = 15 (0xf), region = 122 }
 0x559   :  { %1961 = vsyncpa [#allocation3], 1 }
 0x55a   :  { %1963 = vsyncpa [#allocation3 + $0x1], 1 }
 0x55b   :  { %1964 = vsyncpa [#allocation6], 1 }
 0x55c   :  { %1965 = vsyncpa [#allocation9], 1 }
 0x55d   :  { %1966 = vsyncpa [#allocation4], 1 }
 0x55e   :  { %1968 = vsyncpa [#allocation4 + $0x1], 1 }
 0x55f   :  { %1969 = vsyncpa [#allocation12], 1 }
 0x560   :  { %1971 = vsyncpa [#allocation12 + $0x1], 1 }

// kernel: tpu_custom_call.1
= control target key start
LH: loop header
LB: loop body
LE: loop exit
PB: predicated region body
PF: predicated region fallthrough
CT: control target
= control target key end

     0   :  { %s3889_s0 = inlined_call_operand.hbm [shape: bf16[512,128], index: 0, kind: input, shape index: {}]   ;;  %s3890_s1 = inlined_call_operand.hbm [shape: bf16[128,128], index: 1, kind: input, shape index: {}]   ;;  %s3891_s2 = inlined_call_operand.vmem [shape: f32[1,128], index: 2, kind: input, shape index: {}]   ;;  %s3892_s3 = inlined_call_operand.hbm [shape: bf16[256,128], index: 3, kind: input, shape index: {}]   ;;  %s3893_s4 = inlined_call_operand.vmem [shape: f32[1,256], index: 4, kind: input, shape index: {}]   ;;  %s3894_s5 = inlined_call_operand.hbm [shape: bf16[128,128], index: 5, kind: input, shape index: {}]   ;;  %s3895_s6 = inlined_call_operand.vmem [shape: f32[1,128], index: 6, kind: input, shape index: {}]   ;;  %s3896_s7 = inlined_call_operand.hbm [shape: bf16[512,128], index: 7, kind: output, shape index: {0}]   ;;  %s3897_s8 = inlined_call_operand.hbm [shape: f32[4,8,128], index: 8, kind: output, shape index: {1}]  }
   0x1   :  { %3916 = sst [smem:[#allocation32_spill]] %s3889_s0 }
   0x2   :  { %3917 = sst [smem:[#allocation33_spill]] %s3890_s1 }
   0x3   :  { %3918 = sst [smem:[#allocation34_spill]] %s3891_s2 }
   0x4   :  { %3919 = sst [smem:[#allocation35_spill]] %s3892_s3 }
   0x5   :  { %3920 = sst [smem:[#allocation36_spill]] %s3893_s4 }
   0x6   :  { %14 = vsyncpa [#allocation3], 0 }
   0x7   :  { %16 = vsyncpa [#allocation3 + $0x1], 0 }
   0x8   :  { %17 = vsyncpa [#allocation6], 0 }
   0x9   :  { %18 = vsyncpa [#allocation9], 0 }
   0xa   :  { %19 = vsyncpa [#allocation4], 0 }
   0xb   :  { %21 = vsyncpa [#allocation4 + $0x1], 0 }
   0xc   :  { %22 = vsyncpa [#allocation12], 0 }
   0xd   :  { %24 = vsyncpa [#allocation12 + $0x1], 0  ;;  %s2903_s27 = smov 0   ;;  %s2905_s28 = smov 0  }
   0xe   :  { %s2907_s29 = smov 0   ;;  %s2909_s30 = smov 0  }
   0xf LB: > { %s2924_s9 = sadd.s32 4294967295, %s2846_s30   ;;  %s2065_s10 = sadd.s32 4294967294, %s2846_s30   ;;  %s2846_s30 = sphi %s2909_s30, %s3967_s30   ;;  %s2842_s29 = sphi %s2907_s29, %s3966_s29   ;;  %s2838_s28 = sphi %s2905_s28, %s3965_s28   ;;  %s2834_s27 = sphi %s2903_s27, %s3964_s27  }
  0x10   : > { %p50_p0 = scmp.ne.s32.totalorder %s2838_s28, %s2834_s27  ;;  %p51_p1 = scmp.eq.s32.totalorder %s2924_s9, 0 }
  0x11   : > { %p200_p2 = scmp.eq.s32.totalorder %s2924_s9, 3  ;;  %p206_p3 = scmp.eq.s32.totalorder %s2065_s10, 3 }
  0x12   : > { %p2933_p4 = por %p51_p1, %p50_p0  ;;  %p2066_p5 = scmp.ge.s32.totalorder %s2846_s30, 1 }
  0x13   : > { %p2938_p6 = por %p206_p3, %p50_p0  ;;  %p239_p7 = scmp.lt.s32.totalorder %s2846_s30, 5 }
  0x14   : > { %s3923_s1 = sld [smem:[#allocation33_spill]]  ;;  %s2848_s17 = smov [#allocation5]  }
  0x15   : > { %p2946_p8 = pnand %p2066_p5, %p239_p7  ;;  %s252_s18 = sshll.u32 %s2848_s17, 4  ;;  %s253_s18 = int_to_ptr.vmem [resolvable:$true] %s252_s18 }
  0x16   : > { %s3926_s3 = sld [smem:[#allocation35_spill]]  ;;  %s3898_s23 = smov 64  }
  0x17   : > { %p2461_p9 = pneg %p2946_p8  ;;  %s3899_s24 = smov 4  }
  0x18   : > { %s2851_s25 = smov [#allocation7]   ;;  %s284_s14 = sshll.u32 %s3894_s5, 4  ;;  %s285_s14 = int_to_ptr.hbm [resolvable:$true] %s284_s14 }
  0x19   : > { %p2954_p10 = pnand %p2461_p9, %p51_p1  ;;  %s269_s26 = sshll.u32 %s2851_s25, 4  ;;  %s270_s26 = int_to_ptr.vmem [resolvable:$true] %s269_s26 }
  0x1a   : > { %s250_s15 = sshll.u32 %s3923_s1, 4  ;;  %s37_s21 = sadd.s32 1, %s2842_s29  ;;  %s251_s15 = int_to_ptr.hbm [resolvable:$true] %s250_s15 }
  0x1b   : > { %2464 = dma.hbm_to_vmem [thread:$0]  (!%p2954_p10), %s251_s15, 1024, %s253_s18, [#allocation6], %s3898_s23, %s3898_s23, %s3899_s24  }
  0x1c   : > { %s267_s22 = sshll.u32 %s3926_s3, 4  ;;  %s2852_s15 = smov [#allocation8]   ;;  %s268_s22 = int_to_ptr.hbm [resolvable:$true] %s267_s22 }
  0x1d   : > { %2467 = dma.hbm_to_vmem [thread:$0]  (!%p2954_p10), %s268_s22, 2048, %s270_s26, [#allocation6], %s3898_s23, %s3898_s23, %s3899_s24  }
  0x1e   : > { %s286_s17 = sshll.u32 %s2852_s15, 4  ;;  %s2975_s18 = sadd.s32 1, %s2846_s30   ;;  %s287_s17 = int_to_ptr.vmem [resolvable:$true] %s286_s17 }
  0x1f   : > { %2470 = dma.hbm_to_vmem [thread:$0]  (!%p2954_p10), %s285_s14, 1024, %s287_s17, [#allocation9], %s3898_s23, %s3898_s23, %s3899_s24  }
  0x20   : > { %s34_s20 = ssub.s32 %s2846_s30, %s2975_s18  ;;  %p44_p12 = scmp.ne.s32.totalorder %s2842_s29, %s2838_s28 }
  0x21   : > { %p35_p11 = scmp.eq.s32.totalorder %s34_s20, 0  ;;  %p45_p13 = scmp.eq.s32.totalorder %s2846_s30, 0 }
  0x22   : > { %p2993_p0 = por %p200_p2, %p44_p12  ;;  %p2485_p3 = scmp.lt.s32.totalorder %s2846_s30, 4 }
  0x23   : > { %s2989_s25 = scalar_select %p35_p11, %s2842_s29, %s37_s21  }
  0x24   : > { %s303_s26 = sand.u32 1, %s2842_s29   ;;  %s2336_s19 = sshll.u32 %s2846_s30, 6 }
  0x25   : > { %p46_p5 = por %p45_p13, %p44_p12  ;;  %s2071_s10 = sshll.u32 %s303_s26, 6 }
  0x26   : > { %s3928_s0 = sld [smem:[#allocation32_spill]]  ;;  %s307_s20 = scalar_lea.vmem [#allocation2], %s2071_s10 }
  0x27   : > { %s315_s23 = sshll.u32 %s307_s20, 4  ;;  %p3003_p7 = pnand %p2485_p3, %p46_p5  ;;  %s316_s23 = int_to_ptr.vmem [resolvable:$true] %s315_s23 }
  0x28   : > { %s304_s24 = scalar_lea.sflag [#allocation3], %s303_s26 }
  0x29   : > { %p2714_p9 = pneg %p3003_p7 }
  0x2c   : > { %s312_s14 = scalar_lea.hbm %s3928_s0, %s2336_s19  ;;  %s2717_s10 = scalar_lea.hbm %s3928_s0, 256 }
  0x2d   : > { %s313_s17 = sshll.u32 %s312_s14, 4  ;;  %s314_s17 = int_to_ptr.hbm [resolvable:$true] %s313_s17 }
  0x2e   : > { %s2710_s1 = sshra.s32 %s314_s17, 4  ;;  %s2711_s1 = int_to_ptr.hbm [resolvable:$true] %s2710_s1 }
  0x2f   : > { %s2712_s3 = scalar_lea.hbm %s2711_s1, 64  ;;  %p2718_p12 = scmp.lt.s32.totalorder %s2711_s1, %s3928_s0 }
  0x30   : > { %p2713_p2 = scmp.ne.s32.totalorder %s2711_s1, %s2712_s3  ;;  %p2719_p13 = scmp.lt.s32.totalorder %s2717_s10, %s2712_s3 }
  0x32   : > { %p2715_p10 = pnand %p2714_p9, %p2713_p2  ;;  %p2720_p3 = por %p2719_p13, %p2718_p12 }
  0x34   : > { %p2716_p11 = pneg %p2715_p10 }
  0x36   : > { %p2721_p5 = pnand %p2720_p3, %p2716_p11 }
  0x38   : > { %2724 = shalt.err (!%p2721_p5)
}
  0x39   : > { %s3930_s26 = smov 4   ;;  %s3931_s20 = smov 64  }
  0x3a   : > { %2474 = dma.hbm_to_vmem [thread:$0]  (!%p3003_p7), %s314_s17, 1024, %s316_s23, %s304_s24, %s3931_s20, %s3931_s20, %s3930_s26  }
  0x3b   : > { %327 = sbr.rel (%p2946_p8) target bundleno = 1353 (0x549), region = 48 }
  0x40   : > { %s3023_s19 = sand.u32 1, %s2838_s28  }
  0x41   : > { %s2075_s1 = sshll.u32 %s3023_s19, 6  ;;  %s330_s3 = scalar_lea.sflag [#allocation3], %s3023_s19 }
  0x42   : > { %s3029_s13 = scalar_lea.vmem [#allocation2], %s2075_s1 }
  0x43   : > { %2813 = dma.done.wait (%p2933_p4), %s330_s3, 1024  }
  0x44   : > { %2815 = vsyncadd (%p2933_p4), %s330_s3, 4294966272 }
  0x45   : > { %2817 = dma.done.wait (%p51_p1), [#allocation6], 3072  }
  0x46   : > { %2819 = vsyncadd (%p51_p1), [#allocation6], 4294964224 }
  0x47   : > { %2821 = dma.done.wait (%p51_p1), [#allocation9], 1024  }
  0x48   : > { %2823 = vsyncadd (%p51_p1), [#allocation9], 4294966272  ;;  %v2352_v0 = vld [vmem:[#allocation5 + $0x38] sm:$0xff]  ;;  %v2351_v1 = vld [vmem:[#allocation5 + $0x30] sm:$0xff]  ;;  %v2853_v2 = vmov 127   ;;  %s3932_s2 = sld [smem:[#allocation34_spill]] }
  0x49   : > { %537 = vmatpush.bf16.msra.mxu0 %v2352_v0  ;;  %2532 = vset.pattern.permute.xlu0 %v2853_v2  ;;  %v389_v3 = vld [vmem:[%s3029_s13] sm:$0xff]   ;;  %v391_v6 = vld [vmem:[%s3029_s13 + $0x8] sm:$0xff]   ;;  %v2348_v13 = vld [vmem:[#allocation5 + $0x18] sm:$0xff]  ;;  %s3944_s4 = sld [smem:[#allocation36_spill]]  ;;  %s3830_s10 = scalar_lea.vmem [#allocation10], %s2075_s1 }
  0x4a   : > { %2543 = vset.pattern.permute.xlu1 %v2853_v2  ;;  %2554 = vset.pattern.permute.xlu2 %v2853_v2  ;;  %v405_v4 = vunpack.c.l.bf16 %v389_v3  ;;  %v406_v5 = vunpack.c.h.bf16 %v389_v3  ;;  %v2350_v7 = vld [vmem:[#allocation5 + $0x28] sm:$0xff]  ;;  %v407_v9 = vunpack.c.l.bf16 %v391_v6  ;;  %v408_v10 = vunpack.c.h.bf16 %v391_v6  ;;  %v2349_v11 = vld [vmem:[#allocation5 + $0x20] sm:$0xff]  ;;  %v401_v14 = vld [vmem:[%s3029_s13 + $0x30] sm:$0xff]   ;;  %s2377_s15 = sshll.u32 %s2924_s9, 6  ;;  %s1913_s1 = sshll.u32 %s3830_s10, 4  ;;  %s1914_s1 = int_to_ptr.vmem [resolvable:$true] %s1913_s1 }
  0x4b   : > { %v417_v15 = vunpack.c.l.bf16 %v401_v14  ;;  %v418_v16 = vunpack.c.h.bf16 %v401_v14  ;;  %v2347_v17 = vld [vmem:[#allocation5 + $0x10] sm:$0xff]  ;;  %v2346_v19 = vld [vmem:[#allocation5 + $0x8] sm:$0xff]  ;;  %v2345_v20 = vld [vmem:[#allocation5] sm:$0xff]  ;;  %s1912_s20 = scalar_lea.hbm %s3896_s7, %s2377_s15  ;;  %s2760_s17 = scalar_lea.hbm %s3896_s7, 256 }
  0x4c   : > { %v3045_v8 = vpack.i.bf16 %v406_v5, %v405_v4  ;;  %v3048_v12 = vpack.i.bf16 %v408_v10, %v407_v9  ;;  %v2337_v21 = vld [vmem:[%s3029_s13] sm:$0xff]  ;;  %v2338_v22 = vld [vmem:[%s3029_s13 + $0x8] sm:$0xff]  ;;  %v393_v23 = vld [vmem:[%s3029_s13 + $0x10] sm:$0xff]   ;;  %s1915_s3 = sshll.u32 %s1912_s20, 4  ;;  %s1916_s3 = int_to_ptr.hbm [resolvable:$true] %s1915_s3 }
  0x4d   : > { %538 = vmatpush.bf16.msra.mxu0 %v2351_v1  ;;  %v3052_v18 = vpack.i.bf16 %v418_v16, %v417_v15  ;;  %v409_v24 = vunpack.c.l.bf16 %v393_v23  ;;  %v410_v25 = vunpack.c.h.bf16 %v393_v23  ;;  %v2339_v27 = vld [vmem:[%s3029_s13 + $0x10] sm:$0xff]  ;;  %v395_v28 = vld [vmem:[%s3029_s13 + $0x18] sm:$0xff]   ;;  %v2358_v37 = vld [vmem:[#allocation7 + $0x28] sm:$0xff]  ;;  %s2754_s11 = sshra.s32 %s1916_s3, 4  ;;  %s2755_s11 = int_to_ptr.hbm [resolvable:$true] %s2754_s11 }
  0x4e   : > { %2534 = vperm.xlu0 %2532, %v3045_v8   ;;  %v411_v29 = vunpack.c.l.bf16 %v395_v28  ;;  %v412_v30 = vunpack.c.h.bf16 %v395_v28  ;;  %v3063_v31 = vld [vmem:[#allocation7 + $0x38] sm:$0xff]  ;;  %v3075_v35 = vld [vmem:[#allocation7 + $0x30] sm:$0xff]  ;;  %v2366_v38 = vld [vmem:[#allocation7 + $0x68] sm:$0xff]  ;;  %s2756_s16 = scalar_lea.hbm %s2755_s11, 64  ;;  %p2761_p7 = scmp.lt.s32.totalorder %s2755_s11, %s3896_s7 }
  0x4f   : > { %v3058_v26 = vpack.i.bf16 %v410_v25, %v409_v24  ;;  %v3065_v32 = vld [vmem:[#allocation7 + $0x78] sm:$0xff]  ;;  %818 = vmatpush.bf16.xpose.msra.mxu1 %v3063_v31  ;;  %2425 = vmatpush.bf16.msra.mxu3 %v3063_v31  ;;  %v3077_v36 = vld [vmem:[#allocation7 + $0x70] sm:$0xff]  ;;  %v2341_v39 = vld [vmem:[%s3029_s13 + $0x20] sm:$0xff]  ;;  %p2757_p1 = scmp.ne.s32.totalorder %s2755_s11, %s2756_s16  ;;  %p2762_p2 = scmp.lt.s32.totalorder %s2760_s17, %s2756_s16 }
  0x50   : > { %v3067_v33 = vpack.i.bf16 %v412_v30, %v411_v29  ;;  %867 = vmatpush.bf16.xpose.msra.mxu2 %v3065_v32  ;;  %v2340_v34 = vld [vmem:[%s3029_s13 + $0x18] sm:$0xff]  ;;  %v2357_v40 = vld [vmem:[#allocation7 + $0x20] sm:$0xff]  ;;  %v2342_v48 = vld [vmem:[%s3029_s13 + $0x28] sm:$0xff] }
  0x51   : > { %539 = vmatpush.bf16.msra.mxu0 %v2350_v7  ;;  %2545 = vperm.xlu1 %2543, %v3058_v26   ;;  %v2365_v41 = vld [vmem:[#allocation7 + $0x60] sm:$0xff]  ;;  %v2356_v46 = vld [vmem:[#allocation7 + $0x18] sm:$0xff]  ;;  %v2355_v49 = vld [vmem:[#allocation7 + $0x10] sm:$0xff]  ;;  %p2758_p4 = pnand %p2757_p1, %p2993_p0  ;;  %p2763_p9 = por %p2762_p2, %p2761_p7 }
  0x52   : > { %v397_v42 = vld [vmem:[%s3029_s13 + $0x20] sm:$0xff]   ;;  %v2364_v47 = vld [vmem:[#allocation7 + $0x58] sm:$0xff]  ;;  %v2363_v50 = vld [vmem:[#allocation7 + $0x50] sm:$0xff] }
  0x53   : > { %2426 = vmatpush.bf16.msra.mxu3 %v3075_v35  ;;  %v413_v43 = vunpack.c.l.bf16 %v397_v42  ;;  %v414_v44 = vunpack.c.h.bf16 %v397_v42  ;;  %v399_v51 = vld [vmem:[%s3029_s13 + $0x28] sm:$0xff]   ;;  %v403_v55 = vld [vmem:[%s3029_s13 + $0x38] sm:$0xff]   ;;  %v2343_v60 = vld [vmem:[%s3029_s13 + $0x30] sm:$0xff]  ;;  %p2759_p8 = pneg %p2758_p4 }
  0x54   : > { %v415_v52 = vunpack.c.l.bf16 %v399_v51  ;;  %v416_v53 = vunpack.c.h.bf16 %v399_v51  ;;  %v2354_v56 = vld [vmem:[#allocation7 + $0x8] sm:$0xff]  ;;  %v419_v58 = vunpack.c.l.bf16 %v403_v55  ;;  %v420_v59 = vunpack.c.h.bf16 %v403_v55  ;;  %v2353_v62 = vld [vmem:[#allocation7] sm:$0xff]  ;;  %v2344_v0 = vld [vmem:[%s3029_s13 + $0x38] sm:$0xff]  ;;  %s1896_s13 = scalar_lea.sflag [#allocation4], %s3023_s19 }
  0x55   : > { %540 = vmatpush.bf16.msra.mxu0 %v2349_v11  ;;  %v3085_v45 = vpack.i.bf16 %v414_v44, %v413_v43  ;;  %v2362_v57 = vld [vmem:[#allocation7 + $0x48] sm:$0xff]  ;;  %v2361_v63 = vld [vmem:[#allocation7 + $0x40] sm:$0xff]  ;;  %p2764_p10 = pnand %p2763_p9, %p2759_p8 }
  0x56   : > { %2539 = vperm.xlu0 %2532, %v3048_v12   ;;  %v3090_v54 = vpack.i.bf16 %v416_v53, %v415_v52  ;;  %v3095_v61 = vpack.i.bf16 %v420_v59, %v419_v58  ;;  %v3106_v2 = vld [vmem:[%s3932_s2] ss:$0 sm:$0xff] }
  0x57   : > { %819 = vmatpush.bf16.xpose.msra.mxu1 %v3075_v35  ;;  %2427 = vmatpush.bf16.msra.mxu3 %v2358_v37 }
  0x58   : > { %868 = vmatpush.bf16.xpose.msra.mxu2 %v3077_v36  ;;  %2556 = vperm.xlu2 %2554, %v3085_v45  }
  0x59   : > { %541 = vmatpush.bf16.msra.mxu0 %v2348_v13  ;;  %2550 = vperm.xlu1 %2543, %v3067_v33  }
  0x5b   : > { %2428 = vmatpush.bf16.msra.mxu3 %v2357_v40 }
  0x5d   : > { %542 = vmatpush.bf16.msra.mxu0 %v2347_v17 }
  0x5e   : > { %2566 = vperm.xlu0 %2532, %v3052_v18  }
  0x5f   : > { %820 = vmatpush.bf16.xpose.msra.mxu1 %v2358_v37  ;;  %2429 = vmatpush.bf16.msra.mxu3 %v2356_v46 }
  0x60   : > { %869 = vmatpush.bf16.xpose.msra.mxu2 %v2366_v38  ;;  %2561 = vperm.xlu2 %2554, %v3090_v54  }
  0x61   : > { %543 = vmatpush.bf16.msra.mxu0 %v2346_v19  ;;  %2571 = vperm.xlu1 %2543, %v3095_v61  }
  0x63   : > { %2430 = vmatpush.bf16.msra.mxu3 %v2355_v49 }
  0x65   : > { %544 = vmatpush.bf16.msra.mxu0 %v2345_v20 }
  0x67   : > { %821 = vmatpush.bf16.xpose.msra.mxu1 %v2357_v40  ;;  %2431 = vmatpush.bf16.msra.mxu3 %v2354_v56 }
  0x68   : > { %545 = vmatmul.bf16.vlgmr.msra.gmra.mxu0 %v2337_v21  ;;  %870 = vmatpush.bf16.xpose.msra.mxu2 %v2365_v41 }
  0x69   : > { %1486 = vmatpush.bf16.msrb.mxu0 %v3065_v32 }
  0x6b   : > { %2432 = vmatpush.bf16.msra.mxu3 %v2353_v62 }
  0x6d   : > { %1487 = vmatpush.bf16.msrb.mxu0 %v3077_v36 }
  0x6f   : > { %822 = vmatpush.bf16.xpose.msra.mxu1 %v2356_v46 }
  0x70   : > { %871 = vmatpush.bf16.xpose.msra.mxu2 %v2364_v47 }
  0x71   : > { %1488 = vmatpush.bf16.msrb.mxu0 %v2366_v38 }
  0x75   : > { %1489 = vmatpush.bf16.msrb.mxu0 %v2365_v41 }
  0x77   : > { %823 = vmatpush.bf16.xpose.msra.mxu1 %v2355_v49 }
  0x78   : > { %550 = vmatmul.bf16.gmra.mxu0 %v2338_v22  ;;  %872 = vmatpush.bf16.xpose.msra.mxu2 %v2363_v50 }
  0x79   : > { %1490 = vmatpush.bf16.msrb.mxu0 %v2364_v47 }
  0x7d   : > { %1491 = vmatpush.bf16.msrb.mxu0 %v2363_v50 }
  0x7f   : > { %824 = vmatpush.bf16.xpose.msra.mxu1 %v2354_v56 }
  0x80   : > { %873 = vmatpush.bf16.xpose.msra.mxu2 %v2362_v57 }
  0x81   : > { %1492 = vmatpush.bf16.msrb.mxu0 %v2362_v57 }
  0x85   : > { %1493 = vmatpush.bf16.msrb.mxu0 %v2361_v63 }
  0x87   : > { %825 = vmatpush.bf16.xpose.msra.mxu1 %v2353_v62 }
  0x88   : > { %555 = vmatmul.bf16.gmra.mxu0 %v2339_v27  ;;  %874 = vmatpush.bf16.xpose.msra.mxu2 %v2361_v63 }
  0x8f   : > { %2433 = vmatpush.bf16.msrb.mxu1 %v3065_v32 }
  0x90   : > { %1437 = vmatpush.bf16.msrb.mxu2 %v3063_v31 }
  0x93   : > { %2434 = vmatpush.bf16.msrb.mxu1 %v3077_v36 }
  0x94   : > { %1438 = vmatpush.bf16.msrb.mxu2 %v3075_v35 }
  0x97   : > { %2435 = vmatpush.bf16.msrb.mxu1 %v2366_v38 }
  0x98   : > { %560 = vmatmul.bf16.gmra.mxu0 %v2340_v34  ;;  %1439 = vmatpush.bf16.msrb.mxu2 %v2358_v37 }
  0x9b   : > { %2436 = vmatpush.bf16.msrb.mxu1 %v2365_v41 }
  0x9c   : > { %1440 = vmatpush.bf16.msrb.mxu2 %v2357_v40 }
  0x9f   : > { %2437 = vmatpush.bf16.msrb.mxu1 %v2364_v47 }
  0xa0   : > { %1441 = vmatpush.bf16.msrb.mxu2 %v2356_v46 }
  0xa3   : > { %2438 = vmatpush.bf16.msrb.mxu1 %v2363_v50 }
  0xa4   : > { %1442 = vmatpush.bf16.msrb.mxu2 %v2355_v49 }
  0xa7   : > { %2439 = vmatpush.bf16.msrb.mxu1 %v2362_v57 }
  0xa8   : > { %565 = vmatmul.bf16.gmra.mxu0 %v2341_v39  ;;  %1443 = vmatpush.bf16.msrb.mxu2 %v2354_v56 }
  0xab   : > { %2440 = vmatpush.bf16.msrb.mxu1 %v2361_v63 }
  0xac   : > { %1444 = vmatpush.bf16.msrb.mxu2 %v2353_v62 }
  0xb2   : > { %v2557_v49 = vpop.permute.xlu2 %2556 }
  0xb3   : > { %v2558_v51 = vunpack.i.l.bf16 %v2557_v49  ;;  %v2559_v52 = vunpack.i.h.bf16 %v2557_v49 }
  0xb8   : > { %570 = vmatmul.bf16.gmra.mxu0 %v2342_v48 }
  0xc0   : > { %v2535_v3 = vpop.permute.xlu0 %2534 }
  0xc1   : > { %v2537_v4 = vunpack.i.h.bf16 %v2535_v3  ;;  %v2536_v5 = vunpack.i.l.bf16 %v2535_v3 }
  0xc3   : > { %v2546_v27 = vpop.permute.xlu1 %2545 }
  0xc4   : > { %v2547_v29 = vunpack.i.l.bf16 %v2546_v27  ;;  %v2548_v30 = vunpack.i.h.bf16 %v2546_v27 }
  0xc8   : > { %575 = vmatmul.bf16.gmra.mxu0 %v2343_v60  ;;  %v2540_v16 = vpop.permute.xlu0 %2539  ;;  %v2562_v60 = vpop.permute.xlu2 %2561 }
  0xc9   : > { %v2542_v19 = vunpack.i.h.bf16 %v2540_v16  ;;  %v2541_v20 = vunpack.i.l.bf16 %v2540_v16  ;;  %v2563_v63 = vunpack.i.l.bf16 %v2562_v60 }
  0xcb   : > { %v2551_v38 = vpop.permute.xlu1 %2550 }
  0xcc   : > { %v2552_v40 = vunpack.i.l.bf16 %v2551_v38  ;;  %v2553_v41 = vunpack.i.h.bf16 %v2551_v38 }
  0xd8   : > { %580 = vmatmul.bf16.gmra.mxu0 %v2344_v0  ;;  %v2564_v0 = vunpack.i.h.bf16 %v2562_v60 }
  0xe5   : > { %v546_v1 = vpop.f32.mrf.mxu0 }
  0xe6   : > { %v547_v6 = vadd.f32 %v3106_v2, %v546_v1 }
  0xe8   : > { %v3110_v10 = vmul.f32 %v2536_v5, %v547_v6 }
  0xed   : > { %v548_v7 = vpop.f32.mrf.mxu0 }
  0xee   : > { %v549_v9 = vadd.f32 %v3106_v2, %v548_v7 }
  0xf0   : > { %v3112_v11 = vmul.f32 %v2537_v4, %v549_v9  ;;  %v2567_v9 = vpop.permute.xlu0 %2566 }
  0xf1   : > { %v2568_v16 = vunpack.i.l.bf16 %v2567_v9 }
  0xf2   : > { %v682_v13 = vpack.c.bf16 %v3112_v11, %v3110_v10 }
  0xf4   : > { %826 = vmatmul.bf16.vlgmr.msra.gmra.mxu1 %v682_v13  ;;  %875 = vmatmul.bf16.vlgmr.msra.gmra.mxu2 %v682_v13 }
  0xf5   : > { %v551_v14 = vpop.f32.mrf.mxu0 }
  0xf6   : > { %v552_v15 = vadd.f32 %v3106_v2, %v551_v14 }
  0xf8   : > { %v3118_v22 = vmul.f32 %v2541_v20, %v552_v15  ;;  %v2569_v15 = vunpack.i.h.bf16 %v2567_v9 }
  0xfd   : > { %v553_v17 = vpop.f32.mrf.mxu0 }
  0xfe   : > { %v554_v21 = vadd.f32 %v3106_v2, %v553_v17 }
 0x100   : > { %v3120_v23 = vmul.f32 %v2542_v19, %v554_v21 }
 0x102   : > { %v683_v24 = vpack.c.bf16 %v3120_v23, %v3118_v22 }
 0x104   : > { %831 = vmatmul.bf16.gmra.mxu1 %v683_v24  ;;  %880 = vmatmul.bf16.gmra.mxu2 %v683_v24 }
 0x105   : > { %v556_v25 = vpop.f32.mrf.mxu0 }
 0x106   : > { %v557_v28 = vadd.f32 %v3106_v2, %v556_v25  ;;  %v2572_v25 = vpop.permute.xlu1 %2571 }
 0x108   : > { %v3126_v34 = vmul.f32 %v2547_v29, %v557_v28  ;;  %v2573_v28 = vunpack.i.l.bf16 %v2572_v25 }
 0x10d   : > { %v558_v31 = vpop.f32.mrf.mxu0 }
 0x10e   : > { %v559_v32 = vadd.f32 %v3106_v2, %v558_v31 }
 0x110   : > { %v3128_v35 = vmul.f32 %v2548_v30, %v559_v32  ;;  %v2574_v30 = vunpack.i.h.bf16 %v2572_v25 }
 0x112   : > { %3933 = vst [vmem:[#allocation18_spill] sm:$0xff] %v3128_v35  ;;  %v684_v36 = vpack.c.bf16 %v3128_v35, %v3126_v34 }
 0x114   : > { %836 = vmatmul.bf16.gmra.mxu1 %v684_v36  ;;  %885 = vmatmul.bf16.gmra.mxu2 %v684_v36 }
 0x115   : > { %v561_v37 = vpop.f32.mrf.mxu0 }
 0x116   : > { %v562_v39 = vadd.f32 %v3106_v2, %v561_v37 }
 0x118   : > { %v3134_v44 = vmul.f32 %v2552_v40, %v562_v39  ;;  %v916_v39 = vld [vmem:[%s3944_s4] sm:$0x3] }
 0x119   : > { %v3175_v40 = vperm.slane %v916_v39, 0 }
 0x11a   : > { %3934 = vst [vmem:[#allocation19_spill] sm:$0xff] %v3134_v44 }
 0x11d   : > { %v563_v42 = vpop.f32.mrf.mxu0 }
 0x11e   : > { %v564_v43 = vadd.f32 %v3106_v2, %v563_v42 }
 0x120   : > { %v3136_v46 = vmul.f32 %v2553_v41, %v564_v43  ;;  %v3177_v41 = vperm.slane %v916_v39, 1 }
 0x122   : > { %3935 = vst [vmem:[#allocation20_spill] sm:$0xff] %v3136_v46  ;;  %v685_v47 = vpack.c.bf16 %v3136_v46, %v3134_v44 }
 0x124   : > { %841 = vmatmul.bf16.gmra.mxu1 %v685_v47  ;;  %890 = vmatmul.bf16.gmra.mxu2 %v685_v47 }
 0x125   : > { %v566_v48 = vpop.f32.mrf.mxu0 }
 0x126   : > { %v567_v50 = vadd.f32 %v3106_v2, %v566_v48 }
 0x128   : > { %v3142_v56 = vmul.f32 %v2558_v51, %v567_v50 }
 0x12a   : > { %3936 = vst [vmem:[#allocation21_spill] sm:$0xff] %v3142_v56 }
 0x12d   : > { %v568_v53 = vpop.f32.mrf.mxu0 }
 0x12e   : > { %v569_v55 = vadd.f32 %v3106_v2, %v568_v53 }
 0x130   : > { %v3144_v57 = vmul.f32 %v2559_v52, %v569_v55 }
 0x132   : > { %3937 = vst [vmem:[#allocation22_spill] sm:$0xff] %v3144_v57  ;;  %v686_v58 = vpack.c.bf16 %v3144_v57, %v3142_v56 }
 0x134   : > { %846 = vmatmul.bf16.gmra.mxu1 %v686_v58  ;;  %895 = vmatmul.bf16.gmra.mxu2 %v686_v58 }
 0x135   : > { %v571_v59 = vpop.f32.mrf.mxu0 }
 0x136   : > { %v572_v62 = vadd.f32 %v3106_v2, %v571_v59 }
 0x138   : > { %v3150_v4 = vmul.f32 %v2563_v63, %v572_v62 }
 0x13a   : > { %3938 = vst [vmem:[#allocation23_spill] sm:$0xff] %v3150_v4 }
 0x13d   : > { %v573_v1 = vpop.f32.mrf.mxu0 }
 0x13e   : > { %v574_v3 = vadd.f32 %v3106_v2, %v573_v1 }
 0x140   : > { %v3152_v5 = vmul.f32 %v2564_v0, %v574_v3 }
 0x142   : > { %3939 = vst [vmem:[#allocation24_spill] sm:$0xff] %v3152_v5  ;;  %v687_v6 = vpack.c.bf16 %v3152_v5, %v3150_v4 }
 0x144   : > { %851 = vmatmul.bf16.gmra.mxu1 %v687_v6  ;;  %900 = vmatmul.bf16.gmra.mxu2 %v687_v6 }
 0x145   : > { %v576_v7 = vpop.f32.mrf.mxu0 }
 0x146   : > { %v577_v13 = vadd.f32 %v3106_v2, %v576_v7 }
 0x148   : > { %v3158_v19 = vmul.f32 %v2568_v16, %v577_v13 }
 0x14a   : > { %3940 = vst [vmem:[#allocation25_spill] sm:$0xff] %v3158_v19 }
 0x14d   : > { %v578_v14 = vpop.f32.mrf.mxu0 }
 0x14e   : > { %v579_v17 = vadd.f32 %v3106_v2, %v578_v14 }
 0x150   : > { %v3160_v20 = vmul.f32 %v2569_v15, %v579_v17 }
 0x152   : > { %3941 = vst [vmem:[#allocation26_spill] sm:$0xff] %v3160_v20  ;;  %v688_v21 = vpack.c.bf16 %v3160_v20, %v3158_v19 }
 0x154   : > { %856 = vmatmul.bf16.gmra.mxu1 %v688_v21  ;;  %905 = vmatmul.bf16.gmra.mxu2 %v688_v21 }
 0x155   : > { %v581_v24 = vpop.f32.mrf.mxu0 }
 0x156   : > { %v582_v27 = vadd.f32 %v3106_v2, %v581_v24 }
 0x158   : > { %v3168_v36 = vmul.f32 %v2573_v28, %v582_v27 }
 0x15a   : > { %3943 = vst [vmem:[#allocation28_spill] sm:$0xff] %v3168_v36 }
 0x15d   : > { %v583_v29 = vpop.f32.mrf.mxu0 }
 0x15e   : > { %v584_v31 = vadd.f32 %v3106_v2, %v583_v29 }
 0x160   : > { %v3166_v32 = vmul.f32 %v2574_v30, %v584_v31 }
 0x162   : > { %3942 = vst [vmem:[#allocation27_spill] sm:$0xff] %v3166_v32  ;;  %v689_v37 = vpack.c.bf16 %v3166_v32, %v3168_v36 }
 0x164   : > { %861 = vmatmul.bf16.gmra.mxu1 %v689_v37  ;;  %910 = vmatmul.bf16.gmra.mxu2 %v689_v37 }
 0x171   : > { %v827_v38 = vpop.f32.mrf.mxu1 }
 0x172   : > { %v922_v2 = vsub.f32 %v3175_v40, %v827_v38 }
 0x177   : > { %v876_v42 = vpop.f32.mrf.mxu2 }
 0x178   : > { %v923_v43 = vsub.f32 %v3177_v41, %v876_v42 }
 0x179   : > { %v829_v47 = vpop.f32.mrf.mxu1 }
 0x17a   : > { %v954_v48 = vmin.f32 %v922_v2, %v923_v43  ;;  %v3182_v50 = vsub.f32 %v3175_v40, %v829_v47 }
 0x17c   : > { %955 = vmin.xlane.f32.xlu2 %v954_v48 }
 0x17f   : > { %v878_v49 = vpop.f32.mrf.mxu2 }
 0x180   : > { %v3185_v51 = vsub.f32 %v3177_v41, %v878_v49 }
 0x181   : > { %v832_v52 = vpop.f32.mrf.mxu1 }
 0x182   : > { %v957_v53 = vmin.f32 %v3182_v50, %v3185_v51  ;;  %v3190_v58 = vsub.f32 %v3175_v40, %v832_v52 }
 0x184   : > { %958 = vmin.xlane.f32.xlu0 %v957_v53 }
 0x187   : > { %v881_v55 = vpop.f32.mrf.mxu2 }
 0x188   : > { %v3193_v59 = vsub.f32 %v3177_v41, %v881_v55  ;;  %v1002_v55 = vlaneseq }
 0x189   : > { %v834_v60 = vpop.f32.mrf.mxu1 }
 0x18a   : > { %v960_v62 = vmin.f32 %v3190_v58, %v3193_v59  ;;  %v3198_v0 = vsub.f32 %v3175_v40, %v834_v60  ;;  %v3245_v60 = vand.u32 127, %v1002_v55 }
 0x18c   : > { %961 = vmin.xlane.f32.xlu1 %v960_v62  ;;  %v3248_v62 = vadd.s32 128, %v3245_v60 }
 0x18f   : > { %v883_v63 = vpop.f32.mrf.mxu2 }
 0x190   : > { %v3201_v1 = vsub.f32 %v3177_v41, %v883_v63 }
 0x191   : > { %v837_v3 = vpop.f32.mrf.mxu1 }
 0x192   : > { %v963_v6 = vmin.f32 %v3198_v0, %v3201_v1  ;;  %v3206_v7 = vsub.f32 %v3175_v40, %v837_v3 }
 0x194   : > { %964 = vmin.xlane.f32.xlu2 %v963_v6 }
 0x197   : > { %v886_v9 = vpop.f32.mrf.mxu2 }
 0x198   : > { %v3209_v13 = vsub.f32 %v3177_v41, %v886_v9 }
 0x199   : > { %v839_v14 = vpop.f32.mrf.mxu1 }
 0x19a   : > { %v966_v15 = vmin.f32 %v3206_v7, %v3209_v13  ;;  %v3214_v16 = vsub.f32 %v3175_v40, %v839_v14 }
 0x19c   : > { %967 = vmin.xlane.f32.xlu2 %v966_v15 }
 0x19f   : > { %v888_v17 = vpop.f32.mrf.mxu2 }
 0x1a0   : > { %v3217_v21 = vsub.f32 %v3177_v41, %v888_v17 }
 0x1a1   : > { %v842_v24 = vpop.f32.mrf.mxu1 }
 0x1a2   : > { %v969_v25 = vmin.f32 %v3214_v16, %v3217_v21  ;;  %v3222_v27 = vsub.f32 %v3175_v40, %v842_v24 }
 0x1a4   : > { %970 = vmin.xlane.f32.xlu0 %v969_v25 }
 0x1a7   : > { %v891_v28 = vpop.f32.mrf.mxu2 }
 0x1a8   : > { %v3225_v29 = vsub.f32 %v3177_v41, %v891_v28 }
 0x1a9   : > { %v844_v31 = vpop.f32.mrf.mxu1 }
 0x1aa   : > { %v972_v30 = vmin.f32 %v3222_v27, %v3225_v29  ;;  %v3230_v37 = vsub.f32 %v3175_v40, %v844_v31 }
 0x1ac   : > { %973 = vmin.xlane.f32.xlu1 %v972_v30 }
 0x1af   : > { %v893_v38 = vpop.f32.mrf.mxu2 }
 0x1b0   : > { %v3233_v39 = vsub.f32 %v3177_v41, %v893_v38 }
 0x1b1   : > { %v847_v47 = vpop.f32.mrf.mxu1 }
 0x1b2   : > { %v975_v42 = vmin.f32 %v3230_v37, %v3233_v39  ;;  %v3238_v48 = vsub.f32 %v3175_v40, %v847_v47 }
 0x1b4   : > { %976 = vmin.xlane.f32.xlu2 %v975_v42 }
 0x1b7   : > { %v896_v49 = vpop.f32.mrf.mxu2 }
 0x1b8   : > { %v3241_v52 = vsub.f32 %v3177_v41, %v896_v49 }
 0x1b9   : > { %v849_v14 = vpop.f32.mrf.mxu1 }
 0x1ba   : > { %v978_v53 = vmin.f32 %v3238_v48, %v3241_v52  ;;  %v3271_v28 = vsub.f32 %v3175_v40, %v849_v14 }
 0x1bc   : > { %979 = vmin.xlane.f32.xlu2 %v978_v53 }
 0x1bf   : > { %v898_v17 = vpop.f32.mrf.mxu2 }
 0x1c0   : > { %v3274_v30 = vsub.f32 %v3177_v41, %v898_v17 }
 0x1c1   : > { %v852_v38 = vpop.f32.mrf.mxu1 }
 0x1c7   : > { %v901_v47 = vpop.f32.mrf.mxu2 }
 0x1ef   : > { %v3250_v63 = vpop.xlane.xlu2 %955 }
 0x1f0   : > { %vm1005_vm0 = vcmp.eq.f32.partialorder %v922_v2, %v3250_v63  ;;  %vm1006_vm1 = vcmp.eq.f32.partialorder %v923_v43, %v3250_v63 }
 0x1f1   : > { %v1037_v3 = vsel %vm1005_vm0, %v3245_v60, 256  ;;  %v1038_v6 = vsel %vm1006_vm1, %v3248_v62, 256 }
 0x1f2   : > { %vm1069_vm2 = vcmp.lt.s32.totalorder %v1037_v3, %v1038_v6 }
 0x1f3   : > { %v3256_v9 = vsel %vm1069_vm2, %v1037_v3, %v1038_v6  ;;  %v3293_v3 = vsub.f32 %v3175_v40, %v852_v38  ;;  %v3296_v6 = vsub.f32 %v3177_v41, %v901_v47 }
 0x1f4   : > { %v1072_v15 = vshra.s32 %v3256_v9, 16 }
 0x1f6   : > { %v3259_v24 = vcvt.s32.f32 %v1072_v15 }
 0x1f7   : > { %v3261_v25 = vpop.xlane.xlu0 %958 }
 0x1f8   : > { %vm1007_vm3 = vcmp.eq.f32.partialorder %v3182_v50, %v3261_v25  ;;  %vm1008_vm4 = vcmp.eq.f32.partialorder %v3185_v51, %v3261_v25  ;;  %1075 = vmin.xlane.f32.xlu0 %v3259_v24  ;;  %v981_v51 = vmin.f32 %v3271_v28, %v3274_v30 }
 0x1f9   : > { %v1039_v2 = vsel %vm1007_vm3, %v3245_v60, 256  ;;  %v1040_v43 = vsel %vm1008_vm4, %v3248_v62, 256 }
 0x1fa   : > { %vm1085_vm5 = vcmp.lt.s32.totalorder %v1039_v2, %v1040_v43 }
 0x1fb   : > { %v3276_v31 = vsel %vm1085_vm5, %v1039_v2, %v1040_v43  ;;  %v854_v2 = vpop.f32.mrf.mxu1  ;;  %v903_v43 = vpop.f32.mrf.mxu2 }
 0x1fc   : > { %v1088_v50 = vshra.s32 %v3276_v31, 16  ;;  %v3318_v47 = vsub.f32 %v3177_v41, %v903_v43 }
 0x1fe   : > { %v3279_v42 = vcvt.s32.f32 %v1088_v50 }
 0x1ff   : > { %v3283_v49 = vpop.xlane.xlu1 %961 }
 0x200   : > { %vm1009_vm6 = vcmp.eq.f32.partialorder %v3190_v58, %v3283_v49  ;;  %vm1010_vm7 = vcmp.eq.f32.partialorder %v3193_v59, %v3283_v49  ;;  %1091 = vmin.xlane.f32.xlu1 %v3279_v42  ;;  %982 = vmin.xlane.f32.xlu0 %v981_v51  ;;  %v984_v59 = vmin.f32 %v3293_v3, %v3296_v6 }
 0x201   : > { %v1041_v53 = vsel %vm1009_vm6, %v3245_v60, 256  ;;  %v1042_v55 = vsel %vm1010_vm7, %v3248_v62, 256  ;;  %v3315_v51 = vsub.f32 %v3175_v40, %v854_v2 }
 0x202   : > { %vm1101_vm8 = vcmp.lt.s32.totalorder %v1041_v53, %v1042_v55 }
 0x203   : > { %v3298_v14 = vsel %vm1101_vm8, %v1041_v53, %v1042_v55  ;;  %v987_v55 = vmin.f32 %v3315_v51, %v3318_v47 }
 0x204   : > { %v1104_v58 = vshra.s32 %v3298_v14, 16  ;;  %v1103_v44 = vand.u32 65535, %v3298_v14 }
 0x206   : > { %v3301_v15 = vcvt.s32.f32 %v1104_v58 }
 0x207   : > { %v3305_v17 = vpop.xlane.xlu2 %964 }
 0x208   : > { %vm1011_vm9 = vcmp.eq.f32.partialorder %v3198_v0, %v3305_v17  ;;  %vm1012_vm10 = vcmp.eq.f32.partialorder %v3201_v1, %v3305_v17  ;;  %1107 = vmin.xlane.f32.xlu1 %v3301_v15  ;;  %985 = vmin.xlane.f32.xlu0 %v984_v59 }
 0x209   : > { %v1043_v50 = vsel %vm1011_vm9, %v3245_v60, 256  ;;  %v1044_v38 = vsel %vm1012_vm10, %v3248_v62, 256 }
 0x20a   : > { %vm1117_vm11 = vcmp.lt.s32.totalorder %v1043_v50, %v1044_v38 }
 0x20b   : > { %v3320_v0 = vsel %vm1117_vm11, %v1043_v50, %v1044_v38 }
 0x20c   : > { %v1120_v1 = vshra.s32 %v3320_v0, 16 }
 0x20e   : > { %v3323_v53 = vcvt.s32.f32 %v1120_v1 }
 0x20f   : > { %v3327_v58 = vpop.xlane.xlu2 %967 }
 0x210   : > { %vm1013_vm12 = vcmp.eq.f32.partialorder %v3206_v7, %v3327_v58  ;;  %vm1014_vm13 = vcmp.eq.f32.partialorder %v3209_v13, %v3327_v58  ;;  %1123 = vmin.xlane.f32.xlu2 %v3323_v53  ;;  %988 = vmin.xlane.f32.xlu1 %v987_v55  ;;  %v906_v55 = vpop.f32.mrf.mxu2 }
 0x211   : > { %v1045_v59 = vsel %vm1013_vm12, %v3245_v60, 256  ;;  %v1046_v2 = vsel %vm1014_vm13, %v3248_v62, 256 }
 0x212   : > { %vm1133_vm14 = vcmp.lt.s32.totalorder %v1045_v59, %v1046_v2 }
 0x213   : > { %v3336_v43 = vsel %vm1133_vm14, %v1045_v59, %v1046_v2 }
 0x214   : > { %v1136_v50 = vshra.s32 %v3336_v43, 16 }
 0x216   : > { %v3339_v38 = vcvt.s32.f32 %v1136_v50  ;;  %v857_v50 = vpop.f32.mrf.mxu1 }
 0x217   : > { %v3341_v1 = vpop.xlane.xlu0 %970 }
 0x218   : > { %vm1015_vm15 = vcmp.eq.f32.partialorder %v3214_v16, %v3341_v1  ;;  %vm1016_vm0 = vcmp.eq.f32.partialorder %v3217_v21, %v3341_v1  ;;  %1139 = vmin.xlane.f32.xlu2 %v3339_v38  ;;  %v3357_v16 = vsub.f32 %v3177_v41, %v906_v55  ;;  %v3360_v21 = vsub.f32 %v3175_v40, %v857_v50  ;;  %v908_v36 = vpop.f32.mrf.mxu2 }
 0x219   : > { %v1047_v7 = vsel %vm1015_vm15, %v3245_v60, 256  ;;  %v1048_v13 = vsel %vm1016_vm0, %v3248_v62, 256 }
 0x21a   : > { %vm1149_vm1 = vcmp.lt.s32.totalorder %v1047_v7, %v1048_v13  ;;  %v990_v20 = vmin.f32 %v3360_v21, %v3357_v16 }
 0x21b   : > { %v3350_v59 = vsel %vm1149_vm1, %v1047_v7, %v1048_v13 }
 0x21c   : > { %v1152_v2 = vshra.s32 %v3350_v59, 16 }
 0x21e   : > { %v3353_v32 = vcvt.s32.f32 %v1152_v2  ;;  %v859_v19 = vpop.f32.mrf.mxu1 }
 0x21f   : > { %v3404_v46 = vsub.f32 %v3175_v40, %v859_v19 }
 0x220   : > { %1155 = vmin.xlane.f32.xlu0 %v3353_v32  ;;  %v911_v4 = vpop.f32.mrf.mxu2 }
 0x226   : > { %v862_v57 = vpop.f32.mrf.mxu1 }
 0x227   : > { %v3364_v7 = vpop.xlane.xlu2 %976 }
 0x228   : > { %vm1019_vm2 = vcmp.eq.f32.partialorder %v3230_v37, %v3364_v7  ;;  %vm1020_vm3 = vcmp.eq.f32.partialorder %v3233_v39, %v3364_v7  ;;  %991 = vmin.xlane.f32.xlu0 %v990_v20  ;;  %v3379_v37 = vsub.f32 %v3177_v41, %v911_v4  ;;  %v3382_v20 = vsub.f32 %v3175_v40, %v862_v57  ;;  %v913_v14 = vpop.f32.mrf.mxu2 }
 0x229   : > { %v1051_v13 = vsel %vm1019_vm2, %v3245_v60, 256  ;;  %v1052_v55 = vsel %vm1020_vm3, %v3248_v62, 256 }
 0x22a   : > { %vm1181_vm4 = vcmp.lt.s32.totalorder %v1051_v13, %v1052_v55  ;;  %v996_v39 = vmin.f32 %v3382_v20, %v3379_v37 }
 0x22b   : > { %v3372_v2 = vsel %vm1181_vm4, %v1051_v13, %v1052_v55  ;;  %v1071_v13 = vand.u32 65535, %v3256_v9  ;;  %v3387_v55 = vpop.xlane.xlu1 %973  ;;  %v3400_v9 = vsub.f32 %v3177_v41, %v908_v36 }
 0x22c   : > { %v1184_v50 = vshra.s32 %v3372_v2, 16  ;;  %vm1017_vm5 = vcmp.eq.f32.partialorder %v3222_v27, %v3387_v55  ;;  %vm1018_vm6 = vcmp.eq.f32.partialorder %v3225_v29, %v3387_v55  ;;  %v1087_v27 = vand.u32 65535, %v3276_v31 }
 0x22d   : > { %v1073_v4 = vcvt.s32.f32 %v1071_v13  ;;  %v1049_v56 = vsel %vm1017_vm5, %v3245_v60, 256 }
 0x22e   : > { %v3375_v5 = vcvt.s32.f32 %v1184_v50 }
 0x230   : > { %1187 = vmin.xlane.f32.xlu0 %v3375_v5 }
 0x238   : > { %997 = vmin.xlane.f32.xlu0 %v996_v39  ;;  %v1050_v39 = vsel %vm1018_vm6, %v3248_v62, 256 }
 0x239   : > { %vm1165_vm8 = vcmp.lt.s32.totalorder %v1049_v56, %v1050_v39 }
 0x23a   : > { %v3418_v19 = vsel %vm1165_vm8, %v1049_v56, %v1050_v39 }
 0x26b   : > { %v3393_v50 = vpop.xlane.xlu0 %1075 }
 0x26c   : > { %vm1077_vm7 = vcmp.eq.f32.partialorder %v3259_v24, %v3393_v50  ;;  %v1089_v24 = vcvt.s32.f32 %v1087_v27 }
 0x26d   : > { %v1078_v57 = vsel %vm1077_vm7, %v1073_v4, inf  ;;  %v993_v4 = vmin.f32 %v3404_v46, %v3400_v9 }
 0x26e   : > { %1079 = vmin.xlane.f32.xlu1 %v1078_v57 }
 0x273   : > { %v3406_v29 = vpop.xlane.xlu1 %1091  ;;  %v3408_v13 = vpop.xlane.xlu0 %982 }
 0x274   : > { %3945 = vst [vmem:[#allocation29_spill] sm:$0xff] %v3408_v13  ;;  %vm1023_vm9 = vcmp.eq.f32.partialorder %v3271_v28, %v3408_v13  ;;  %vm1024_vm10 = vcmp.eq.f32.partialorder %v3274_v30, %v3408_v13  ;;  %vm1093_vm11 = vcmp.eq.f32.partialorder %v3279_v42, %v3406_v29  ;;  %v1168_v28 = vshra.s32 %v3418_v19, 16  ;;  %v3426_v30 = vpop.xlane.xlu2 %979 }
 0x275   : > { %v1055_v36 = vsel %vm1023_vm9, %v3245_v60, 256  ;;  %v1056_v31 = vsel %vm1024_vm10, %v3248_v62, 256  ;;  %v1094_v57 = vsel %vm1093_vm11, %v1089_v24, inf  ;;  %vm1021_vm13 = vcmp.eq.f32.partialorder %v3238_v48, %v3426_v30 }
 0x276   : > { %1095 = vmin.xlane.f32.xlu2 %v1094_v57  ;;  %994 = vmin.xlane.f32.xlu1 %v993_v4  ;;  %vm1213_vm12 = vcmp.lt.s32.totalorder %v1055_v36, %v1056_v31  ;;  %v3437_v4 = vcvt.s32.f32 %v1168_v28  ;;  %vm1022_vm14 = vcmp.eq.f32.partialorder %v3241_v52, %v3426_v30  ;;  %v864_v52 = vpop.f32.mrf.mxu1 }
 0x277   : > { %v3422_v27 = vsel %vm1213_vm12, %v1055_v36, %v1056_v31  ;;  %v1105_v36 = vcvt.s32.f32 %v1103_v44 }
 0x278   : > { %v1216_v42 = vshra.s32 %v3422_v27, 16 }
 0x27a   : > { %v3429_v56 = vcvt.s32.f32 %v1216_v42  ;;  %v3460_v42 = vsub.f32 %v3177_v41, %v913_v14 }
 0x27b   : > { %v3433_v39 = vpop.xlane.xlu1 %1107  ;;  %v3435_v24 = vpop.xlane.xlu0 %985 }
 0x27c   : > { %3946 = vst [vmem:[#allocation30_spill] sm:$0xff] %v3435_v24  ;;  %vm1025_vm15 = vcmp.eq.f32.partialorder %v3293_v3, %v3435_v24  ;;  %vm1026_vm0 = vcmp.eq.f32.partialorder %v3296_v6, %v3435_v24  ;;  %1219 = vmin.xlane.f32.xlu0 %v3429_v56  ;;  %vm1109_vm1 = vcmp.eq.f32.partialorder %v3301_v15, %v3433_v39  ;;  %v1053_v3 = vsel %vm1021_vm13, %v3245_v60, 256 }
 0x27d   : > { %v1057_v31 = vsel %vm1025_vm15, %v3245_v60, 256  ;;  %v1058_v57 = vsel %vm1026_vm0, %v3248_v62, 256  ;;  %v1110_v44 = vsel %vm1109_vm1, %v1105_v36, inf  ;;  %v1054_v6 = vsel %vm1022_vm14, %v3248_v62, 256 }
 0x27e   : > { %1171 = vmin.xlane.f32.xlu2 %v3437_v4  ;;  %1111 = vmin.xlane.f32.xlu1 %v1110_v44  ;;  %vm1229_vm2 = vcmp.lt.s32.totalorder %v1057_v31, %v1058_v57  ;;  %v1119_v15 = vand.u32 65535, %v3320_v0  ;;  %v3464_v44 = vsub.f32 %v3175_v40, %v864_v52  ;;  %vm1197_vm3 = vcmp.lt.s32.totalorder %v1053_v3, %v1054_v6 }
 0x27f   : > { %v3456_v28 = vsel %vm1229_vm2, %v1057_v31, %v1058_v57  ;;  %v3481_v0 = vsel %vm1197_vm3, %v1053_v3, %v1054_v6  ;;  %v1135_v31 = vand.u32 65535, %v3336_v43  ;;  %v1151_v6 = vand.u32 65535, %v3350_v59 }
 0x280   : > { %v1232_v36 = vshra.s32 %v3456_v28, 16  ;;  %v1121_v35 = vcvt.s32.f32 %v1119_v15  ;;  %v999_v40 = vmin.f32 %v3464_v44, %v3460_v42 }
 0x282   : > { %v3466_v24 = vcvt.s32.f32 %v1232_v36  ;;  %v1153_v36 = vcvt.s32.f32 %v1151_v6  ;;  %v1082_v6 = vcvt.f32.s32 %v3393_v50 }
 0x283   : > { %v3468_v13 = vpop.xlane.xlu2 %1123  ;;  %v3470_v48 = vpop.xlane.xlu1 %988 }
 0x284   : > { %3947 = vst [vmem:[#allocation31_spill] sm:$0xff] %v3470_v48  ;;  %vm1027_vm4 = vcmp.eq.f32.partialorder %v3315_v51, %v3470_v48  ;;  %vm1028_vm5 = vcmp.eq.f32.partialorder %v3318_v47, %v3470_v48  ;;  %1235 = vmin.xlane.f32.xlu0 %v3466_v24  ;;  %vm1125_vm6 = vcmp.eq.f32.partialorder %v3323_v53, %v3468_v13  ;;  %v1200_v47 = vshra.s32 %v3481_v0, 16 }
 0x285   : > { %v1126_v41 = vsel %vm1125_vm6, %v1121_v35, inf  ;;  %v1059_v14 = vsel %vm1027_vm4, %v3245_v60, 256  ;;  %v1060_v51 = vsel %vm1028_vm5, %v3248_v62, 256  ;;  %v1137_v53 = vcvt.s32.f32 %v1135_v31 }
 0x286   : > { %1127 = vmin.xlane.f32.xlu2 %v1126_v41  ;;  %1000 = vmin.xlane.f32.xlu1 %v999_v40  ;;  %vm1245_vm7 = vcmp.lt.s32.totalorder %v1059_v14, %v1060_v51  ;;  %v3489_v52 = vcvt.s32.f32 %v1200_v47 }
 0x287   : > { %v3493_v3 = vsel %vm1245_vm7, %v1059_v14, %v1060_v51  ;;  %v1183_v51 = vand.u32 65535, %v3372_v2 }
 0x288   : > { %v1248_v43 = vshra.s32 %v3493_v3, 16 }
 0x28a   : > { %v3502_v40 = vcvt.s32.f32 %v1248_v43  ;;  %v1098_v43 = vcvt.f32.s32 %v3406_v29 }
 0x28b   : > { %v3487_v57 = vpop.xlane.xlu2 %1139 }
 0x28c   : > { %vm1141_vm8 = vcmp.eq.f32.partialorder %v3339_v38, %v3487_v57 }
 0x28d   : > { %v1142_v35 = vsel %vm1141_vm8, %v1137_v53, inf }
 0x28e   : > { %1203 = vmin.xlane.f32.xlu2 %v3489_v52  ;;  %1143 = vmin.xlane.f32.xlu1 %v1142_v35  ;;  %v1185_v35 = vcvt.s32.f32 %v1183_v51 }
 0x293   : > { %v3498_v15 = vpop.xlane.xlu0 %1155 }
 0x294   : > { %vm1157_vm9 = vcmp.eq.f32.partialorder %v3353_v32, %v3498_v15 }
 0x295   : > { %v1158_v41 = vsel %vm1157_vm9, %v1153_v36, inf  ;;  %v1083_v36 = vshll.u32 %v1082_v6, 16 }
 0x296   : > { %1159 = vmin.xlane.f32.xlu2 %v1158_v41  ;;  %1251 = vmin.xlane.f32.xlu1 %v3502_v40 }
 0x29b   : > { %v3505_v38 = vpop.xlane.xlu0 %991 }
 0x29c   : > { %vm1029_vm10 = vcmp.eq.f32.partialorder %v3360_v21, %v3505_v38  ;;  %vm1030_vm11 = vcmp.eq.f32.partialorder %v3357_v16, %v3505_v38  ;;  %vm1547_vm14 = vcmp.lt.f32.partialorder %v3505_v38, inf }
 0x29d   : > { %v1061_v59 = vsel %vm1029_vm10, %v3245_v60, 256  ;;  %v1062_v14 = vsel %vm1030_vm11, %v3248_v62, 256 }
 0x29e   : > { %vm1261_vm12 = vcmp.lt.s32.totalorder %v1061_v59, %v1062_v14 }
 0x29f   : > { %v3513_v32 = vsel %vm1261_vm12, %v1061_v59, %v1062_v14  ;;  %v1099_v59 = vshll.u32 %v1098_v43, 16 }
 0x2a0   : > { %v1264_v31 = vshra.s32 %v3513_v32, 16 }
 0x2a2   : > { %v3517_v47 = vcvt.s32.f32 %v1264_v31 }
 0x2a3   : > { %v3519_v53 = vpop.xlane.xlu0 %1187 }
 0x2a4   : > { %1267 = vmin.xlane.f32.xlu1 %v3517_v47  ;;  %vm1189_vm13 = vcmp.eq.f32.partialorder %v3375_v5, %v3519_v53  ;;  %v1215_v5 = vand.u32 65535, %v3422_v27 }
 0x2a5   : > { %v1190_v16 = vsel %vm1189_vm13, %v1185_v35, inf }
 0x2a6   : > { %1191 = vmin.xlane.f32.xlu0 %v1190_v16  ;;  %v1167_v16 = vand.u32 65535, %v3418_v19  ;;  %v1217_v27 = vcvt.s32.f32 %v1215_v5 }
 0x2a8   : > { %v1169_v43 = vcvt.s32.f32 %v1167_v16 }
 0x2ab   : > { %v3526_v41 = vpop.xlane.xlu0 %997 }
 0x2ac   : > { %vm1033_vm11 = vcmp.eq.f32.partialorder %v3382_v20, %v3526_v41  ;;  %vm1034_vm12 = vcmp.eq.f32.partialorder %v3379_v37, %v3526_v41 }
 0x2ad   : > { %v1066_v20 = vsel %vm1034_vm12, %v3248_v62, 256 }
 0x2e1   : > { %v1080_v21 = vpop.xlane.xlu1 %1079 }
 0x2e2   : > { %v1081_v2 = vcvt.f32.s32 %v1080_v21 }
 0x2e4   : > { %v1084_v14 = vadd.s32 %v1083_v36, %v1081_v2  ;;  %v1231_v36 = vand.u32 65535, %v3456_v28 }
 0x2e6   : > { %vm1325_vm3 = vcmp.eq.s32.totalorder %v3245_v60, %v1084_v14  ;;  %vm1326_vm7 = vcmp.eq.s32.totalorder %v3248_v62, %v1084_v14  ;;  %v1130_v14 = vcvt.f32.s32 %v3468_v13 }
 0x2e8   : > { %v1131_v28 = vshll.u32 %v1130_v14, 16 }
 0x2e9   : > { %v1096_v31 = vpop.xlane.xlu2 %1095  ;;  %v3528_v51 = vpop.xlane.xlu1 %994 }
 0x2ea   : > { %v1097_v48 = vcvt.f32.s32 %v1096_v31  ;;  %vm1031_vm15 = vcmp.eq.f32.partialorder %v3404_v46, %v3528_v51  ;;  %vm1032_vm0 = vcmp.eq.f32.partialorder %v3400_v9, %v3528_v51  ;;  %vm1548_vm1 = vcmp.lt.f32.partialorder %v3528_v51, inf }
 0x2eb   : > { %vm3541_vm2 = vmpackc.low %vm1548_vm1, %vm1547_vm14  ;;  %v1063_v35 = vsel %vm1031_vm15, %v3245_v60, 256  ;;  %v1064_v46 = vsel %vm1032_vm0, %v3248_v62, 256  ;;  %v1065_v31 = vsel %vm1033_vm11, %v3245_v60, 256 }
 0x2ec   : > { %v1100_v29 = vadd.s32 %v1099_v59, %v1097_v48  ;;  %vm1277_vm8 = vcmp.lt.s32.totalorder %v1063_v35, %v1064_v46  ;;  %v2854_v48 = vmov 1.0|1.0   ;;  %v1114_v59 = vcvt.f32.s32 %v3433_v39 }
 0x2ed   : > { %v3566_v2 = vsel %vm1277_vm8, %v1063_v35, %v1064_v46  ;;  %vm1293_vm0 = vcmp.lt.s32.totalorder %v1065_v31, %v1066_v20 }
 0x2ee   : > { %vm1327_vm4 = vcmp.eq.s32.totalorder %v3245_v60, %v1100_v29  ;;  %vm1328_vm5 = vcmp.eq.s32.totalorder %v3248_v62, %v1100_v29  ;;  %v1280_v37 = vshra.s32 %v3566_v2, 16  ;;  %v1115_v35 = vshll.u32 %v1114_v59, 16 }
 0x2ef   : > { %v3551_v9 = vpop.xlane.xlu0 %1219  ;;  %vm2241_vm6 = vmpackc.low %vm1327_vm4, %vm1325_vm3 }
 0x2f0   : > { %2242 = vmatmul.msk.bf16.vlgmr.msrb.gmra.mxu2 %vm2241_vm6, %v2854_v48  ;;  %vm2257_vm9 = vmpackc.low %vm1328_vm5, %vm1326_vm7  ;;  %vm1221_vm10 = vcmp.eq.f32.partialorder %v3429_v56, %v3551_v9  ;;  %v3580_v16 = vcvt.s32.f32 %v1280_v37  ;;  %v1146_v37 = vcvt.f32.s32 %v3487_v57 }
 0x2f1   : > { %2258 = vmatmul.msk.bf16.vlgmr.msrb.gmra.mxu0 %vm2257_vm9, %v2854_v48  ;;  %v3558_v19 = vpop.xlane.xlu2 %1171  ;;  %v1112_v21 = vpop.xlane.xlu1 %1111  ;;  %v1222_v6 = vsel %vm1221_vm10, %v1217_v27, inf }
 0x2f2   : > { %1223 = vmin.xlane.f32.xlu1 %v1222_v6  ;;  %vm1173_vm13 = vcmp.eq.f32.partialorder %v3437_v4, %v3558_v19  ;;  %v1113_v5 = vcvt.f32.s32 %v1112_v21  ;;  %v1233_v4 = vcvt.s32.f32 %v1231_v36  ;;  %v3586_v21 = vsel %vm1293_vm0, %v1065_v31, %v1066_v20 }
 0x2f3   : > { %v1174_v56 = vsel %vm1173_vm13, %v1169_v43, inf  ;;  %v1199_v36 = vand.u32 65535, %v3481_v0 }
 0x2f4   : > { %1175 = vmin.xlane.f32.xlu2 %v1174_v56  ;;  %v1116_v27 = vadd.s32 %v1115_v35, %v1113_v5  ;;  %v1162_v5 = vcvt.f32.s32 %v3498_v15 }
 0x2f5   : > { %v1201_v59 = vcvt.s32.f32 %v1199_v36 }
 0x2f6   : > { %vm1329_vm5 = vcmp.eq.s32.totalorder %v3245_v60, %v1116_v27  ;;  %vm1330_vm9 = vcmp.eq.s32.totalorder %v3248_v62, %v1116_v27 }
 0x2f7   : > { %v3574_v29 = vpop.xlane.xlu0 %1235 }
 0x2f8   : > { %vm1237_vm15 = vcmp.eq.f32.partialorder %v3466_v24, %v3574_v29 }
 0x2f9   : > { %v1128_v39 = vpop.xlane.xlu2 %1127  ;;  %v3578_v46 = vpop.xlane.xlu1 %1000  ;;  %v1238_v13 = vsel %vm1237_vm15, %v1233_v4, inf  ;;  %v1247_v4 = vand.u32 65535, %v3493_v3  ;;  %v1263_v3 = vand.u32 65535, %v3513_v32  ;;  %v2855_v32 = vmov 126  }
 0x2fa   : > { %v1129_v6 = vcvt.f32.s32 %v1128_v39  ;;  %vm1035_vm3 = vcmp.eq.f32.partialorder %v3464_v44, %v3578_v46  ;;  %vm1036_vm4 = vcmp.eq.f32.partialorder %v3460_v42, %v3578_v46  ;;  %1239 = vmin.xlane.f32.xlu1 %v1238_v13  ;;  %v1296_v42 = vshra.s32 %v3586_v21, 16  ;;  %2587 = vset.pattern.permute.xlu0 %v2855_v32 }
 0x2fb   : > { %v1067_v43 = vsel %vm1035_vm3, %v3245_v60, 256  ;;  %v1068_v56 = vsel %vm1036_vm4, %v3248_v62, 256  ;;  %v1147_v39 = vshll.u32 %v1146_v37, 16  ;;  %v1163_v13 = vshll.u32 %v1162_v5, 16  ;;  %2575 = vset.pattern.permute.xlu1 %v2855_v32  ;;  %2581 = vset.pattern.permute.xlu2 %v2855_v32 }
 0x2fc   : > { %v1132_v24 = vadd.s32 %v1131_v28, %v1129_v6  ;;  %1283 = vmin.xlane.f32.xlu2 %v3580_v16  ;;  %vm1309_vm11 = vcmp.lt.s32.totalorder %v1067_v43, %v1068_v56  ;;  %v3603_v14 = vcvt.s32.f32 %v1296_v42  ;;  %v1249_v6 = vcvt.s32.f32 %v1247_v4 }
 0x2fd   : > { %v3605_v20 = vsel %vm1309_vm11, %v1067_v43, %v1068_v56  ;;  %v1265_v36 = vcvt.s32.f32 %v1263_v3 }
 0x2fe   : > { %vm1331_vm6 = vcmp.eq.s32.totalorder %v3245_v60, %v1132_v24  ;;  %vm1332_vm7 = vcmp.eq.s32.totalorder %v3248_v62, %v1132_v24  ;;  %v1312_v28 = vshra.s32 %v3605_v20, 16 }
 0x2ff   : > { %vm2243_vm8 = vmpackc.low %vm1331_vm6, %vm1329_vm5 }
 0x300   : > { %2244 = vmatmul.msk.bf16.gmra.mxu2 %vm2243_vm8, %v2854_v48  ;;  %vm2259_vm10 = vmpackc.low %vm1332_vm7, %vm1330_vm9  ;;  %v3614_v56 = vcvt.s32.f32 %v1312_v28 }
 0x301   : > { %2260 = vmatmul.msk.bf16.gmra.mxu0 %vm2259_vm10, %v2854_v48  ;;  %v3599_v44 = vpop.xlane.xlu2 %1203  ;;  %v1144_v0 = vpop.xlane.xlu1 %1143 }
 0x302   : > { %vm1205_vm12 = vcmp.eq.f32.partialorder %v3489_v52, %v3599_v44  ;;  %v1145_v35 = vcvt.f32.s32 %v1144_v0 }
 0x303   : > { %v1206_v31 = vsel %vm1205_vm12, %v1201_v59, inf  ;;  %v1194_v59 = vcvt.f32.s32 %v3519_v53 }
 0x304   : > { %1207 = vmin.xlane.f32.xlu0 %v1206_v31  ;;  %1299 = vmin.xlane.f32.xlu2 %v3603_v14  ;;  %v1148_v24 = vadd.s32 %v1147_v39, %v1145_v35  ;;  %v1178_v31 = vcvt.f32.s32 %v3558_v19 }
 0x305   : > { %v1195_v5 = vshll.u32 %v1194_v59, 16 }
 0x306   : > { %vm1333_vm15 = vcmp.eq.s32.totalorder %v3245_v60, %v1148_v24  ;;  %vm1334_vm5 = vcmp.eq.s32.totalorder %v3248_v62, %v1148_v24  ;;  %v1179_v35 = vshll.u32 %v1178_v31, 16  ;;  %v1295_v24 = vand.u32 65535, %v3586_v21 }
 0x309   : > { %v1160_v52 = vpop.xlane.xlu2 %1159  ;;  %v3612_v27 = vpop.xlane.xlu1 %1251 }
 0x30a   : > { %v1161_v43 = vcvt.f32.s32 %v1160_v52  ;;  %vm1253_vm13 = vcmp.eq.f32.partialorder %v3502_v40, %v3612_v27  ;;  %v1258_v21 = vcvt.f32.s32 %v3612_v27 }
 0x30b   : > { %v1254_v57 = vsel %vm1253_vm13, %v1249_v6, inf  ;;  %v1226_v6 = vcvt.f32.s32 %v3551_v9  ;;  %v1242_v9 = vcvt.f32.s32 %v3574_v29 }
 0x30c   : > { %v1164_v15 = vadd.s32 %v1163_v13, %v1161_v43  ;;  %1315 = vmin.xlane.f32.xlu0 %v3614_v56  ;;  %1255 = vmin.xlane.f32.xlu2 %v1254_v57  ;;  %v1210_v43 = vcvt.f32.s32 %v3599_v44  ;;  %v1311_v44 = vand.u32 65535, %v3605_v20 }
 0x30e   : > { %vm1335_vm0 = vcmp.eq.s32.totalorder %v3245_v60, %v1164_v15  ;;  %vm1336_vm3 = vcmp.eq.s32.totalorder %v3248_v62, %v1164_v15  ;;  %v1227_v15 = vshll.u32 %v1226_v6, 16  ;;  %v1313_v20 = vcvt.s32.f32 %v1311_v44 }
 0x30f   : > { %vm2245_vm4 = vmpackc.low %vm1335_vm0, %vm1333_vm15 }
 0x310   : > { %2246 = vmatmul.msk.bf16.gmra.mxu2 %vm2245_vm4, %v2854_v48  ;;  %vm2261_vm6 = vmpackc.low %vm1336_vm3, %vm1334_vm5 }
 0x311   : > { %2262 = vmatmul.msk.bf16.gmra.mxu0 %vm2261_vm6, %v2854_v48 }
 0x317   : > { %v3626_v40 = vpop.xlane.xlu1 %1267 }
 0x318   : > { %vm1269_vm7 = vcmp.eq.f32.partialorder %v3517_v47, %v3626_v40  ;;  %v1279_v47 = vand.u32 65535, %v3566_v2 }
 0x319   : > { %v1270_v42 = vsel %vm1269_vm7, %v1265_v36, inf  ;;  %v1192_v0 = vpop.xlane.xlu0 %1191 }
 0x31a   : > { %1271 = vmin.xlane.f32.xlu0 %v1270_v42  ;;  %v1193_v37 = vcvt.f32.s32 %v1192_v0  ;;  %v1281_v52 = vcvt.s32.f32 %v1279_v47  ;;  %v1297_v42 = vcvt.s32.f32 %v1295_v24  ;;  %v1211_v0 = vshll.u32 %v1210_v43, 16  ;;  %v2374_v24 = vld [vmem:[#allocation8 + $0x28] sm:$0xff] }
 0x31c   : > { %v1196_v28 = vadd.s32 %v1195_v5, %v1193_v37 }
 0x31e   : > { %vm1339_vm9 = vcmp.eq.s32.totalorder %v3245_v60, %v1196_v28  ;;  %vm1340_vm12 = vcmp.eq.s32.totalorder %v3248_v62, %v1196_v28 }
 0x365   : > { %v1224_v53 = vpop.xlane.xlu1 %1223 }
 0x366   : > { %v1225_v57 = vcvt.f32.s32 %v1224_v53 }
 0x367   : > { %v1176_v4 = vpop.xlane.xlu2 %1175 }
 0x368   : > { %v1177_v39 = vcvt.f32.s32 %v1176_v4  ;;  %v1228_v59 = vadd.s32 %v1227_v15, %v1225_v57  ;;  %v2371_v15 = vld [vmem:[#allocation8 + $0x10] sm:$0xff] }
 0x36a   : > { %v1180_v13 = vadd.s32 %v1179_v35, %v1177_v39  ;;  %vm1343_vm4 = vcmp.eq.s32.totalorder %v3245_v60, %v1228_v59  ;;  %vm1344_vm7 = vcmp.eq.s32.totalorder %v3248_v62, %v1228_v59  ;;  %v1259_v35 = vshll.u32 %v1258_v21, 16  ;;  %v2369_v21 = vld [vmem:[#allocation8] sm:$0xff] }
 0x36c   : > { %vm1337_vm8 = vcmp.eq.s32.totalorder %v3245_v60, %v1180_v13  ;;  %vm1338_vm10 = vcmp.eq.s32.totalorder %v3248_v62, %v1180_v13 }
 0x36d   : > { %vm2247_vm11 = vmpackc.low %vm1339_vm9, %vm1337_vm8 }
 0x36e   : > { %2248 = vmatmul.msk.bf16.vlgmr.msra.gmra.mxu3 %vm2247_vm11, %v2854_v48  ;;  %vm2263_vm13 = vmpackc.low %vm1340_vm12, %vm1338_vm10 }
 0x36f   : > { %2264 = vmatmul.msk.bf16.gmra.mxu0 %vm2263_vm13, %v2854_v48  ;;  %v3639_v19 = vpop.xlane.xlu2 %1283 }
 0x370   : > { %vm1285_vm15 = vcmp.eq.f32.partialorder %v3580_v16, %v3639_v19  ;;  %v1240_v16 = vpop.xlane.xlu1 %1239 }
 0x371   : > { %v1286_v2 = vsel %vm1285_vm15, %v1281_v52, inf  ;;  %v1241_v4 = vcvt.f32.s32 %v1240_v16 }
 0x372   : > { %1287 = vmin.xlane.f32.xlu1 %v1286_v2  ;;  %v2376_v2 = vld [vmem:[#allocation8 + $0x38] sm:$0xff] }
 0x373   : > { %v1446_v52 = vpop.f32.mrf.mxu2  ;;  %1814 = vmatpush.bf16.msrb.mxu3 %v2376_v2 }
 0x377   : > { %v3646_v3 = vpop.xlane.xlu2 %1299  ;;  %v1208_v36 = vpop.xlane.xlu0 %1207 }
 0x378   : > { %v1209_v31 = vcvt.f32.s32 %v1208_v36  ;;  %vm1301_vm0 = vcmp.eq.f32.partialorder %v3603_v14, %v3646_v3  ;;  %v1243_v14 = vshll.u32 %v1242_v9, 16  ;;  %v1290_v36 = vcvt.f32.s32 %v3639_v19 }
 0x379   : > { %v1302_v37 = vsel %vm1301_vm0, %v1297_v42, inf }
 0x37a   : > { %v1212_v5 = vadd.s32 %v1211_v0, %v1209_v31  ;;  %1303 = vmin.xlane.f32.xlu2 %v1302_v37  ;;  %v1244_v28 = vadd.s32 %v1243_v14, %v1241_v4  ;;  %v2370_v31 = vld [vmem:[#allocation8 + $0x8] sm:$0xff]  ;;  %v1291_v37 = vshll.u32 %v1290_v36, 16  ;;  %v1306_v4 = vcvt.f32.s32 %v3646_v3 }
 0x37b   : > { %v1448_v43 = vpop.f32.mrf.mxu2 }
 0x37c   : > { %vm1341_vm3 = vcmp.eq.s32.totalorder %v3245_v60, %v1212_v5  ;;  %vm1342_vm5 = vcmp.eq.s32.totalorder %v3248_v62, %v1212_v5  ;;  %vm1346_vm10 = vcmp.eq.s32.totalorder %v3248_v62, %v1244_v28  ;;  %vm1345_vm15 = vcmp.eq.s32.totalorder %v3245_v60, %v1244_v28 }
 0x37d   : > { %vm2249_vm6 = vmpackc.low %vm1343_vm4, %vm1341_vm3 }
 0x37e   : > { %2250 = vmatmul.msk.bf16.gmra.mxu3 %vm2249_vm6, %v2854_v48  ;;  %vm2265_vm8 = vmpackc.low %vm1344_vm7, %vm1342_vm5 }
 0x37f   : > { %2266 = vmatmul.msk.bf16.gmra.mxu0 %vm2265_vm8, %v2854_v48  ;;  %v3659_v29 = vpop.xlane.xlu0 %1315  ;;  %v1256_v27 = vpop.xlane.xlu2 %1255 }
 0x380   : > { %v1257_v39 = vcvt.f32.s32 %v1256_v27  ;;  %vm1317_vm9 = vcmp.eq.f32.partialorder %v3614_v56, %v3659_v29  ;;  %v1495_v56 = vpop.f32.mrf.mxu0  ;;  %v1322_v27 = vcvt.f32.s32 %v3659_v29 }
 0x381   : > { %v1318_v32 = vsel %vm1317_vm9, %v1313_v20, inf  ;;  %vm1535_vm9 = vcmp.lt.f32.partialorder %v3250_v63, inf }
 0x382   : > { %v1260_v13 = vadd.s32 %v1259_v35, %v1257_v39  ;;  %1319 = vmin.xlane.f32.xlu0 %v1318_v32  ;;  %v1307_v35 = vshll.u32 %v1306_v4, 16  ;;  %v3692_v39 = vadd.f32 %v1495_v56, %v1446_v52 }
 0x383   : > { %v1451_v57 = vpop.f32.mrf.mxu2 }
 0x384   : > { %vm1348_vm11 = vcmp.eq.s32.totalorder %v3248_v62, %v1260_v13  ;;  %vm1347_vm12 = vcmp.eq.s32.totalorder %v3245_v60, %v1260_v13  ;;  %v1583_v29 = vsel %vm1535_vm9, %v3692_v39, 0.0 }
 0x385   : > { %vm2267_vm13 = vmpackc.low %vm1348_vm11, %vm1346_vm10  ;;  %vm1536_vm10 = vcmp.lt.f32.partialorder %v3261_v25, inf  ;;  %vm1537_vm11 = vcmp.lt.f32.partialorder %v3283_v49, inf }
 0x386   : > { %2268 = vmatmul.msk.bf16.vlgmr.msrb.gmra.mxu1 %vm2267_vm13, %v2854_v48  ;;  %vm2251_vm0 = vmpackc.low %vm1347_vm12, %vm1345_vm15 }
 0x388   : > { %v1497_v47 = vpop.f32.mrf.mxu0 }
 0x389   : > { %v3694_v2 = vadd.f32 %v1497_v47, %v1448_v43 }
 0x38b   : > { %2577 = vperm.xlu1 %2575, %v3045_v8   ;;  %v2375_v8 = vld [vmem:[#allocation8 + $0x30] sm:$0xff]  ;;  %v1453_v44 = vpop.f32.mrf.mxu2 }
 0x38c   : > { %1815 = vmatpush.bf16.msrb.mxu3 %v2375_v8  ;;  %v1323_v8 = vshll.u32 %v1322_v27, 16 }
 0x38e   : > { %2252 = vmatmul.msk.bf16.gmra.mxu3 %vm2251_vm0, %v2854_v48 }
 0x390   : > { %v1500_v53 = vpop.f32.mrf.mxu0  ;;  %1816 = vmatpush.bf16.msrb.mxu3 %v2374_v24 }
 0x392   : > { %2583 = vperm.xlu2 %2581, %v3048_v12   ;;  %v2373_v12 = vld [vmem:[#allocation8 + $0x20] sm:$0xff] }
 0x393   : > { %2594 = vperm.xlu1 %2575, %v3067_v33   ;;  %v1456_v28 = vpop.f32.mrf.mxu2 }
 0x394   : > { %1817 = vmatpush.bf16.msrb.mxu3 %v2373_v12 }
 0x396   : > { %2589 = vperm.xlu0 %2587, %v3058_v26   ;;  %v2372_v26 = vld [vmem:[#allocation8 + $0x18] sm:$0xff] }
 0x398   : > { %v1502_v6 = vpop.f32.mrf.mxu0  ;;  %1818 = vmatpush.bf16.msrb.mxu3 %v2372_v26  ;;  %v3696_v26 = vadd.f32 %v1500_v53, %v1451_v57  ;;  %v1584_v53 = vsel %vm1536_vm10, %v3694_v2, 0.0 }
 0x399   : > { %v3705_v56 = vadd.f32 %v1502_v6, %v1453_v44 }
 0x39a   : > { %2599 = vperm.xlu2 %2581, %v3085_v45   ;;  %v1272_v45 = vpop.xlane.xlu0 %1271  ;;  %v1585_v43 = vsel %vm1537_vm11, %v3696_v26, 0.0 }
 0x39b   : > { %2604 = vperm.xlu1 %2575, %v3090_v54   ;;  %v1274_v54 = vcvt.f32.s32 %v3626_v40  ;;  %v1273_v42 = vcvt.f32.s32 %v1272_v45  ;;  %v1599_v45 = vsub.f32 %v1583_v29, %v3110_v10 }
 0x39c   : > { %1819 = vmatpush.bf16.msrb.mxu3 %v2371_v15  ;;  %v1601_v15 = vsub.f32 %v1585_v43, %v3118_v22 }
 0x39d   : > { %v1275_v0 = vshll.u32 %v1274_v54, 16  ;;  %v1600_v54 = vsub.f32 %v1584_v53, %v3112_v11  ;;  %v2306_v53 = vpack.c.bf16 %v3694_v2, %v3692_v39  ;;  %v3953_v2 = vld [vmem:[#allocation20_spill] sm:$0xff] }
 0x39f   : > { %v1276_v9 = vadd.s32 %v1275_v0, %v1273_v42 }
 0x3a0   : > { %v3675_v33 = vpop.f32.mrf.mxu0  ;;  %1820 = vmatpush.bf16.msrb.mxu3 %v2370_v31  ;;  %v1458_v31 = vpop.f32.mrf.mxu2 }
 0x3a1   : > { %vm1349_vm3 = vcmp.eq.s32.totalorder %v3245_v60, %v1276_v9  ;;  %vm1350_vm7 = vcmp.eq.s32.totalorder %v3248_v62, %v1276_v9  ;;  %v3736_v11 = vadd.f32 %v3675_v33, %v1456_v28 }
 0x3a2   : > { %2609 = vperm.xlu2 %2581, %v3052_v18  }
 0x3a3   : > { %2614 = vperm.xlu1 %2575, %v3095_v61  }
 0x3a4   : > { %1821 = vmatpush.bf16.msrb.mxu3 %v2369_v21 }
 0x3a8   : > { %v3680_v59 = vpop.f32.mrf.mxu0 }
 0x3a9   : > { %v3739_v21 = vadd.f32 %v3680_v59, %v1458_v31 }
 0x3e5   : > { %v1288_v16 = vpop.xlane.xlu1 %1287 }
 0x3e6   : > { %v1289_v5 = vcvt.f32.s32 %v1288_v16 }
 0x3e8   : > { %v1292_v61 = vadd.s32 %v1291_v37, %v1289_v5 }
 0x3ea   : > { %vm1351_vm4 = vcmp.eq.s32.totalorder %v3245_v60, %v1292_v61  ;;  %vm1352_vm5 = vcmp.eq.s32.totalorder %v3248_v62, %v1292_v61 }
 0x3eb   : > { %vm2253_vm6 = vmpackc.low %vm1351_vm4, %vm1349_vm3  ;;  %vm1542_vm4 = vcmp.lt.f32.partialorder %v3364_v7, inf }
 0x3ec   : > { %v3686_v40 = vpop.f32.mrf.mxu0  ;;  %2254 = vmatmul.msk.bf16.gmra.mxu3 %vm2253_vm6, %v2854_v48  ;;  %vm2269_vm8 = vmpackc.low %vm1352_vm5, %vm1350_vm7  ;;  %vm1538_vm5 = vcmp.lt.f32.partialorder %v3305_v17, inf  ;;  %vm1539_vm7 = vcmp.lt.f32.partialorder %v3327_v58, inf }
 0x3ed   : > { %2270 = vmatmul.msk.bf16.gmra.mxu1 %vm2269_vm8, %v2854_v48  ;;  %v1304_v19 = vpop.xlane.xlu2 %1303  ;;  %v1587_v27 = vsel %vm1539_vm7, %v3736_v11, 0.0  ;;  %vm1540_vm8 = vcmp.lt.f32.partialorder %v3341_v1, inf }
 0x3ee   : > { %v1305_v20 = vcvt.f32.s32 %v1304_v19  ;;  %v1588_v33 = vsel %vm1540_vm8, %v3739_v21, 0.0 }
 0x3f0   : > { %v1308_v24 = vadd.s32 %v1307_v35, %v1305_v20 }
 0x3f1   : > { %v1461_v14 = vpop.f32.mrf.mxu3 }
 0x3f2   : > { %vm1353_vm12 = vcmp.eq.s32.totalorder %v3245_v60, %v1308_v24  ;;  %vm1354_vm0 = vcmp.eq.s32.totalorder %v3248_v62, %v1308_v24  ;;  %v3743_v19 = vadd.f32 %v3686_v40, %v1461_v14  ;;  %v1603_v40 = vsub.f32 %v1587_v27, %v3126_v34 }
 0x3f4   : > { %v1512_v32 = vpop.f32.mrf.mxu0 }
 0x3f5   : > { %v1320_v13 = vpop.xlane.xlu0 %1319  ;;  %v2584_v47 = vpop.permute.xlu2 %2583 }
 0x3f6   : > { %v1321_v12 = vcvt.f32.s32 %v1320_v13  ;;  %v2585_v6 = vunpack.i.l.bf16 %v2584_v47  ;;  %v2586_v36 = vunpack.i.h.bf16 %v2584_v47 }
 0x3f8   : > { %v1324_v3 = vadd.s32 %v1323_v8, %v1321_v12  ;;  %v1681_v9 = vmul.f32 %v2585_v6, %v1601_v15  ;;  %v3950_v8 = vld [vmem:[#allocation18_spill] sm:$0xff] }
 0x3f9   : > { %v1463_v52 = vpop.f32.mrf.mxu3  ;;  %v1604_v24 = vsub.f32 %v1588_v33, %v3950_v8  ;;  %v3957_v8 = vld [vmem:[#allocation23_spill] sm:$0xff] }
 0x3fa   : > { %v3710_v18 = vadd.f32 %v1512_v32, %v1463_v52  ;;  %vm1355_vm13 = vcmp.eq.s32.totalorder %v3245_v60, %v1324_v3  ;;  %vm1356_vm3 = vcmp.eq.s32.totalorder %v3248_v62, %v1324_v3  ;;  %v1586_v62 = vsel %vm1538_vm5, %v3705_v56, 0.0 }
 0x3fb   : > { %vm2255_vm15 = vmpackc.low %vm1355_vm13, %vm1353_vm12  ;;  %v1602_v37 = vsub.f32 %v1586_v62, %v3120_v23  ;;  %v1697_v4 = vmul.f32 %v1681_v9, %v1681_v9  ;;  %vm1541_vm12 = vcmp.lt.f32.partialorder %v3387_v55, inf  ;;  %vm1543_vm13 = vcmp.lt.f32.partialorder %v3426_v30, inf }
 0x3fc   : > { %2256 = vmatmul.msk.bf16.gmra.mxu3 %vm2255_vm15, %v2854_v48  ;;  %vm2271_vm6 = vmpackc.low %vm1356_vm3, %vm1354_vm0  ;;  %v3725_v60 = vsel %vm1542_vm4, %v3710_v18, 0.0  ;;  %v1515_v16 = vpop.f32.mrf.mxu0  ;;  %v1589_v14 = vsel %vm1541_vm12, %v3743_v19, 0.0 }
 0x3fd   : > { %2272 = vmatmul.msk.bf16.gmra.mxu1 %vm2271_vm6, %v2854_v48  ;;  %v2578_v57 = vpop.permute.xlu1 %2577  ;;  %v1682_v48 = vmul.f32 %v2586_v36, %v1602_v37  ;;  %v2600_v43 = vpop.permute.xlu2 %2599  ;;  %vm2305_vm0 = vmpackc.low %vm1536_vm10, %vm1535_vm9 }
 0x3fe   : > { %v2580_v42 = vunpack.i.h.bf16 %v2578_v57  ;;  %v2579_v0 = vunpack.i.l.bf16 %v2578_v57  ;;  %vm2308_vm10 = vmpackc.low %vm1538_vm5, %vm1537_vm11 }
 0x3ff   : > { %v1698_v59 = vmul.f32 %v1682_v48, %v1682_v48  ;;  %v3955_v48 = vld [vmem:[#allocation22_spill] sm:$0xff]  ;;  %vm2311_vm3 = vmpackc.low %vm1540_vm8, %vm1539_vm7 }
 0x400   : > { %v1680_v10 = vmul.f32 %v2580_v42, %v1600_v54  ;;  %v1679_v5 = vmul.f32 %v2579_v0, %v1599_v45  ;;  %v3951_v45 = vld [vmem:[#allocation29_spill] sm:$0xff]  ;;  %v3952_v54 = vld [vmem:[#allocation19_spill] sm:$0xff]  ;;  %v1606_v42 = vsub.f32 %v3725_v60, %v3953_v2  ;;  %vm2314_vm6 = vmpackc.low %vm1542_vm4, %vm1541_vm12 }
 0x401   : > { %v1466_v61 = vpop.f32.mrf.mxu3  ;;  %vm1544_vm15 = vcmp.lt.f32.partialorder %v3951_v45, inf  ;;  %v1605_v62 = vsub.f32 %v1589_v14, %v3952_v54  ;;  %v3954_v0 = vld [vmem:[#allocation21_spill] sm:$0xff]  ;;  %v2312_v54 = vpack.c.bf16 %v3739_v21, %v3736_v11  ;;  %v3959_v11 = vld [vmem:[#allocation24_spill] sm:$0xff] }
 0x402   : > { %v1696_v44 = vmul.f32 %v1680_v10, %v1680_v10  ;;  %v1695_v22 = vmul.f32 %v1679_v5, %v1679_v5  ;;  %v3752_v35 = vadd.f32 %v1515_v16, %v1466_v61  ;;  %v2601_v16 = vunpack.i.l.bf16 %v2600_v43  ;;  %vm2317_vm11 = vmpackc.low %vm1544_vm15, %vm1543_vm13 }
 0x403   : > { %v2602_v10 = vunpack.i.h.bf16 %v2600_v43 }
 0x404   : > { %v1711_v23 = vadd.f32 %v1696_v44, %v1695_v22  ;;  %v1517_v12 = vpop.f32.mrf.mxu0  ;;  %v1591_v34 = vsel %vm1543_vm13, %v3752_v35, 0.0  ;;  %v1520_v22 = vpop.f32.mrf.mxu1 }
 0x405   : > { %v2595_v28 = vpop.permute.xlu1 %2594  ;;  %v1607_v31 = vsub.f32 %v1591_v34, %v3954_v0  ;;  %v2309_v34 = vpack.c.bf16 %v3705_v56, %v3696_v26  ;;  %v3958_v26 = vld [vmem:[#allocation31_spill] sm:$0xff] }
 0x406   : > { %v1712_v20 = vadd.f32 %v1711_v23, %v1697_v4  ;;  %v2596_v3 = vunpack.i.l.bf16 %v2595_v28  ;;  %v2597_v57 = vunpack.i.h.bf16 %v2595_v28  ;;  %vm1546_vm5 = vcmp.lt.f32.partialorder %v3958_v26, inf }
 0x407   : > { %v1687_v4 = vmul.f32 %v2601_v16, %v1607_v31 }
 0x408   : > { %v2590_v32 = vpop.permute.xlu0 %2589  ;;  %v1713_v13 = vadd.f32 %v1712_v20, %v1698_v59  ;;  %v1685_v37 = vmul.f32 %v2596_v3, %v1605_v62  ;;  %v1686_v44 = vmul.f32 %v2597_v57, %v1606_v42  ;;  %v3956_v20 = vld [vmem:[#allocation30_spill] sm:$0xff]  ;;  %v2315_v62 = vpack.c.bf16 %v3710_v18, %v3743_v19 }
 0x409   : > { %v2592_v29 = vunpack.i.h.bf16 %v2590_v32  ;;  %v2591_v47 = vunpack.i.l.bf16 %v2590_v32  ;;  %v1468_v52 = vpop.f32.mrf.mxu3  ;;  %vm1545_vm9 = vcmp.lt.f32.partialorder %v3956_v20, inf }
 0x40a   : > { %v1518_v6 = vadd.f32 %v1517_v12, %v1468_v52  ;;  %v1701_v23 = vmul.f32 %v1685_v37, %v1685_v37  ;;  %v1702_v14 = vmul.f32 %v1686_v44, %v1686_v44  ;;  %vm2320_vm7 = vmpackc.low %vm1546_vm5, %vm1545_vm9 }
 0x40b   : > { %v1684_v15 = vmul.f32 %v2592_v29, %v1604_v24  ;;  %v1683_v36 = vmul.f32 %v2591_v47, %v1603_v40 }
 0x40c   : > { %v1592_v39 = vsel %vm1544_vm15, %v1518_v6, 0.0  ;;  %2307 = vmatmul.msk.bf16.vlgmr.msrb.gmra.mxu3 %vm2305_vm0, %v2306_v53  ;;  %v2318_v49 = vpack.c.bf16 %v1518_v6, %v3752_v35  ;;  %v1522_v58 = vpop.f32.mrf.mxu1  ;;  %v2610_v6 = vpop.permute.xlu2 %2609 }
 0x40d   : > { %v1699_v9 = vmul.f32 %v1683_v36, %v1683_v36  ;;  %v1700_v5 = vmul.f32 %v1684_v15, %v1684_v15  ;;  %v1608_v63 = vsub.f32 %v1592_v39, %v3955_v48  ;;  %v2605_v25 = vpop.permute.xlu1 %2604  ;;  %v3960_v15 = vld [vmem:[#allocation25_spill] sm:$0xff]  ;;  %v2611_v39 = vunpack.i.l.bf16 %v2610_v6  ;;  %v3961_v48 = vld [vmem:[#allocation26_spill] sm:$0xff] }
 0x40e   : > { %v2606_v40 = vunpack.i.l.bf16 %v2605_v25  ;;  %v2607_v18 = vunpack.i.h.bf16 %v2605_v25 }
 0x40f   : > { %v1714_v61 = vadd.f32 %v1713_v13, %v1699_v9  ;;  %v1688_v28 = vmul.f32 %v2602_v10, %v1608_v63  ;;  %v1703_v13 = vmul.f32 %v1687_v4, %v1687_v4 }
 0x411   : > { %v1715_v27 = vadd.f32 %v1714_v61, %v1700_v5  ;;  %v1471_v33 = vpop.f32.mrf.mxu3  ;;  %v1704_v3 = vmul.f32 %v1688_v28, %v1688_v28  ;;  %v2612_v61 = vunpack.i.h.bf16 %v2610_v6 }
 0x412   : > { %v1521_v59 = vadd.f32 %v1520_v22, %v1471_v33  ;;  %v3962_v33 = vld [vmem:[#allocation28_spill] sm:$0xff] }
 0x413   : > { %v1716_v60 = vadd.f32 %v1715_v27, %v1701_v23 }
 0x414   : > { %v1593_v32 = vsel %vm1545_vm9, %v1521_v59, 0.0 }
 0x415   : > { %v1609_v24 = vsub.f32 %v1593_v32, %v3957_v8  ;;  %v1717_v12 = vadd.f32 %v1716_v60, %v1702_v14  ;;  %v2615_v27 = vpop.permute.xlu1 %2614  ;;  %v3963_v8 = vld [vmem:[#allocation27_spill] sm:$0xff] }
 0x416   : > { %v2616_v20 = vunpack.i.l.bf16 %v2615_v27 }
 0x417   : > { %v1689_v29 = vmul.f32 %v2606_v40, %v1609_v24  ;;  %v1718_v47 = vadd.f32 %v1717_v12, %v1703_v13  ;;  %v2617_v13 = vunpack.i.h.bf16 %v2615_v27 }
 0x419   : > { %v1705_v52 = vmul.f32 %v1689_v29, %v1689_v29  ;;  %v1719_v53 = vadd.f32 %v1718_v47, %v1704_v3  ;;  %v1473_v17 = vpop.f32.mrf.mxu3 }
 0x41a   : > { %v1523_v1 = vadd.f32 %v1522_v58, %v1473_v17 }
 0x41b   : > { %v1720_v43 = vadd.f32 %v1719_v53, %v1705_v52 }
 0x41c   : > { %2310 = vmatmul.msk.bf16.gmra.mxu3 %vm2308_vm10, %v2309_v34  ;;  %v2321_v56 = vpack.c.bf16 %v1523_v1, %v1521_v59  ;;  %v1594_v7 = vsel %vm1546_vm5, %v1523_v1, 0.0 }
 0x41d   : > { %v1610_v21 = vsub.f32 %v1594_v7, %v3959_v11 }
 0x41f   : > { %v1690_v30 = vmul.f32 %v2607_v18, %v1610_v21 }
 0x421   : > { %v1706_v57 = vmul.f32 %v1690_v30, %v1690_v30 }
 0x423   : > { %v1721_v31 = vadd.f32 %v1720_v43, %v1706_v57 }
 0x42c   : > { %2313 = vmatmul.msk.bf16.gmra.mxu3 %vm2311_vm3, %v2312_v54 }
 0x43c   : > { %2316 = vmatmul.msk.bf16.gmra.mxu3 %vm2314_vm6, %v2315_v62 }
 0x44c   : > { %2319 = vmatmul.msk.bf16.gmra.mxu3 %vm2317_vm11, %v2318_v49 }
 0x45c   : > { %2322 = vmatmul.msk.bf16.gmra.mxu3 %vm2320_vm7, %v2321_v56 }
 0x46a   : > { %v1525_v55 = vpop.f32.mrf.mxu1 }
 0x46f   : > { %v1476_v19 = vpop.f32.mrf.mxu3 }
 0x470   : > { %v1526_v35 = vadd.f32 %v1525_v55, %v1476_v19 }
 0x472   : > { %v1595_v45 = vsel %vm1547_vm14, %v1526_v35, 0.0  ;;  %v1527_v2 = vpop.f32.mrf.mxu1  ;;  %vm1549_vm14 = vcmp.lt.f32.partialorder %v3526_v41, inf }
 0x473   : > { %v1611_v36 = vsub.f32 %v1595_v45, %v3960_v15 }
 0x475   : > { %v1691_v42 = vmul.f32 %v2611_v39, %v1611_v36 }
 0x477   : > { %v1707_v0 = vmul.f32 %v1691_v42, %v1691_v42  ;;  %v1478_v16 = vpop.f32.mrf.mxu3 }
 0x478   : > { %v1528_v37 = vadd.f32 %v1527_v2, %v1478_v16 }
 0x479   : > { %v1722_v9 = vadd.f32 %v1721_v31, %v1707_v0 }
 0x47a   : > { %v1596_v10 = vsel %vm1548_vm1, %v1528_v37, 0.0  ;;  %v2324_v5 = vpack.c.bf16 %v1528_v37, %v1526_v35  ;;  %v1530_v44 = vpop.f32.mrf.mxu1  ;;  %vm1550_vm1 = vcmp.lt.f32.partialorder %v3578_v46, inf  ;;  %v2619_v46 = vld [vmem:[%s3895_s6] ss:$0 sm:$0xff] }
 0x47b   : > { %v1612_v63 = vsub.f32 %v1596_v10, %v3961_v48 }
 0x47c   : > { %2325 = vmatmul.msk.bf16.gmra.mxu3 %vm3541_vm2, %v2324_v5  ;;  %vm2326_vm2 = vmpackc.low %vm1550_vm1, %vm1549_vm14 }
 0x47d   : > { %v1692_v38 = vmul.f32 %v2612_v61, %v1612_v63 }
 0x47f   : > { %v1708_v25 = vmul.f32 %v1692_v38, %v1692_v38  ;;  %v1481_v22 = vpop.f32.mrf.mxu3 }
 0x480   : > { %v1531_v4 = vadd.f32 %v1530_v44, %v1481_v22 }
 0x481   : > { %v1723_v23 = vadd.f32 %v1722_v9, %v1708_v25 }
 0x482   : > { %v1597_v51 = vsel %vm1549_vm14, %v1531_v4, 0.0  ;;  %v1532_v28 = vpop.f32.mrf.mxu1 }
 0x483   : > { %v1613_v59 = vsub.f32 %v1597_v51, %v3962_v33 }
 0x485   : > { %v1693_v60 = vmul.f32 %v2616_v20, %v1613_v59 }
 0x487   : > { %v1483_v40 = vpop.f32.mrf.mxu3  ;;  %v1709_v12 = vmul.f32 %v1693_v60, %v1693_v60 }
 0x488   : > { %v1533_v50 = vadd.f32 %v1532_v28, %v1483_v40 }
 0x489   : > { %v1724_v52 = vadd.f32 %v1723_v23, %v1709_v12 }
 0x48a   : > { %v1598_v14 = vsel %vm1550_vm1, %v1533_v50, 0.0  ;;  %v2327_v32 = vpack.c.bf16 %v1533_v50, %v1531_v4 }
 0x48b   : > { %v1614_v24 = vsub.f32 %v1598_v14, %v3963_v8 }
 0x48c   : > { %2328 = vmatmul.msk.bf16.gmra.mxu3 %vm2326_vm2, %v2327_v32 }
 0x48d   : > { %v1694_v3 = vmul.f32 %v2617_v13, %v1614_v24 }
 0x48f   : > { %v1823_v29 = vpop.f32.mrf.mxu3  ;;  %v1710_v47 = vmul.f32 %v1694_v3, %v1694_v3 }
 0x490   : > { %v1824_v43 = vadd.f32 %v2619_v46, %v1823_v29 }
 0x491   : > { %v1725_v53 = vadd.f32 %v1724_v52, %v1710_v47 }
 0x493   : > { %1726 = vadd.xlane.f32.xlu2 %v1725_v53 }
 0x497   : > { %v1825_v34 = vpop.f32.mrf.mxu3 }
 0x498   : > { %v1826_v54 = vadd.f32 %v2619_v46, %v1825_v34 }
 0x49a   : > { %v2381_v62 = vpack.c.bf16 %v1826_v54, %v1824_v43 }
 0x49c   : > { %2382 = vst [vmem:[%s3830_s10] sm:$0xff] %v2381_v62  }
 0x49f   : > { %v1828_v41 = vpop.f32.mrf.mxu3 }
 0x4a0   : > { %v1829_v17 = vadd.f32 %v2619_v46, %v1828_v41 }
 0x4a7   : > { %v1830_v49 = vpop.f32.mrf.mxu3 }
 0x4a8   : > { %v1831_v58 = vadd.f32 %v2619_v46, %v1830_v49 }
 0x4aa   : > { %v2386_v1 = vpack.c.bf16 %v1831_v58, %v1829_v17 }
 0x4ac   : > { %2418 = vst [vmem:[%s3830_s10 + $0x8] sm:$0xff] %v2386_v1  }
 0x4af   : > { %v1833_v26 = vpop.f32.mrf.mxu3 }
 0x4b0   : > { %v1834_v7 = vadd.f32 %v2619_v46, %v1833_v26 }
 0x4b7   : > { %v1835_v56 = vpop.f32.mrf.mxu3 }
 0x4b8   : > { %v1836_v55 = vadd.f32 %v2619_v46, %v1835_v56 }
 0x4ba   : > { %v2391_v18 = vpack.c.bf16 %v1836_v55, %v1834_v7 }
 0x4bc   : > { %2419 = vst [vmem:[%s3830_s10 + $0x10] sm:$0xff] %v2391_v18  }
 0x4bf   : > { %v1838_v11 = vpop.f32.mrf.mxu3 }
 0x4c0   : > { %v1839_v30 = vadd.f32 %v2619_v46, %v1838_v11 }
 0x4c7   : > { %v1840_v21 = vpop.f32.mrf.mxu3 }
 0x4c8   : > { %v1841_v19 = vadd.f32 %v2619_v46, %v1840_v21 }
 0x4ca   : > { %v2396_v35 = vpack.c.bf16 %v1841_v19, %v1839_v30 }
 0x4cc   : > { %2420 = vst [vmem:[%s3830_s10 + $0x18] sm:$0xff] %v2396_v35  }
 0x4cf   : > { %v1843_v6 = vpop.f32.mrf.mxu3 }
 0x4d0   : > { %v1844_v57 = vadd.f32 %v2619_v46, %v1843_v6 }
 0x4d7   : > { %v1845_v45 = vpop.f32.mrf.mxu3 }
 0x4d8   : > { %v1846_v15 = vadd.f32 %v2619_v46, %v1845_v45 }
 0x4da   : > { %v2401_v36 = vpack.c.bf16 %v1846_v15, %v1844_v57 }
 0x4dc   : > { %2421 = vst [vmem:[%s3830_s10 + $0x20] sm:$0xff] %v2401_v36  }
 0x4df   : > { %v1848_v39 = vpop.f32.mrf.mxu3 }
 0x4e0   : > { %v1849_v42 = vadd.f32 %v2619_v46, %v1848_v39 }
 0x4e7   : > { %v1850_v2 = vpop.f32.mrf.mxu3 }
 0x4e8   : > { %v1851_v0 = vadd.f32 %v2619_v46, %v1850_v2 }
 0x4ea   : > { %v2406_v31 = vpack.c.bf16 %v1851_v0, %v1849_v42 }
 0x4ec   : > { %2422 = vst [vmem:[%s3830_s10 + $0x28] sm:$0xff] %v2406_v31  }
 0x4ff   : > { %v1853_v16 = vpop.f32.mrf.mxu3 }
 0x500   : > { %v1854_v5 = vadd.f32 %v2619_v46, %v1853_v16 }
 0x506   : > { %v1727_v37 = vpop.xlane.xlu2 %1726 }
 0x507   : > { %v1728_v9 = vrot.slane %v1727_v37, 4  ;;  %v1855_v10 = vpop.f32.mrf.mxu3 }
 0x508   : > { %v1856_v61 = vadd.f32 %v2619_v46, %v1855_v10 }
 0x509   : > { %v1729_v48 = vadd.f32 %v1728_v9, %v1727_v37 }
 0x50a   : > { %v2411_v63 = vpack.c.bf16 %v1856_v61, %v1854_v5 }
 0x50b   : > { %v1730_v38 = vrot.slane %v1729_v48, 2 }
 0x50c   : > { %2423 = vst [vmem:[%s3830_s10 + $0x30] sm:$0xff] %v2411_v63  }
 0x50d   : > { %v1731_v44 = vadd.f32 %v1730_v38, %v1729_v48 }
 0x50f   : > { %v1858_v25 = vpop.f32.mrf.mxu3  ;;  %v1732_v22 = vrot.slane %v1731_v44, 1 }
 0x510   : > { %v1859_v27 = vadd.f32 %v2619_v46, %v1858_v25 }
 0x511   : > { %v1733_v4 = vadd.f32 %v1732_v22, %v1731_v44 }
 0x513   : > { %2441 = vpush %v1733_v4 }
 0x517   : > { %v1860_v23 = vpop.f32.mrf.mxu3 }
 0x518   : > { %v1861_v51 = vadd.f32 %v2619_v46, %v1860_v23 }
 0x51a   : > { %v2416_v33 = vpack.c.bf16 %v1861_v51, %v1859_v27 }
 0x51c   : > { %2424 = vst [vmem:[%s3830_s10 + $0x38] sm:$0xff] %v2416_v33  }
 0x51d   : > { %2767 = shalt.err (!%p2764_p10)
}
 0x51e   : > { %s2856_s10 = smov 64   ;;  %s2857_s14 = smov 4  }
 0x51f   : > { %2457 = dma.vmem_to_hbm [thread:$0]  (%p2993_p0), %s1914_s1, 1024, %s1916_s3, %s1896_s13, %s2856_s10, %s2856_s10, %s2857_s14  }
 0x520   : > { %s2080_s26 = sshll.u32 %s3023_s19, 3  ;;  %s2333_s20 = sshll.u32 %s2924_s9, 3 }
 0x521   : > { %s1928_s21 = scalar_lea.hbm %s3897_s8, %s2333_s20  ;;  %s386_s11 = scalar_lea.vmem [#allocation11], %s2080_s26 }
 0x522   : > { %s1930_s16 = sshll.u32 %s386_s11, 4  ;;  %s1932_s17 = sshll.u32 %s1928_s21, 4  ;;  %s1931_s16 = int_to_ptr.vmem [resolvable:$true] %s1930_s16  ;;  %s1933_s17 = int_to_ptr.hbm [resolvable:$true] %s1932_s17 }
 0x523   : > { %s1901_s0 = scalar_lea.sflag [#allocation12], %s3023_s19  ;;  %s2782_s2 = sshra.s32 %s1933_s17, 4  ;;  %s2783_s2 = int_to_ptr.hbm [resolvable:$true] %s2782_s2 }
 0x524   : > { %s2784_s4 = scalar_lea.hbm %s2783_s2, 8  ;;  %s2788_s3 = scalar_lea.hbm %s3897_s8, 32 }
 0x525   : > { %p2785_p11 = scmp.ne.s32.totalorder %s2783_s2, %s2784_s4  ;;  %p2789_p3 = scmp.lt.s32.totalorder %s2783_s2, %s3897_s8 }
 0x526   : > { %p2790_p5 = scmp.lt.s32.totalorder %s2788_s3, %s2784_s4 }
 0x527   : > { %p2786_p12 = pnand %p2785_p11, %p2993_p0 }
 0x528   : > { %p2791_p1 = por %p2790_p5, %p2789_p3 }
 0x529   : > { %p2787_p13 = pneg %p2786_p12 }
 0x52b   : > { %p2792_p4 = pnand %p2791_p1, %p2787_p13 }
 0x544   : > { %s2442_s15 = spop %2441 }
 0x545   : > { %v1735_v59 = vstv %s2442_s15 }
 0x546   : > { %1737 = vst [vmem:[%s386_s11] sm:$0xff] %v1735_v59 }
 0x547   : > { %2795 = shalt.err (!%p2792_p4)
}
 0x548   : > { %2458 = dma.vmem_to_hbm [thread:$0]  (%p2993_p0), %s1931_s16, 128, %s1933_s17, %s1901_s0  }
 0x549 PF: > { %p2489_p8 = scmp.ge.s32.totalorder %s2846_s30, 2  ;;  %s1944_s19 = sand.u32 1, %s2834_s27  }
 0x54a   : > { %s1945_s14 = scalar_lea.sflag [#allocation4], %s1944_s19 }
 0x54b   : > { %p2476_p7 = pnand %p2489_p8, %p2938_p6 }
 0x54d   : > { %p2477_p2 = pneg %p2476_p7 }
 0x54f   : > { %2825 = dma.done.wait (%p2477_p2), %s1945_s14, 1024  }
 0x550   : > { %2827 = vsyncadd (%p2477_p2), %s1945_s14, 4294966272  ;;  %s1955_s2 = scalar_lea.sflag [#allocation12], %s1944_s19 }
 0x551   : > { %2829 = dma.done.wait (%p2477_p2), %s1955_s2, 128  }
 0x552   : > { %2831 = vsyncadd (%p2477_p2), %s1955_s2, 4294967168  ;;  %p27_p0 = scmp.ge.s32.totalorder %s2975_s18, 6   ;;  %s3964_s27 = smov %s2838_s28 }
 0x553   : > { %s3965_s28 = smov %s2842_s29  ;;  %s3966_s29 = smov %s2989_s25 }
 0x554   : > { %s3967_s30 = smov %s2975_s18  ;;  %29 = sbr.rel (!%p27_p0) target bundleno = 15 (0xf), region = 122 }
 0x559   :  { %1961 = vsyncpa [#allocation3], 1 }
 0x55a   :  { %1963 = vsyncpa [#allocation3 + $0x1], 1 }
 0x55b   :  { %1964 = vsyncpa [#allocation6], 1 }
 0x55c   :  { %1965 = vsyncpa [#allocation9], 1 }
 0x55d   :  { %1966 = vsyncpa [#allocation4], 1 }
 0x55e   :  { %1968 = vsyncpa [#allocation4 + $0x1], 1 }
 0x55f   :  { %1969 = vsyncpa [#allocation12], 1 }
 0x560   :  { %1971 = vsyncpa [#allocation12 + $0x1], 1 }

</bundles_post_ra>
